<compile_context>
chip_gen: v7x
topology: tpu7x:2x2x1
jax: 0.10.0
libtpu: 0.0.40
codegen_flags: <defaults>
</compile_context>

<pallas_src>
import jax
import jax.numpy as jnp
import numpy as np
from jax import lax
from jax.experimental import pallas as pl
from jax.experimental.pallas import tpu as pltpu

HIDDEN = 128
INPUT_LEN = 28
N_CLASSES = 10
N_LAYERS = 2  # two stacked LSTM cells, hard-wired into the kernel


def lstm_kernel(x_ref, wih0_ref, b0_ref, whh0_ref, w1_ref, b1_ref,
                h_out_ref, gx0_ref):
    """Runs the full 2-layer LSTM recurrence in one invocation.

    x_ref    : (T*B, INPUT_LEN)  time-major, row (t*B + b)
    wih0_ref : (INPUT_LEN, 4H)   layer-0 input weights (right-multiply form)
    b0_ref   : (1, 4H)           fused b_ih0 + b_hh0
    whh0_ref : (H, 4H)           layer-0 recurrent weights
    w1_ref   : (2H, 4H)          stacked [W_ih1 ; W_hh1] for a fused matmul
    b1_ref   : (1, 4H)           fused b_ih1 + b_hh1
    h_out_ref: (B, H)            final top-layer hidden state
    gx0_ref  : (T*B, 4H) scratch for the hoisted layer-0 input projection
    """
    B, H = h_out_ref.shape
    TB = x_ref.shape[0]
    T = TB // B

    # Hoisted layer-0 input projection: one big MXU matmul for all timesteps.
    gx0_ref[...] = (jnp.dot(x_ref[...], wih0_ref[...],
                            preferred_element_type=jnp.float32)
                    + b0_ref[...])

    # Hoist weight reads / bias broadcast out of the time loop
    # (JAX does not CSE broadcast_in_dim inside the loop body).
    w_hh0 = whh0_ref[...]
    w1 = w1_ref[...]
    b1 = jnp.broadcast_to(b1_ref[...], (B, 4 * H))

    def gates_to_hc(gates, c):
        # PyTorch gate order: i, f, g, o
        i = jax.nn.sigmoid(gates[:, 0 * H:1 * H])
        f = jax.nn.sigmoid(gates[:, 1 * H:2 * H])
        g = jnp.tanh(gates[:, 2 * H:3 * H])
        o = jax.nn.sigmoid(gates[:, 3 * H:4 * H])
        c_new = f * c + i * g
        h_new = o * jnp.tanh(c_new)
        return h_new, c_new

    def step(t, carry):
        h0, c0, h1, c1 = carry
        row = pl.multiple_of(t * B, B)  # B=8 -> sublane-aligned dynamic offset
        # Layer 0: input projection already computed; only the recurrent matmul
        # sits on the serial chain.
        gates0 = gx0_ref[pl.ds(row, B), :] + jnp.dot(
            h0, w_hh0, preferred_element_type=jnp.float32)
        h0, c0 = gates_to_hc(gates0, c0)
        # Layer 1: single fused matmul over concat([layer-0 h, own h]).
        gates1 = jnp.dot(jnp.concatenate([h0, h1], axis=1), w1,
                         preferred_element_type=jnp.float32) + b1
        h1, c1 = gates_to_hc(gates1, c1)
        return h0, c0, h1, c1

    zeros = jnp.zeros((B, H), jnp.float32)  # zero-init h/c (matches torch.zeros)
    _, _, h1, _ = lax.fori_loop(0, T, step, (zeros, zeros, zeros, zeros),
                                unroll=True)
    h_out_ref[...] = h1


def lstm_forward(x, raw_params):
    """x: (B, T, INPUT_LEN) float32 -> logits (B, N_CLASSES) float32."""
    (w_ih0, w_hh0, b_ih0, b_hh0,
     w_ih1, w_hh1, b_ih1, b_hh1,
     w_out, b_out) = raw_params
    B, T, F = x.shape
    assert F == INPUT_LEN

    # Time-major, flattened so the kernel slices (B, F) rows per step.
    x_flat = jnp.transpose(x, (1, 0, 2)).reshape(T * B, F)

    # Pre-transpose to right-multiply form; fuse biases; stack layer-1 weights.
    wih0_t = w_ih0.T                                   # (F, 4H)
    b0 = (b_ih0 + b_hh0)[None, :]                      # (1, 4H)
    whh0_t = w_hh0.T                                   # (H, 4H)
    w1 = jnp.concatenate([w_ih1.T, w_hh1.T], axis=0)   # (2H, 4H)
    b1 = (b_ih1 + b_hh1)[None, :]                      # (1, 4H)

    full = lambda i: (0, 0)
    grid_spec = pltpu.PrefetchScalarGridSpec(
        num_scalar_prefetch=0,
        grid=(1,),
        in_specs=[
            pl.BlockSpec((T * B, INPUT_LEN), full),      # x (whole sequence)
            pl.BlockSpec((INPUT_LEN, 4 * HIDDEN), full),  # W_ih layer 0 (T)
            pl.BlockSpec((1, 4 * HIDDEN), full),          # b layer 0
            pl.BlockSpec((HIDDEN, 4 * HIDDEN), full),     # W_hh layer 0 (T)
            pl.BlockSpec((2 * HIDDEN, 4 * HIDDEN), full), # [W_ih1; W_hh1] (T)
            pl.BlockSpec((1, 4 * HIDDEN), full),          # b layer 1
        ],
        out_specs=pl.BlockSpec((B, HIDDEN), full),        # final h1 (lane-dense)
        scratch_shapes=[pltpu.VMEM((T * B, 4 * HIDDEN), jnp.float32)],
    )

    h_last = pl.pallas_call(
        lstm_kernel,
        out_shape=jax.ShapeDtypeStruct((B, HIDDEN), jnp.float32),
        grid_spec=grid_spec,
        compiler_params=pltpu.CompilerParams(
            dimension_semantics=("arbitrary",)),
    )(x_flat, wih0_t, b0, whh0_t, w1, b1)

    # Final Linear head (10 output lanes) kept outside the kernel: avoids masked
    # narrow-lane stores / a 10-column MXU matmul, and lets XLA fuse it freely.
    return h_last @ w_out.T + b_out


def init_params(key):
    """Deterministic PyTorch-style uniform(-1/sqrt(H), 1/sqrt(H)) init (raw layout)."""
    k = 1.0 / np.sqrt(HIDDEN)
    keys = jax.random.split(key, 10)

    def u(kk, shape):
        return jax.random.uniform(kk, shape, jnp.float32, -k, k)

    w_ih0 = u(keys[0], (4 * HIDDEN, INPUT_LEN))
    w_hh0 = u(keys[1], (4 * HIDDEN, HIDDEN))
    b_ih0 = u(keys[2], (4 * HIDDEN,))
    b_hh0 = u(keys[3], (4 * HIDDEN,))
    w_ih1 = u(keys[4], (4 * HIDDEN, HIDDEN))
    w_hh1 = u(keys[5], (4 * HIDDEN, HIDDEN))
    b_ih1 = u(keys[6], (4 * HIDDEN,))
    b_hh1 = u(keys[7], (4 * HIDDEN,))
    w_out = u(keys[8], (N_CLASSES, HIDDEN))
    b_out = u(keys[9], (N_CLASSES,))
    return (w_ih0, w_hh0, b_ih0, b_hh0,
            w_ih1, w_hh1, b_ih1, b_hh1,
            w_out, b_out)


def reference_forward(x, raw_params):
    """Pure-JAX reference (same math as nn.LSTM(2 layers) + nn.Linear)."""
    (w_ih0, w_hh0, b_ih0, b_hh0,
     w_ih1, w_hh1, b_ih1, b_hh1,
     w_out, b_out) = raw_params
    B, T, _ = x.shape
    H = HIDDEN

    def cell(x_t, h, c, w_ih, w_hh, b_ih, b_hh):
        g = x_t @ w_ih.T + b_ih + h @ w_hh.T + b_hh
        i = jax.nn.sigmoid(g[:, 0 * H:1 * H])
        f = jax.nn.sigmoid(g[:, 1 * H:2 * H])
        gg = jnp.tanh(g[:, 2 * H:3 * H])
        o = jax.nn.sigmoid(g[:, 3 * H:4 * H])
        c_new = f * c + i * gg
        return o * jnp.tanh(c_new), c_new

    h0 = c0 = h1 = c1 = jnp.zeros((B, H), jnp.float32)
    for t in range(T):
        h0, c0 = cell(x[:, t, :], h0, c0, w_ih0, w_hh0, b_ih0, b_hh0)
        h1, c1 = cell(h0, h1, c1, w_ih1, w_hh1, b_ih1, b_hh1)
    return h1 @ w_out.T + b_out


if __name__ == "__main__":
    B, T = 8, 8  # small batch / sequence; feature dim fixed at INPUT_LEN=28
    key = jax.random.PRNGKey(0)
    kx, kp = jax.random.split(key)
    x = jax.random.normal(kx, (B, T, INPUT_LEN), jnp.float32)
    params = init_params(kp)

    out = lstm_forward(x, params)
    out = jax.block_until_ready(out)

    ref = reference_forward(x, params)
    np.testing.assert_allclose(np.asarray(out), np.asarray(ref),
                               rtol=1e-3, atol=1e-3)

    assert out.shape == (B, N_CLASSES)
    print("KERNEL_OK")
</pallas_src>

<mosaic_0001>
module attributes {stable_mosaic.version = 11 : i64} {
  func.func @lstm_kernel(%arg0: i32, %arg1: memref<64x28xf32, #tpu.memory_space<vmem>>, %arg2: memref<28x512xf32, #tpu.memory_space<vmem>>, %arg3: memref<1x512xf32, #tpu.memory_space<vmem>>, %arg4: memref<128x512xf32, #tpu.memory_space<vmem>>, %arg5: memref<256x512xf32, #tpu.memory_space<vmem>>, %arg6: memref<1x512xf32, #tpu.memory_space<vmem>>, %arg7: memref<8x128xf32, #tpu.memory_space<vmem>>, %arg8: memref<64x512xf32, #tpu.memory_space<vmem>>) attributes {dimension_semantics = [#tpu.dimension_semantics<arbitrary>], iteration_bounds = array<i64: 1>, scalar_prefetch = 0 : i64, scratch_operands = 1 : i64, tpu.core_type = #tpu.core_type<tc>, window_params = [{pipeline_mode = #tpu.pipeline_mode<synchronous>, transform_indices = @transform_0, window_bounds = array<i64: 64, 28>}, {pipeline_mode = #tpu.pipeline_mode<synchronous>, transform_indices = @transform_1, window_bounds = array<i64: 28, 512>}, {pipeline_mode = #tpu.pipeline_mode<synchronous>, transform_indices = @transform_2, window_bounds = array<i64: 1, 512>}, {pipeline_mode = #tpu.pipeline_mode<synchronous>, transform_indices = @transform_3, window_bounds = array<i64: 128, 512>}, {pipeline_mode = #tpu.pipeline_mode<synchronous>, transform_indices = @transform_4, window_bounds = array<i64: 256, 512>}, {pipeline_mode = #tpu.pipeline_mode<synchronous>, transform_indices = @transform_5, window_bounds = array<i64: 1, 512>}, {pipeline_mode = #tpu.pipeline_mode<synchronous>, transform_indices = @transform_6, window_bounds = array<i64: 8, 128>}]} {
    %c0 = arith.constant 0 : index
    %c0_0 = arith.constant 0 : index
    %0 = vector.load %arg1[%c0, %c0_0] : memref<64x28xf32, #tpu.memory_space<vmem>>, vector<64x28xf32>
    %c0_1 = arith.constant 0 : index
    %c0_2 = arith.constant 0 : index
    %1 = vector.load %arg2[%c0_1, %c0_2] : memref<28x512xf32, #tpu.memory_space<vmem>>, vector<28x512xf32>
    %cst = arith.constant dense<0.000000e+00> : vector<64x512xf32>
    %2 = tpu.matmul %0, %1, %cst {dimension_numbers = #tpu.dot_dimension_numbers<[1], [0], [0], [1], [0, 0, 1, 1], [], []>} : vector<64x28xf32>, vector<28x512xf32>, vector<64x512xf32> -> vector<64x512xf32>
    %c0_3 = arith.constant 0 : index
    %c0_4 = arith.constant 0 : index
    %3 = vector.load %arg3[%c0_3, %c0_4] : memref<1x512xf32, #tpu.memory_space<vmem>>, vector<1x512xf32>
    %4 = vector.broadcast %3 : vector<1x512xf32> to vector<64x512xf32>
    %5 = arith.addf %2, %4 : vector<64x512xf32>
    %c0_5 = arith.constant 0 : index
    %c0_6 = arith.constant 0 : index
    %6 = vector.load %arg8[%c0_5, %c0_6] : memref<64x512xf32, #tpu.memory_space<vmem>>, vector<64x512xf32>
    tpu.vector_store %arg8[%c0_5, %c0_6], %5 {strides = array<i32>} : memref<64x512xf32, #tpu.memory_space<vmem>>, vector<64x512xf32>,
    %c0_7 = arith.constant 0 : index
    %c0_8 = arith.constant 0 : index
    %7 = vector.load %arg4[%c0_7, %c0_8] : memref<128x512xf32, #tpu.memory_space<vmem>>, vector<128x512xf32>
    %c0_9 = arith.constant 0 : index
    %c0_10 = arith.constant 0 : index
    %8 = vector.load %arg5[%c0_9, %c0_10] : memref<256x512xf32, #tpu.memory_space<vmem>>, vector<256x512xf32>
    %c0_11 = arith.constant 0 : index
    %c0_12 = arith.constant 0 : index
    %9 = vector.load %arg6[%c0_11, %c0_12] : memref<1x512xf32, #tpu.memory_space<vmem>>, vector<1x512xf32>
    %10 = vector.shape_cast %9 : vector<1x512xf32> to vector<1x512xf32>
    %11 = vector.broadcast %10 : vector<1x512xf32> to vector<8x512xf32>
    %cst_13 = arith.constant 0.000000e+00 : f32
    %12 = vector.broadcast %cst_13 : f32 to vector<8x128xf32>
    %c0_i32 = arith.constant 0 : i32
    %c8_i32 = arith.constant 8 : i32
    %13 = arith.muli %c0_i32, %c8_i32 : i32
    %14 = tpu.assume_multiple %13, 8 : i32
    %15 = arith.index_cast %14 : i32 to index
    %c0_14 = arith.constant 0 : index
    %16 = vector.load %arg8[%15, %c0_14] : memref<64x512xf32, #tpu.memory_space<vmem>>, vector<8x512xf32>
    %cst_15 = arith.constant dense<0.000000e+00> : vector<8x512xf32>
    %17 = tpu.matmul %12, %7, %cst_15 {dimension_numbers = #tpu.dot_dimension_numbers<[1], [0], [0], [1], [0, 0, 1, 1], [], []>} : vector<8x128xf32>, vector<128x512xf32>, vector<8x512xf32> -> vector<8x512xf32>
    %18 = arith.addf %16, %17 : vector<8x512xf32>
    %19 = vector.extract_strided_slice %18 {offsets = [0, 0], sizes = [8, 128], strides = [1, 1]} : vector<8x512xf32> to vector<8x128xf32>
    %20 = arith.negf %19 : vector<8x128xf32>
    %21 = math.exp %20 : vector<8x128xf32>
    %cst_16 = arith.constant 1.000000e+00 : f32
    %22 = vector.broadcast %cst_16 : f32 to vector<8x128xf32>
    %23 = arith.addf %22, %21 : vector<8x128xf32>
    %24 = arith.divf %22, %23 : vector<8x128xf32>
    %25 = vector.extract_strided_slice %18 {offsets = [0, 128], sizes = [8, 128], strides = [1, 1]} : vector<8x512xf32> to vector<8x128xf32>
    %26 = arith.negf %25 : vector<8x128xf32>
    %27 = math.exp %26 : vector<8x128xf32>
    %cst_17 = arith.constant 1.000000e+00 : f32
    %28 = vector.broadcast %cst_17 : f32 to vector<8x128xf32>
    %29 = arith.addf %28, %27 : vector<8x128xf32>
    %30 = arith.divf %28, %29 : vector<8x128xf32>
    %31 = vector.extract_strided_slice %18 {offsets = [0, 256], sizes = [8, 128], strides = [1, 1]} : vector<8x512xf32> to vector<8x128xf32>
    %32 = math.tanh %31 : vector<8x128xf32>
    %33 = vector.extract_strided_slice %18 {offsets = [0, 384], sizes = [8, 128], strides = [1, 1]} : vector<8x512xf32> to vector<8x128xf32>
    %34 = arith.negf %33 : vector<8x128xf32>
    %35 = math.exp %34 : vector<8x128xf32>
    %cst_18 = arith.constant 1.000000e+00 : f32
    %36 = vector.broadcast %cst_18 : f32 to vector<8x128xf32>
    %37 = arith.addf %36, %35 : vector<8x128xf32>
    %38 = arith.divf %36, %37 : vector<8x128xf32>
    %39 = arith.mulf %30, %12 : vector<8x128xf32>
    %40 = arith.mulf %24, %32 : vector<8x128xf32>
    %41 = arith.addf %39, %40 : vector<8x128xf32>
    %42 = math.tanh %41 : vector<8x128xf32>
    %43 = arith.mulf %38, %42 : vector<8x128xf32>
    %44 = tpu.concatenate %43, %12 in 1 : vector<8x128xf32>, vector<8x128xf32> -> vector<8x256xf32>
    %cst_19 = arith.constant dense<0.000000e+00> : vector<8x512xf32>
    %45 = tpu.matmul %44, %8, %cst_19 {dimension_numbers = #tpu.dot_dimension_numbers<[1], [0], [0], [1], [0, 0, 1, 1], [], []>} : vector<8x256xf32>, vector<256x512xf32>, vector<8x512xf32> -> vector<8x512xf32>
    %46 = arith.addf %45, %11 : vector<8x512xf32>
    %47 = vector.extract_strided_slice %46 {offsets = [0, 0], sizes = [8, 128], strides = [1, 1]} : vector<8x512xf32> to vector<8x128xf32>
    %48 = arith.negf %47 : vector<8x128xf32>
    %49 = math.exp %48 : vector<8x128xf32>
    %cst_20 = arith.constant 1.000000e+00 : f32
    %50 = vector.broadcast %cst_20 : f32 to vector<8x128xf32>
    %51 = arith.addf %50, %49 : vector<8x128xf32>
    %52 = arith.divf %50, %51 : vector<8x128xf32>
    %53 = vector.extract_strided_slice %46 {offsets = [0, 128], sizes = [8, 128], strides = [1, 1]} : vector<8x512xf32> to vector<8x128xf32>
    %54 = arith.negf %53 : vector<8x128xf32>
    %55 = math.exp %54 : vector<8x128xf32>
    %cst_21 = arith.constant 1.000000e+00 : f32
    %56 = vector.broadcast %cst_21 : f32 to vector<8x128xf32>
    %57 = arith.addf %56, %55 : vector<8x128xf32>
    %58 = arith.divf %56, %57 : vector<8x128xf32>
    %59 = vector.extract_strided_slice %46 {offsets = [0, 256], sizes = [8, 128], strides = [1, 1]} : vector<8x512xf32> to vector<8x128xf32>
    %60 = math.tanh %59 : vector<8x128xf32>
    %61 = vector.extract_strided_slice %46 {offsets = [0, 384], sizes = [8, 128], strides = [1, 1]} : vector<8x512xf32> to vector<8x128xf32>
    %62 = arith.negf %61 : vector<8x128xf32>
    %63 = math.exp %62 : vector<8x128xf32>
    %cst_22 = arith.constant 1.000000e+00 : f32
    %64 = vector.broadcast %cst_22 : f32 to vector<8x128xf32>
    %65 = arith.addf %64, %63 : vector<8x128xf32>
    %66 = arith.divf %64, %65 : vector<8x128xf32>
    %67 = arith.mulf %58, %12 : vector<8x128xf32>
    %68 = arith.mulf %52, %60 : vector<8x128xf32>
    %69 = arith.addf %67, %68 : vector<8x128xf32>
    %70 = math.tanh %69 : vector<8x128xf32>
    %71 = arith.mulf %66, %70 : vector<8x128xf32>
    %c1_i32 = arith.constant 1 : i32
    %c8_i32_23 = arith.constant 8 : i32
    %72 = arith.muli %c1_i32, %c8_i32_23 : i32
    %73 = tpu.assume_multiple %72, 8 : i32
    %74 = arith.index_cast %73 : i32 to index
    %c0_24 = arith.constant 0 : index
    %75 = vector.load %arg8[%74, %c0_24] : memref<64x512xf32, #tpu.memory_space<vmem>>, vector<8x512xf32>
    %cst_25 = arith.constant dense<0.000000e+00> : vector<8x512xf32>
    %76 = tpu.matmul %43, %7, %cst_25 {dimension_numbers = #tpu.dot_dimension_numbers<[1], [0], [0], [1], [0, 0, 1, 1], [], []>} : vector<8x128xf32>, vector<128x512xf32>, vector<8x512xf32> -> vector<8x512xf32>
    %77 = arith.addf %75, %76 : vector<8x512xf32>
    %78 = vector.extract_strided_slice %77 {offsets = [0, 0], sizes = [8, 128], strides = [1, 1]} : vector<8x512xf32> to vector<8x128xf32>
    %79 = arith.negf %78 : vector<8x128xf32>
    %80 = math.exp %79 : vector<8x128xf32>
    %cst_26 = arith.constant 1.000000e+00 : f32
    %81 = vector.broadcast %cst_26 : f32 to vector<8x128xf32>
    %82 = arith.addf %81, %80 : vector<8x128xf32>
    %83 = arith.divf %81, %82 : vector<8x128xf32>
    %84 = vector.extract_strided_slice %77 {offsets = [0, 128], sizes = [8, 128], strides = [1, 1]} : vector<8x512xf32> to vector<8x128xf32>
    %85 = arith.negf %84 : vector<8x128xf32>
    %86 = math.exp %85 : vector<8x128xf32>
    %cst_27 = arith.constant 1.000000e+00 : f32
    %87 = vector.broadcast %cst_27 : f32 to vector<8x128xf32>
    %88 = arith.addf %87, %86 : vector<8x128xf32>
    %89 = arith.divf %87, %88 : vector<8x128xf32>
    %90 = vector.extract_strided_slice %77 {offsets = [0, 256], sizes = [8, 128], strides = [1, 1]} : vector<8x512xf32> to vector<8x128xf32>
    %91 = math.tanh %90 : vector<8x128xf32>
    %92 = vector.extract_strided_slice %77 {offsets = [0, 384], sizes = [8, 128], strides = [1, 1]} : vector<8x512xf32> to vector<8x128xf32>
    %93 = arith.negf %92 : vector<8x128xf32>
    %94 = math.exp %93 : vector<8x128xf32>
    %cst_28 = arith.constant 1.000000e+00 : f32
    %95 = vector.broadcast %cst_28 : f32 to vector<8x128xf32>
    %96 = arith.addf %95, %94 : vector<8x128xf32>
    %97 = arith.divf %95, %96 : vector<8x128xf32>
    %98 = arith.mulf %89, %41 : vector<8x128xf32>
    %99 = arith.mulf %83, %91 : vector<8x128xf32>
    %100 = arith.addf %98, %99 : vector<8x128xf32>
    %101 = math.tanh %100 : vector<8x128xf32>
    %102 = arith.mulf %97, %101 : vector<8x128xf32>
    %103 = tpu.concatenate %102, %71 in 1 : vector<8x128xf32>, vector<8x128xf32> -> vector<8x256xf32>
    %cst_29 = arith.constant dense<0.000000e+00> : vector<8x512xf32>
    %104 = tpu.matmul %103, %8, %cst_29 {dimension_numbers = #tpu.dot_dimension_numbers<[1], [0], [0], [1], [0, 0, 1, 1], [], []>} : vector<8x256xf32>, vector<256x512xf32>, vector<8x512xf32> -> vector<8x512xf32>
    %105 = arith.addf %104, %11 : vector<8x512xf32>
    %106 = vector.extract_strided_slice %105 {offsets = [0, 0], sizes = [8, 128], strides = [1, 1]} : vector<8x512xf32> to vector<8x128xf32>
    %107 = arith.negf %106 : vector<8x128xf32>
    %108 = math.exp %107 : vector<8x128xf32>
    %cst_30 = arith.constant 1.000000e+00 : f32
    %109 = vector.broadcast %cst_30 : f32 to vector<8x128xf32>
    %110 = arith.addf %109, %108 : vector<8x128xf32>
    %111 = arith.divf %109, %110 : vector<8x128xf32>
    %112 = vector.extract_strided_slice %105 {offsets = [0, 128], sizes = [8, 128], strides = [1, 1]} : vector<8x512xf32> to vector<8x128xf32>
    %113 = arith.negf %112 : vector<8x128xf32>
    %114 = math.exp %113 : vector<8x128xf32>
    %cst_31 = arith.constant 1.000000e+00 : f32
    %115 = vector.broadcast %cst_31 : f32 to vector<8x128xf32>
    %116 = arith.addf %115, %114 : vector<8x128xf32>
    %117 = arith.divf %115, %116 : vector<8x128xf32>
    %118 = vector.extract_strided_slice %105 {offsets = [0, 256], sizes = [8, 128], strides = [1, 1]} : vector<8x512xf32> to vector<8x128xf32>
    %119 = math.tanh %118 : vector<8x128xf32>
    %120 = vector.extract_strided_slice %105 {offsets = [0, 384], sizes = [8, 128], strides = [1, 1]} : vector<8x512xf32> to vector<8x128xf32>
    %121 = arith.negf %120 : vector<8x128xf32>
    %122 = math.exp %121 : vector<8x128xf32>
    %cst_32 = arith.constant 1.000000e+00 : f32
    %123 = vector.broadcast %cst_32 : f32 to vector<8x128xf32>
    %124 = arith.addf %123, %122 : vector<8x128xf32>
    %125 = arith.divf %123, %124 : vector<8x128xf32>
    %126 = arith.mulf %117, %69 : vector<8x128xf32>
    %127 = arith.mulf %111, %119 : vector<8x128xf32>
    %128 = arith.addf %126, %127 : vector<8x128xf32>
    %129 = math.tanh %128 : vector<8x128xf32>
    %130 = arith.mulf %125, %129 : vector<8x128xf32>
    %c2_i32 = arith.constant 2 : i32
    %c8_i32_33 = arith.constant 8 : i32
    %131 = arith.muli %c2_i32, %c8_i32_33 : i32
    %132 = tpu.assume_multiple %131, 8 : i32
    %133 = arith.index_cast %132 : i32 to index
    %c0_34 = arith.constant 0 : index
    %134 = vector.load %arg8[%133, %c0_34] : memref<64x512xf32, #tpu.memory_space<vmem>>, vector<8x512xf32>
    %cst_35 = arith.constant dense<0.000000e+00> : vector<8x512xf32>
    %135 = tpu.matmul %102, %7, %cst_35 {dimension_numbers = #tpu.dot_dimension_numbers<[1], [0], [0], [1], [0, 0, 1, 1], [], []>} : vector<8x128xf32>, vector<128x512xf32>, vector<8x512xf32> -> vector<8x512xf32>
    %136 = arith.addf %134, %135 : vector<8x512xf32>
    %137 = vector.extract_strided_slice %136 {offsets = [0, 0], sizes = [8, 128], strides = [1, 1]} : vector<8x512xf32> to vector<8x128xf32>
    %138 = arith.negf %137 : vector<8x128xf32>
    %139 = math.exp %138 : vector<8x128xf32>
    %cst_36 = arith.constant 1.000000e+00 : f32
    %140 = vector.broadcast %cst_36 : f32 to vector<8x128xf32>
    %141 = arith.addf %140, %139 : vector<8x128xf32>
    %142 = arith.divf %140, %141 : vector<8x128xf32>
    %143 = vector.extract_strided_slice %136 {offsets = [0, 128], sizes = [8, 128], strides = [1, 1]} : vector<8x512xf32> to vector<8x128xf32>
    %144 = arith.negf %143 : vector<8x128xf32>
    %145 = math.exp %144 : vector<8x128xf32>
    %cst_37 = arith.constant 1.000000e+00 : f32
    %146 = vector.broadcast %cst_37 : f32 to vector<8x128xf32>
    %147 = arith.addf %146, %145 : vector<8x128xf32>
    %148 = arith.divf %146, %147 : vector<8x128xf32>
    %149 = vector.extract_strided_slice %136 {offsets = [0, 256], sizes = [8, 128], strides = [1, 1]} : vector<8x512xf32> to vector<8x128xf32>
    %150 = math.tanh %149 : vector<8x128xf32>
    %151 = vector.extract_strided_slice %136 {offsets = [0, 384], sizes = [8, 128], strides = [1, 1]} : vector<8x512xf32> to vector<8x128xf32>
    %152 = arith.negf %151 : vector<8x128xf32>
    %153 = math.exp %152 : vector<8x128xf32>
    %cst_38 = arith.constant 1.000000e+00 : f32
    %154 = vector.broadcast %cst_38 : f32 to vector<8x128xf32>
    %155 = arith.addf %154, %153 : vector<8x128xf32>
    %156 = arith.divf %154, %155 : vector<8x128xf32>
    %157 = arith.mulf %148, %100 : vector<8x128xf32>
    %158 = arith.mulf %142, %150 : vector<8x128xf32>
    %159 = arith.addf %157, %158 : vector<8x128xf32>
    %160 = math.tanh %159 : vector<8x128xf32>
    %161 = arith.mulf %156, %160 : vector<8x128xf32>
    %162 = tpu.concatenate %161, %130 in 1 : vector<8x128xf32>, vector<8x128xf32> -> vector<8x256xf32>
    %cst_39 = arith.constant dense<0.000000e+00> : vector<8x512xf32>
    %163 = tpu.matmul %162, %8, %cst_39 {dimension_numbers = #tpu.dot_dimension_numbers<[1], [0], [0], [1], [0, 0, 1, 1], [], []>} : vector<8x256xf32>, vector<256x512xf32>, vector<8x512xf32> -> vector<8x512xf32>
    %164 = arith.addf %163, %11 : vector<8x512xf32>
    %165 = vector.extract_strided_slice %164 {offsets = [0, 0], sizes = [8, 128], strides = [1, 1]} : vector<8x512xf32> to vector<8x128xf32>
    %166 = arith.negf %165 : vector<8x128xf32>
    %167 = math.exp %166 : vector<8x128xf32>
    %cst_40 = arith.constant 1.000000e+00 : f32
    %168 = vector.broadcast %cst_40 : f32 to vector<8x128xf32>
    %169 = arith.addf %168, %167 : vector<8x128xf32>
    %170 = arith.divf %168, %169 : vector<8x128xf32>
    %171 = vector.extract_strided_slice %164 {offsets = [0, 128], sizes = [8, 128], strides = [1, 1]} : vector<8x512xf32> to vector<8x128xf32>
    %172 = arith.negf %171 : vector<8x128xf32>
    %173 = math.exp %172 : vector<8x128xf32>
    %cst_41 = arith.constant 1.000000e+00 : f32
    %174 = vector.broadcast %cst_41 : f32 to vector<8x128xf32>
    %175 = arith.addf %174, %173 : vector<8x128xf32>
    %176 = arith.divf %174, %175 : vector<8x128xf32>
    %177 = vector.extract_strided_slice %164 {offsets = [0, 256], sizes = [8, 128], strides = [1, 1]} : vector<8x512xf32> to vector<8x128xf32>
    %178 = math.tanh %177 : vector<8x128xf32>
    %179 = vector.extract_strided_slice %164 {offsets = [0, 384], sizes = [8, 128], strides = [1, 1]} : vector<8x512xf32> to vector<8x128xf32>
    %180 = arith.negf %179 : vector<8x128xf32>
    %181 = math.exp %180 : vector<8x128xf32>
    %cst_42 = arith.constant 1.000000e+00 : f32
    %182 = vector.broadcast %cst_42 : f32 to vector<8x128xf32>
    %183 = arith.addf %182, %181 : vector<8x128xf32>
    %184 = arith.divf %182, %183 : vector<8x128xf32>
    %185 = arith.mulf %176, %128 : vector<8x128xf32>
    %186 = arith.mulf %170, %178 : vector<8x128xf32>
    %187 = arith.addf %185, %186 : vector<8x128xf32>
    %188 = math.tanh %187 : vector<8x128xf32>
    %189 = arith.mulf %184, %188 : vector<8x128xf32>
    %c3_i32 = arith.constant 3 : i32
    %c8_i32_43 = arith.constant 8 : i32
    %190 = arith.muli %c3_i32, %c8_i32_43 : i32
    %191 = tpu.assume_multiple %190, 8 : i32
    %192 = arith.index_cast %191 : i32 to index
    %c0_44 = arith.constant 0 : index
    %193 = vector.load %arg8[%192, %c0_44] : memref<64x512xf32, #tpu.memory_space<vmem>>, vector<8x512xf32>
    %cst_45 = arith.constant dense<0.000000e+00> : vector<8x512xf32>
    %194 = tpu.matmul %161, %7, %cst_45 {dimension_numbers = #tpu.dot_dimension_numbers<[1], [0], [0], [1], [0, 0, 1, 1], [], []>} : vector<8x128xf32>, vector<128x512xf32>, vector<8x512xf32> -> vector<8x512xf32>
    %195 = arith.addf %193, %194 : vector<8x512xf32>
    %196 = vector.extract_strided_slice %195 {offsets = [0, 0], sizes = [8, 128], strides = [1, 1]} : vector<8x512xf32> to vector<8x128xf32>
    %197 = arith.negf %196 : vector<8x128xf32>
    %198 = math.exp %197 : vector<8x128xf32>
    %cst_46 = arith.constant 1.000000e+00 : f32
    %199 = vector.broadcast %cst_46 : f32 to vector<8x128xf32>
    %200 = arith.addf %199, %198 : vector<8x128xf32>
    %201 = arith.divf %199, %200 : vector<8x128xf32>
    %202 = vector.extract_strided_slice %195 {offsets = [0, 128], sizes = [8, 128], strides = [1, 1]} : vector<8x512xf32> to vector<8x128xf32>
    %203 = arith.negf %202 : vector<8x128xf32>
    %204 = math.exp %203 : vector<8x128xf32>
    %cst_47 = arith.constant 1.000000e+00 : f32
    %205 = vector.broadcast %cst_47 : f32 to vector<8x128xf32>
    %206 = arith.addf %205, %204 : vector<8x128xf32>
    %207 = arith.divf %205, %206 : vector<8x128xf32>
    %208 = vector.extract_strided_slice %195 {offsets = [0, 256], sizes = [8, 128], strides = [1, 1]} : vector<8x512xf32> to vector<8x128xf32>
    %209 = math.tanh %208 : vector<8x128xf32>
    %210 = vector.extract_strided_slice %195 {offsets = [0, 384], sizes = [8, 128], strides = [1, 1]} : vector<8x512xf32> to vector<8x128xf32>
    %211 = arith.negf %210 : vector<8x128xf32>
    %212 = math.exp %211 : vector<8x128xf32>
    %cst_48 = arith.constant 1.000000e+00 : f32
    %213 = vector.broadcast %cst_48 : f32 to vector<8x128xf32>
    %214 = arith.addf %213, %212 : vector<8x128xf32>
    %215 = arith.divf %213, %214 : vector<8x128xf32>
    %216 = arith.mulf %207, %159 : vector<8x128xf32>
    %217 = arith.mulf %201, %209 : vector<8x128xf32>
    %218 = arith.addf %216, %217 : vector<8x128xf32>
    %219 = math.tanh %218 : vector<8x128xf32>
    %220 = arith.mulf %215, %219 : vector<8x128xf32>
    %221 = tpu.concatenate %220, %189 in 1 : vector<8x128xf32>, vector<8x128xf32> -> vector<8x256xf32>
    %cst_49 = arith.constant dense<0.000000e+00> : vector<8x512xf32>
    %222 = tpu.matmul %221, %8, %cst_49 {dimension_numbers = #tpu.dot_dimension_numbers<[1], [0], [0], [1], [0, 0, 1, 1], [], []>} : vector<8x256xf32>, vector<256x512xf32>, vector<8x512xf32> -> vector<8x512xf32>
    %223 = arith.addf %222, %11 : vector<8x512xf32>
    %224 = vector.extract_strided_slice %223 {offsets = [0, 0], sizes = [8, 128], strides = [1, 1]} : vector<8x512xf32> to vector<8x128xf32>
    %225 = arith.negf %224 : vector<8x128xf32>
    %226 = math.exp %225 : vector<8x128xf32>
    %cst_50 = arith.constant 1.000000e+00 : f32
    %227 = vector.broadcast %cst_50 : f32 to vector<8x128xf32>
    %228 = arith.addf %227, %226 : vector<8x128xf32>
    %229 = arith.divf %227, %228 : vector<8x128xf32>
    %230 = vector.extract_strided_slice %223 {offsets = [0, 128], sizes = [8, 128], strides = [1, 1]} : vector<8x512xf32> to vector<8x128xf32>
    %231 = arith.negf %230 : vector<8x128xf32>
    %232 = math.exp %231 : vector<8x128xf32>
    %cst_51 = arith.constant 1.000000e+00 : f32
    %233 = vector.broadcast %cst_51 : f32 to vector<8x128xf32>
    %234 = arith.addf %233, %232 : vector<8x128xf32>
    %235 = arith.divf %233, %234 : vector<8x128xf32>
    %236 = vector.extract_strided_slice %223 {offsets = [0, 256], sizes = [8, 128], strides = [1, 1]} : vector<8x512xf32> to vector<8x128xf32>
    %237 = math.tanh %236 : vector<8x128xf32>
    %238 = vector.extract_strided_slice %223 {offsets = [0, 384], sizes = [8, 128], strides = [1, 1]} : vector<8x512xf32> to vector<8x128xf32>
    %239 = arith.negf %238 : vector<8x128xf32>
    %240 = math.exp %239 : vector<8x128xf32>
    %cst_52 = arith.constant 1.000000e+00 : f32
    %241 = vector.broadcast %cst_52 : f32 to vector<8x128xf32>
    %242 = arith.addf %241, %240 : vector<8x128xf32>
    %243 = arith.divf %241, %242 : vector<8x128xf32>
    %244 = arith.mulf %235, %187 : vector<8x128xf32>
    %245 = arith.mulf %229, %237 : vector<8x128xf32>
    %246 = arith.addf %244, %245 : vector<8x128xf32>
    %247 = math.tanh %246 : vector<8x128xf32>
    %248 = arith.mulf %243, %247 : vector<8x128xf32>
    %c4_i32 = arith.constant 4 : i32
    %c8_i32_53 = arith.constant 8 : i32
    %249 = arith.muli %c4_i32, %c8_i32_53 : i32
    %250 = tpu.assume_multiple %249, 8 : i32
    %251 = arith.index_cast %250 : i32 to index
    %c0_54 = arith.constant 0 : index
    %252 = vector.load %arg8[%251, %c0_54] : memref<64x512xf32, #tpu.memory_space<vmem>>, vector<8x512xf32>
    %cst_55 = arith.constant dense<0.000000e+00> : vector<8x512xf32>
    %253 = tpu.matmul %220, %7, %cst_55 {dimension_numbers = #tpu.dot_dimension_numbers<[1], [0], [0], [1], [0, 0, 1, 1], [], []>} : vector<8x128xf32>, vector<128x512xf32>, vector<8x512xf32> -> vector<8x512xf32>
    %254 = arith.addf %252, %253 : vector<8x512xf32>
    %255 = vector.extract_strided_slice %254 {offsets = [0, 0], sizes = [8, 128], strides = [1, 1]} : vector<8x512xf32> to vector<8x128xf32>
    %256 = arith.negf %255 : vector<8x128xf32>
    %257 = math.exp %256 : vector<8x128xf32>
    %cst_56 = arith.constant 1.000000e+00 : f32
    %258 = vector.broadcast %cst_56 : f32 to vector<8x128xf32>
    %259 = arith.addf %258, %257 : vector<8x128xf32>
    %260 = arith.divf %258, %259 : vector<8x128xf32>
    %261 = vector.extract_strided_slice %254 {offsets = [0, 128], sizes = [8, 128], strides = [1, 1]} : vector<8x512xf32> to vector<8x128xf32>
    %262 = arith.negf %261 : vector<8x128xf32>
    %263 = math.exp %262 : vector<8x128xf32>
    %cst_57 = arith.constant 1.000000e+00 : f32
    %264 = vector.broadcast %cst_57 : f32 to vector<8x128xf32>
    %265 = arith.addf %264, %263 : vector<8x128xf32>
    %266 = arith.divf %264, %265 : vector<8x128xf32>
    %267 = vector.extract_strided_slice %254 {offsets = [0, 256], sizes = [8, 128], strides = [1, 1]} : vector<8x512xf32> to vector<8x128xf32>
    %268 = math.tanh %267 : vector<8x128xf32>
    %269 = vector.extract_strided_slice %254 {offsets = [0, 384], sizes = [8, 128], strides = [1, 1]} : vector<8x512xf32> to vector<8x128xf32>
    %270 = arith.negf %269 : vector<8x128xf32>
    %271 = math.exp %270 : vector<8x128xf32>
    %cst_58 = arith.constant 1.000000e+00 : f32
    %272 = vector.broadcast %cst_58 : f32 to vector<8x128xf32>
    %273 = arith.addf %272, %271 : vector<8x128xf32>
    %274 = arith.divf %272, %273 : vector<8x128xf32>
    %275 = arith.mulf %266, %218 : vector<8x128xf32>
    %276 = arith.mulf %260, %268 : vector<8x128xf32>
    %277 = arith.addf %275, %276 : vector<8x128xf32>
    %278 = math.tanh %277 : vector<8x128xf32>
    %279 = arith.mulf %274, %278 : vector<8x128xf32>
    %280 = tpu.concatenate %279, %248 in 1 : vector<8x128xf32>, vector<8x128xf32> -> vector<8x256xf32>
    %cst_59 = arith.constant dense<0.000000e+00> : vector<8x512xf32>
    %281 = tpu.matmul %280, %8, %cst_59 {dimension_numbers = #tpu.dot_dimension_numbers<[1], [0], [0], [1], [0, 0, 1, 1], [], []>} : vector<8x256xf32>, vector<256x512xf32>, vector<8x512xf32> -> vector<8x512xf32>
    %282 = arith.addf %281, %11 : vector<8x512xf32>
    %283 = vector.extract_strided_slice %282 {offsets = [0, 0], sizes = [8, 128], strides = [1, 1]} : vector<8x512xf32> to vector<8x128xf32>
    %284 = arith.negf %283 : vector<8x128xf32>
    %285 = math.exp %284 : vector<8x128xf32>
    %cst_60 = arith.constant 1.000000e+00 : f32
    %286 = vector.broadcast %cst_60 : f32 to vector<8x128xf32>
    %287 = arith.addf %286, %285 : vector<8x128xf32>
    %288 = arith.divf %286, %287 : vector<8x128xf32>
    %289 = vector.extract_strided_slice %282 {offsets = [0, 128], sizes = [8, 128], strides = [1, 1]} : vector<8x512xf32> to vector<8x128xf32>
    %290 = arith.negf %289 : vector<8x128xf32>
    %291 = math.exp %290 : vector<8x128xf32>
    %cst_61 = arith.constant 1.000000e+00 : f32
    %292 = vector.broadcast %cst_61 : f32 to vector<8x128xf32>
    %293 = arith.addf %292, %291 : vector<8x128xf32>
    %294 = arith.divf %292, %293 : vector<8x128xf32>
    %295 = vector.extract_strided_slice %282 {offsets = [0, 256], sizes = [8, 128], strides = [1, 1]} : vector<8x512xf32> to vector<8x128xf32>
    %296 = math.tanh %295 : vector<8x128xf32>
    %297 = vector.extract_strided_slice %282 {offsets = [0, 384], sizes = [8, 128], strides = [1, 1]} : vector<8x512xf32> to vector<8x128xf32>
    %298 = arith.negf %297 : vector<8x128xf32>
    %299 = math.exp %298 : vector<8x128xf32>
    %cst_62 = arith.constant 1.000000e+00 : f32
    %300 = vector.broadcast %cst_62 : f32 to vector<8x128xf32>
    %301 = arith.addf %300, %299 : vector<8x128xf32>
    %302 = arith.divf %300, %301 : vector<8x128xf32>
    %303 = arith.mulf %294, %246 : vector<8x128xf32>
    %304 = arith.mulf %288, %296 : vector<8x128xf32>
    %305 = arith.addf %303, %304 : vector<8x128xf32>
    %306 = math.tanh %305 : vector<8x128xf32>
    %307 = arith.mulf %302, %306 : vector<8x128xf32>
    %c5_i32 = arith.constant 5 : i32
    %c8_i32_63 = arith.constant 8 : i32
    %308 = arith.muli %c5_i32, %c8_i32_63 : i32
    %309 = tpu.assume_multiple %308, 8 : i32
    %310 = arith.index_cast %309 : i32 to index
    %c0_64 = arith.constant 0 : index
    %311 = vector.load %arg8[%310, %c0_64] : memref<64x512xf32, #tpu.memory_space<vmem>>, vector<8x512xf32>
    %cst_65 = arith.constant dense<0.000000e+00> : vector<8x512xf32>
    %312 = tpu.matmul %279, %7, %cst_65 {dimension_numbers = #tpu.dot_dimension_numbers<[1], [0], [0], [1], [0, 0, 1, 1], [], []>} : vector<8x128xf32>, vector<128x512xf32>, vector<8x512xf32> -> vector<8x512xf32>
    %313 = arith.addf %311, %312 : vector<8x512xf32>
    %314 = vector.extract_strided_slice %313 {offsets = [0, 0], sizes = [8, 128], strides = [1, 1]} : vector<8x512xf32> to vector<8x128xf32>
    %315 = arith.negf %314 : vector<8x128xf32>
    %316 = math.exp %315 : vector<8x128xf32>
    %cst_66 = arith.constant 1.000000e+00 : f32
    %317 = vector.broadcast %cst_66 : f32 to vector<8x128xf32>
    %318 = arith.addf %317, %316 : vector<8x128xf32>
    %319 = arith.divf %317, %318 : vector<8x128xf32>
    %320 = vector.extract_strided_slice %313 {offsets = [0, 128], sizes = [8, 128], strides = [1, 1]} : vector<8x512xf32> to vector<8x128xf32>
    %321 = arith.negf %320 : vector<8x128xf32>
    %322 = math.exp %321 : vector<8x128xf32>
    %cst_67 = arith.constant 1.000000e+00 : f32
    %323 = vector.broadcast %cst_67 : f32 to vector<8x128xf32>
    %324 = arith.addf %323, %322 : vector<8x128xf32>
    %325 = arith.divf %323, %324 : vector<8x128xf32>
    %326 = vector.extract_strided_slice %313 {offsets = [0, 256], sizes = [8, 128], strides = [1, 1]} : vector<8x512xf32> to vector<8x128xf32>
    %327 = math.tanh %326 : vector<8x128xf32>
    %328 = vector.extract_strided_slice %313 {offsets = [0, 384], sizes = [8, 128], strides = [1, 1]} : vector<8x512xf32> to vector<8x128xf32>
    %329 = arith.negf %328 : vector<8x128xf32>
    %330 = math.exp %329 : vector<8x128xf32>
    %cst_68 = arith.constant 1.000000e+00 : f32
    %331 = vector.broadcast %cst_68 : f32 to vector<8x128xf32>
    %332 = arith.addf %331, %330 : vector<8x128xf32>
    %333 = arith.divf %331, %332 : vector<8x128xf32>
    %334 = arith.mulf %325, %277 : vector<8x128xf32>
    %335 = arith.mulf %319, %327 : vector<8x128xf32>
    %336 = arith.addf %334, %335 : vector<8x128xf32>
    %337 = math.tanh %336 : vector<8x128xf32>
    %338 = arith.mulf %333, %337 : vector<8x128xf32>
    %339 = tpu.concatenate %338, %307 in 1 : vector<8x128xf32>, vector<8x128xf32> -> vector<8x256xf32>
    %cst_69 = arith.constant dense<0.000000e+00> : vector<8x512xf32>
    %340 = tpu.matmul %339, %8, %cst_69 {dimension_numbers = #tpu.dot_dimension_numbers<[1], [0], [0], [1], [0, 0, 1, 1], [], []>} : vector<8x256xf32>, vector<256x512xf32>, vector<8x512xf32> -> vector<8x512xf32>
    %341 = arith.addf %340, %11 : vector<8x512xf32>
    %342 = vector.extract_strided_slice %341 {offsets = [0, 0], sizes = [8, 128], strides = [1, 1]} : vector<8x512xf32> to vector<8x128xf32>
    %343 = arith.negf %342 : vector<8x128xf32>
    %344 = math.exp %343 : vector<8x128xf32>
    %cst_70 = arith.constant 1.000000e+00 : f32
    %345 = vector.broadcast %cst_70 : f32 to vector<8x128xf32>
    %346 = arith.addf %345, %344 : vector<8x128xf32>
    %347 = arith.divf %345, %346 : vector<8x128xf32>
    %348 = vector.extract_strided_slice %341 {offsets = [0, 128], sizes = [8, 128], strides = [1, 1]} : vector<8x512xf32> to vector<8x128xf32>
    %349 = arith.negf %348 : vector<8x128xf32>
    %350 = math.exp %349 : vector<8x128xf32>
    %cst_71 = arith.constant 1.000000e+00 : f32
    %351 = vector.broadcast %cst_71 : f32 to vector<8x128xf32>
    %352 = arith.addf %351, %350 : vector<8x128xf32>
    %353 = arith.divf %351, %352 : vector<8x128xf32>
    %354 = vector.extract_strided_slice %341 {offsets = [0, 256], sizes = [8, 128], strides = [1, 1]} : vector<8x512xf32> to vector<8x128xf32>
    %355 = math.tanh %354 : vector<8x128xf32>
    %356 = vector.extract_strided_slice %341 {offsets = [0, 384], sizes = [8, 128], strides = [1, 1]} : vector<8x512xf32> to vector<8x128xf32>
    %357 = arith.negf %356 : vector<8x128xf32>
    %358 = math.exp %357 : vector<8x128xf32>
    %cst_72 = arith.constant 1.000000e+00 : f32
    %359 = vector.broadcast %cst_72 : f32 to vector<8x128xf32>
    %360 = arith.addf %359, %358 : vector<8x128xf32>
    %361 = arith.divf %359, %360 : vector<8x128xf32>
    %362 = arith.mulf %353, %305 : vector<8x128xf32>
    %363 = arith.mulf %347, %355 : vector<8x128xf32>
    %364 = arith.addf %362, %363 : vector<8x128xf32>
    %365 = math.tanh %364 : vector<8x128xf32>
    %366 = arith.mulf %361, %365 : vector<8x128xf32>
    %c6_i32 = arith.constant 6 : i32
    %c8_i32_73 = arith.constant 8 : i32
    %367 = arith.muli %c6_i32, %c8_i32_73 : i32
    %368 = tpu.assume_multiple %367, 8 : i32
    %369 = arith.index_cast %368 : i32 to index
    %c0_74 = arith.constant 0 : index
    %370 = vector.load %arg8[%369, %c0_74] : memref<64x512xf32, #tpu.memory_space<vmem>>, vector<8x512xf32>
    %cst_75 = arith.constant dense<0.000000e+00> : vector<8x512xf32>
    %371 = tpu.matmul %338, %7, %cst_75 {dimension_numbers = #tpu.dot_dimension_numbers<[1], [0], [0], [1], [0, 0, 1, 1], [], []>} : vector<8x128xf32>, vector<128x512xf32>, vector<8x512xf32> -> vector<8x512xf32>
    %372 = arith.addf %370, %371 : vector<8x512xf32>
    %373 = vector.extract_strided_slice %372 {offsets = [0, 0], sizes = [8, 128], strides = [1, 1]} : vector<8x512xf32> to vector<8x128xf32>
    %374 = arith.negf %373 : vector<8x128xf32>
    %375 = math.exp %374 : vector<8x128xf32>
    %cst_76 = arith.constant 1.000000e+00 : f32
    %376 = vector.broadcast %cst_76 : f32 to vector<8x128xf32>
    %377 = arith.addf %376, %375 : vector<8x128xf32>
    %378 = arith.divf %376, %377 : vector<8x128xf32>
    %379 = vector.extract_strided_slice %372 {offsets = [0, 128], sizes = [8, 128], strides = [1, 1]} : vector<8x512xf32> to vector<8x128xf32>
    %380 = arith.negf %379 : vector<8x128xf32>
    %381 = math.exp %380 : vector<8x128xf32>
    %cst_77 = arith.constant 1.000000e+00 : f32
    %382 = vector.broadcast %cst_77 : f32 to vector<8x128xf32>
    %383 = arith.addf %382, %381 : vector<8x128xf32>
    %384 = arith.divf %382, %383 : vector<8x128xf32>
    %385 = vector.extract_strided_slice %372 {offsets = [0, 256], sizes = [8, 128], strides = [1, 1]} : vector<8x512xf32> to vector<8x128xf32>
    %386 = math.tanh %385 : vector<8x128xf32>
    %387 = vector.extract_strided_slice %372 {offsets = [0, 384], sizes = [8, 128], strides = [1, 1]} : vector<8x512xf32> to vector<8x128xf32>
    %388 = arith.negf %387 : vector<8x128xf32>
    %389 = math.exp %388 : vector<8x128xf32>
    %cst_78 = arith.constant 1.000000e+00 : f32
    %390 = vector.broadcast %cst_78 : f32 to vector<8x128xf32>
    %391 = arith.addf %390, %389 : vector<8x128xf32>
    %392 = arith.divf %390, %391 : vector<8x128xf32>
    %393 = arith.mulf %384, %336 : vector<8x128xf32>
    %394 = arith.mulf %378, %386 : vector<8x128xf32>
    %395 = arith.addf %393, %394 : vector<8x128xf32>
    %396 = math.tanh %395 : vector<8x128xf32>
    %397 = arith.mulf %392, %396 : vector<8x128xf32>
    %398 = tpu.concatenate %397, %366 in 1 : vector<8x128xf32>, vector<8x128xf32> -> vector<8x256xf32>
    %cst_79 = arith.constant dense<0.000000e+00> : vector<8x512xf32>
    %399 = tpu.matmul %398, %8, %cst_79 {dimension_numbers = #tpu.dot_dimension_numbers<[1], [0], [0], [1], [0, 0, 1, 1], [], []>} : vector<8x256xf32>, vector<256x512xf32>, vector<8x512xf32> -> vector<8x512xf32>
    %400 = arith.addf %399, %11 : vector<8x512xf32>
    %401 = vector.extract_strided_slice %400 {offsets = [0, 0], sizes = [8, 128], strides = [1, 1]} : vector<8x512xf32> to vector<8x128xf32>
    %402 = arith.negf %401 : vector<8x128xf32>
    %403 = math.exp %402 : vector<8x128xf32>
    %cst_80 = arith.constant 1.000000e+00 : f32
    %404 = vector.broadcast %cst_80 : f32 to vector<8x128xf32>
    %405 = arith.addf %404, %403 : vector<8x128xf32>
    %406 = arith.divf %404, %405 : vector<8x128xf32>
    %407 = vector.extract_strided_slice %400 {offsets = [0, 128], sizes = [8, 128], strides = [1, 1]} : vector<8x512xf32> to vector<8x128xf32>
    %408 = arith.negf %407 : vector<8x128xf32>
    %409 = math.exp %408 : vector<8x128xf32>
    %cst_81 = arith.constant 1.000000e+00 : f32
    %410 = vector.broadcast %cst_81 : f32 to vector<8x128xf32>
    %411 = arith.addf %410, %409 : vector<8x128xf32>
    %412 = arith.divf %410, %411 : vector<8x128xf32>
    %413 = vector.extract_strided_slice %400 {offsets = [0, 256], sizes = [8, 128], strides = [1, 1]} : vector<8x512xf32> to vector<8x128xf32>
    %414 = math.tanh %413 : vector<8x128xf32>
    %415 = vector.extract_strided_slice %400 {offsets = [0, 384], sizes = [8, 128], strides = [1, 1]} : vector<8x512xf32> to vector<8x128xf32>
    %416 = arith.negf %415 : vector<8x128xf32>
    %417 = math.exp %416 : vector<8x128xf32>
    %cst_82 = arith.constant 1.000000e+00 : f32
    %418 = vector.broadcast %cst_82 : f32 to vector<8x128xf32>
    %419 = arith.addf %418, %417 : vector<8x128xf32>
    %420 = arith.divf %418, %419 : vector<8x128xf32>
    %421 = arith.mulf %412, %364 : vector<8x128xf32>
    %422 = arith.mulf %406, %414 : vector<8x128xf32>
    %423 = arith.addf %421, %422 : vector<8x128xf32>
    %424 = math.tanh %423 : vector<8x128xf32>
    %425 = arith.mulf %420, %424 : vector<8x128xf32>
    %c7_i32 = arith.constant 7 : i32
    %c8_i32_83 = arith.constant 8 : i32
    %426 = arith.muli %c7_i32, %c8_i32_83 : i32
    %427 = tpu.assume_multiple %426, 8 : i32
    %428 = arith.index_cast %427 : i32 to index
    %c0_84 = arith.constant 0 : index
    %429 = vector.load %arg8[%428, %c0_84] : memref<64x512xf32, #tpu.memory_space<vmem>>, vector<8x512xf32>
    %cst_85 = arith.constant dense<0.000000e+00> : vector<8x512xf32>
    %430 = tpu.matmul %397, %7, %cst_85 {dimension_numbers = #tpu.dot_dimension_numbers<[1], [0], [0], [1], [0, 0, 1, 1], [], []>} : vector<8x128xf32>, vector<128x512xf32>, vector<8x512xf32> -> vector<8x512xf32>
    %431 = arith.addf %429, %430 : vector<8x512xf32>
    %432 = vector.extract_strided_slice %431 {offsets = [0, 0], sizes = [8, 128], strides = [1, 1]} : vector<8x512xf32> to vector<8x128xf32>
    %433 = arith.negf %432 : vector<8x128xf32>
    %434 = math.exp %433 : vector<8x128xf32>
    %cst_86 = arith.constant 1.000000e+00 : f32
    %435 = vector.broadcast %cst_86 : f32 to vector<8x128xf32>
    %436 = arith.addf %435, %434 : vector<8x128xf32>
    %437 = arith.divf %435, %436 : vector<8x128xf32>
    %438 = vector.extract_strided_slice %431 {offsets = [0, 128], sizes = [8, 128], strides = [1, 1]} : vector<8x512xf32> to vector<8x128xf32>
    %439 = arith.negf %438 : vector<8x128xf32>
    %440 = math.exp %439 : vector<8x128xf32>
    %cst_87 = arith.constant 1.000000e+00 : f32
    %441 = vector.broadcast %cst_87 : f32 to vector<8x128xf32>
    %442 = arith.addf %441, %440 : vector<8x128xf32>
    %443 = arith.divf %441, %442 : vector<8x128xf32>
    %444 = vector.extract_strided_slice %431 {offsets = [0, 256], sizes = [8, 128], strides = [1, 1]} : vector<8x512xf32> to vector<8x128xf32>
    %445 = math.tanh %444 : vector<8x128xf32>
    %446 = vector.extract_strided_slice %431 {offsets = [0, 384], sizes = [8, 128], strides = [1, 1]} : vector<8x512xf32> to vector<8x128xf32>
    %447 = arith.negf %446 : vector<8x128xf32>
    %448 = math.exp %447 : vector<8x128xf32>
    %cst_88 = arith.constant 1.000000e+00 : f32
    %449 = vector.broadcast %cst_88 : f32 to vector<8x128xf32>
    %450 = arith.addf %449, %448 : vector<8x128xf32>
    %451 = arith.divf %449, %450 : vector<8x128xf32>
    %452 = arith.mulf %443, %395 : vector<8x128xf32>
    %453 = arith.mulf %437, %445 : vector<8x128xf32>
    %454 = arith.addf %452, %453 : vector<8x128xf32>
    %455 = math.tanh %454 : vector<8x128xf32>
    %456 = arith.mulf %451, %455 : vector<8x128xf32>
    %457 = tpu.concatenate %456, %425 in 1 : vector<8x128xf32>, vector<8x128xf32> -> vector<8x256xf32>
    %cst_89 = arith.constant dense<0.000000e+00> : vector<8x512xf32>
    %458 = tpu.matmul %457, %8, %cst_89 {dimension_numbers = #tpu.dot_dimension_numbers<[1], [0], [0], [1], [0, 0, 1, 1], [], []>} : vector<8x256xf32>, vector<256x512xf32>, vector<8x512xf32> -> vector<8x512xf32>
    %459 = arith.addf %458, %11 : vector<8x512xf32>
    %460 = vector.extract_strided_slice %459 {offsets = [0, 0], sizes = [8, 128], strides = [1, 1]} : vector<8x512xf32> to vector<8x128xf32>
    %461 = arith.negf %460 : vector<8x128xf32>
    %462 = math.exp %461 : vector<8x128xf32>
    %cst_90 = arith.constant 1.000000e+00 : f32
    %463 = vector.broadcast %cst_90 : f32 to vector<8x128xf32>
    %464 = arith.addf %463, %462 : vector<8x128xf32>
    %465 = arith.divf %463, %464 : vector<8x128xf32>
    %466 = vector.extract_strided_slice %459 {offsets = [0, 128], sizes = [8, 128], strides = [1, 1]} : vector<8x512xf32> to vector<8x128xf32>
    %467 = arith.negf %466 : vector<8x128xf32>
    %468 = math.exp %467 : vector<8x128xf32>
    %cst_91 = arith.constant 1.000000e+00 : f32
    %469 = vector.broadcast %cst_91 : f32 to vector<8x128xf32>
    %470 = arith.addf %469, %468 : vector<8x128xf32>
    %471 = arith.divf %469, %470 : vector<8x128xf32>
    %472 = vector.extract_strided_slice %459 {offsets = [0, 256], sizes = [8, 128], strides = [1, 1]} : vector<8x512xf32> to vector<8x128xf32>
    %473 = math.tanh %472 : vector<8x128xf32>
    %474 = vector.extract_strided_slice %459 {offsets = [0, 384], sizes = [8, 128], strides = [1, 1]} : vector<8x512xf32> to vector<8x128xf32>
    %475 = arith.negf %474 : vector<8x128xf32>
    %476 = math.exp %475 : vector<8x128xf32>
    %cst_92 = arith.constant 1.000000e+00 : f32
    %477 = vector.broadcast %cst_92 : f32 to vector<8x128xf32>
    %478 = arith.addf %477, %476 : vector<8x128xf32>
    %479 = arith.divf %477, %478 : vector<8x128xf32>
    %480 = arith.mulf %471, %423 : vector<8x128xf32>
    %481 = arith.mulf %465, %473 : vector<8x128xf32>
    %482 = arith.addf %480, %481 : vector<8x128xf32>
    %483 = math.tanh %482 : vector<8x128xf32>
    %484 = arith.mulf %479, %483 : vector<8x128xf32>
    %c8_i32_93 = arith.constant 8 : i32
    %c0_94 = arith.constant 0 : index
    %c0_95 = arith.constant 0 : index
    %485 = vector.load %arg7[%c0_94, %c0_95] : memref<8x128xf32, #tpu.memory_space<vmem>>, vector<8x128xf32>
    tpu.vector_store %arg7[%c0_94, %c0_95], %484 {strides = array<i32>} : memref<8x128xf32, #tpu.memory_space<vmem>>, vector<8x128xf32>,
    return
  }
  func.func @transform_0(%arg0: i32) -> (i32, i32) {
    %c0_i32 = arith.constant 0 : i32
    %c0_i32_0 = arith.constant 0 : i32
    %c0_i32_1 = arith.constant 0 : i32
    return %c0_i32, %c0_i32_0 : i32, i32
  }
  func.func @transform_1(%arg0: i32) -> (i32, i32) {
    %c0_i32 = arith.constant 0 : i32
    %c0_i32_0 = arith.constant 0 : i32
    %c0_i32_1 = arith.constant 0 : i32
    return %c0_i32, %c0_i32_0 : i32, i32
  }
  func.func @transform_2(%arg0: i32) -> (i32, i32) {
    %c0_i32 = arith.constant 0 : i32
    %c0_i32_0 = arith.constant 0 : i32
    %c0_i32_1 = arith.constant 0 : i32
    return %c0_i32, %c0_i32_0 : i32, i32
  }
  func.func @transform_3(%arg0: i32) -> (i32, i32) {
    %c0_i32 = arith.constant 0 : i32
    %c0_i32_0 = arith.constant 0 : i32
    %c0_i32_1 = arith.constant 0 : i32
    return %c0_i32, %c0_i32_0 : i32, i32
  }
  func.func @transform_4(%arg0: i32) -> (i32, i32) {
    %c0_i32 = arith.constant 0 : i32
    %c0_i32_0 = arith.constant 0 : i32
    %c0_i32_1 = arith.constant 0 : i32
    return %c0_i32, %c0_i32_0 : i32, i32
  }
  func.func @transform_5(%arg0: i32) -> (i32, i32) {
    %c0_i32 = arith.constant 0 : i32
    %c0_i32_0 = arith.constant 0 : i32
    %c0_i32_1 = arith.constant 0 : i32
    return %c0_i32, %c0_i32_0 : i32, i32
  }
  func.func @transform_6(%arg0: i32) -> (i32, i32) {
    %c0_i32 = arith.constant 0 : i32
    %c0_i32_0 = arith.constant 0 : i32
    %c0_i32_1 = arith.constant 0 : i32
    return %c0_i32, %c0_i32_0 : i32, i32
  }
}

</mosaic_0001>

<bundles_post_ra>
// kernel: tpu_custom_call.1
= control target key start
LH: loop header
LB: loop body
LE: loop exit
PB: predicated region body
PF: predicated region fallthrough
CT: control target
= control target key end

     0   :  { %11 = vsyncpa [#allocation4], 0  ;;  %s6754_s0 = inlined_call_operand.vmem [shape: f32[64,28], index: 0, kind: input, shape index: {}]   ;;  %s6755_s1 = inlined_call_operand.hbm [shape: f32[28,512], index: 1, kind: input, shape index: {}]   ;;  %s6756_s2 = inlined_call_operand.vmem [shape: f32[1,512], index: 2, kind: input, shape index: {}]   ;;  %s6757_s3 = inlined_call_operand.hbm [shape: f32[128,512], index: 3, kind: input, shape index: {}]   ;;  %s6758_s4 = inlined_call_operand.hbm [shape: f32[256,512], index: 4, kind: input, shape index: {}]   ;;  %s6759_s5 = inlined_call_operand.vmem [shape: f32[1,512], index: 5, kind: input, shape index: {}]   ;;  %s6760_s6 = inlined_call_operand.hbm [shape: f32[8,128], index: 6, kind: output, shape index: {}]  }
   0x1   :  { %12 = vsyncpa [#allocation7], 0 }
   0x2   :  { %13 = vsyncpa [#allocation5], 0  ;;  %s5435_s21 = smov [#allocation6]   ;;  %s5436_s23 = smov [#allocation3]  }
   0x3   :  { %s35_s22 = sshll.u32 %s5435_s21, 4  ;;  %s21_s24 = sshll.u32 %s5436_s23, 4  ;;  %s36_s22 = int_to_ptr.vmem [resolvable:$true] %s35_s22  ;;  %s5478_s24 = int_to_ptr.vmem [resolvable:$true] %s21_s24 }
   0x4   :  { %s5341_s27 = scalar_lea.hbm %s6757_s3, 8192 }
   0x5   :  { %p5342_p0 = scmp.ne.s32.totalorder %s6757_s3, %s5341_s27  ;;  %p5345_p1 = scmp.lt.u32.totalorder %s5341_s27, %s6757_s3 }
   0x7   :  { %p5347_p2 = pnand %p5345_p1, %p5342_p0 }
   0x9   :  { %5350 = shalt.err (!%p5347_p2)
}
   0xa   :  { %s5351_s8 = scalar_lea.vmem %s36_s22, 8192  ;;  %p5356_p4 = scmp.lt.s32.totalorder %s36_s22, %s36_s22 }
   0xb   :  { %p5352_p3 = scmp.ne.s32.totalorder %s36_s22, %s5351_s8  ;;  %p5357_p5 = scmp.lt.s32.totalorder %s5351_s8, %s5351_s8 }
   0xd   :  { %p5358_p6 = por %p5357_p5, %p5356_p4 }
   0xf   :  { %p5359_p7 = pnand %p5358_p6, %p5352_p3 }
  0x11   :  { %5362 = shalt.err (!%p5359_p7)
}
  0x12   :  { %s5437_s9 = smov 512   ;;  %s5438_s10 = smov 32  }
  0x13   :  { %41 = dma.hbm_to_vmem [thread:$0]  %s6757_s3, 8192, %s36_s22, [#allocation7], %s5437_s9, %s5437_s9, %s5438_s10  }
  0x14   :  { %s5363_s15 = scalar_lea.hbm %s6755_s1, 2048 }
  0x15   :  { %p5364_p8 = scmp.ne.s32.totalorder %s6755_s1, %s5363_s15  ;;  %p5367_p9 = scmp.lt.u32.totalorder %s5363_s15, %s6755_s1 }
  0x17   :  { %p5369_p10 = pnand %p5367_p9, %p5364_p8 }
  0x19   :  { %5372 = shalt.err (!%p5369_p10)
}
  0x1a   :  { %s5373_s20 = scalar_lea.vmem %s5478_s24, 2048  ;;  %p5378_p12 = scmp.lt.s32.totalorder %s5478_s24, %s5478_s24 }
  0x1b   :  { %p5374_p11 = scmp.ne.s32.totalorder %s5478_s24, %s5373_s20  ;;  %p5379_p13 = scmp.lt.s32.totalorder %s5373_s20, %s5373_s20 }
  0x1d   :  { %p5380_p0 = por %p5379_p13, %p5378_p12 }
  0x1f   :  { %p5381_p1 = pnand %p5380_p0, %p5374_p11 }
  0x21   :  { %5384 = shalt.err (!%p5381_p1)
}
  0x22   :  { %27 = dma.hbm_to_vmem [thread:$0]  %s6755_s1, 2048, %s5478_s24, [#allocation4], %s5437_s9, %s5437_s9, %s5438_s10  }
  0x23   :  { %s5439_s22 = smov [#allocation8]   ;;  %s5385_s27 = scalar_lea.hbm %s6758_s4, 16384 }
  0x24   :  { %s47_s23 = sshll.u32 %s5439_s22, 4  ;;  %p5386_p2 = scmp.ne.s32.totalorder %s6758_s4, %s5385_s27  ;;  %s48_s23 = int_to_ptr.vmem [resolvable:$true] %s47_s23 }
  0x25   :  { %p5389_p3 = scmp.lt.u32.totalorder %s5385_s27, %s6758_s4 }
  0x27   :  { %p5391_p4 = pnand %p5389_p3, %p5386_p2 }
  0x29   :  { %5394 = shalt.err (!%p5391_p4)
}
  0x2a   :  { %s5395_s8 = scalar_lea.vmem %s48_s23, 16384  ;;  %p5400_p6 = scmp.lt.s32.totalorder %s48_s23, %s48_s23 }
  0x2b   :  { %p5396_p5 = scmp.ne.s32.totalorder %s48_s23, %s5395_s8  ;;  %p5401_p7 = scmp.lt.s32.totalorder %s5395_s8, %s5395_s8 }
  0x2d   :  { %p5402_p8 = por %p5401_p7, %p5400_p6 }
  0x2f   :  { %p5403_p9 = pnand %p5402_p8, %p5396_p5 }
  0x31   :  { %5406 = shalt.err (!%p5403_p9)
}
  0x32   :  { %53 = dma.hbm_to_vmem [thread:$0]  %s6758_s4, 16384, %s48_s23, [#allocation7], %s5437_s9, %s5437_s9, %s5438_s10  }
  0x33   :  { %5429 = dma.done.wait [#allocation4], 2048  }
  0x34   :  { %5430 = vsyncadd [#allocation4], 4294965248 }
  0x35   :  { %5431 = dma.done.wait [#allocation7], 24576  }
  0x36   :  { %5432 = vsyncadd [#allocation7], 4294942720  ;;  %v6761_v0 = vmov 0.0   ;;  %vm136_vm0 = vcmask 1043456   ;;  %vm5441_vm1 = vmmov 1   ;;  %v74_v2 = vld [vmem:[#allocation3 + $0x8] sm:$0xff] }
  0x37   :  { %213 = vmatprep.mubr.f32.mxu0 %v6761_v0  ;;  %326 = vmatprep.mubr.f32.mxu1 %v6761_v0  ;;  %vm5532_vm2 = vmpackc.low %vm136_vm0, %vm5441_vm1  ;;  %v78_v3 = vld [vmem:[#allocation3 + $0x28] sm:$0xff]  ;;  %v76_v4 = vld [vmem:[#allocation3 + $0x18] sm:$0xff]  ;;  %vm111_vm3 = vcmask 228352  }
  0x38   :  { %v3457_v5 = vpack.c.bf16 %v78_v3, %v74_v2  ;;  %v80_v6 = vld [vmem:[#allocation3 + $0x38] sm:$0xff]  ;;  %v73_v7 = vld [vmem:[#allocation3] sm:$0xff]  ;;  %v75_v11 = vld [vmem:[#allocation3 + $0x10] sm:$0xff] }
  0x39   :  { %v77_v8 = vld [vmem:[#allocation3 + $0x20] sm:$0xff]  ;;  %v3467_v9 = vpack.c.bf16 %v80_v6, %v76_v4  ;;  %v79_v12 = vld [vmem:[#allocation3 + $0x30] sm:$0xff]  ;;  %v82_v13 = vld [vmem:[#allocation3 + $0x48] sm:$0xff] }
  0x3a   :  { %v3459_v10 = vpack.c.bf16 %v77_v8, %v73_v7  ;;  %3458 = vmatprep.subr.bf16.mxu0 %v3457_v5  ;;  %v3469_v14 = vpack.c.bf16 %v79_v12, %v75_v11  ;;  %v86_v15 = vld [vmem:[#allocation3 + $0x68] sm:$0xf]  ;;  %v84_v16 = vld [vmem:[#allocation3 + $0x58] sm:$0xff]  ;;  %v81_v20 = vld [vmem:[#allocation3 + $0x40] sm:$0xff] }
  0x3b   :  { %v88_v17 = vld [vmem:[#allocation3 + $0x78] sm:$0xf]  ;;  %3468 = vmatprep.subr.bf16.mxu1 %v3467_v9  ;;  %v3461_v18 = vpack.c.bf16 %v86_v15, %v82_v13  ;;  %v85_v21 = vld [vmem:[#allocation3 + $0x60] sm:$0xf]  ;;  %v83_v22 = vld [vmem:[#allocation3 + $0x50] sm:$0xff] }
  0x3c   :  { %3460 = vmatpush1.bf16.msra.mxu0 %v3459_v10  ;;  %v3471_v19 = vpack.c.bf16 %v88_v17, %v84_v16  ;;  %3470 = vmatpush1.bf16.msra.mxu1 %v3469_v14  ;;  %v3464_v23 = vpack.c.bf16 %v85_v21, %v81_v20  ;;  %v87_v24 = vld [vmem:[#allocation3 + $0x70] sm:$0xf]  ;;  %v408_v25 = vld [vmem:[#allocation6 + $0x8] sm:$0xff]  ;;  %v410_v28 = vld [vmem:[#allocation6 + $0x18] sm:$0xff] }
  0x3d   :  { %3463 = vmatprep.subr.msk.bf16.mxu0 %vm5532_vm2, %v3461_v18  ;;  %v3474_v26 = vpack.c.bf16 %v87_v24, %v83_v22  ;;  %v412_v27 = vld [vmem:[#allocation6 + $0x28] sm:$0xff]  ;;  %v414_v29 = vld [vmem:[#allocation6 + $0x38] sm:$0xff]  ;;  %v407_v32 = vld [vmem:[#allocation6] sm:$0xff] }
  0x3e   :  { %3473 = vmatprep.subr.msk.bf16.mxu1 %vm5532_vm2, %v3471_v19  ;;  %v5540_v30 = vpack.c.bf16 %v412_v27, %v408_v25  ;;  %v5542_v31 = vpack.c.bf16 %v414_v29, %v410_v28  ;;  %v411_v33 = vld [vmem:[#allocation6 + $0x20] sm:$0xff]  ;;  %v409_v34 = vld [vmem:[#allocation6 + $0x10] sm:$0xff]  ;;  %v416_v38 = vld [vmem:[#allocation6 + $0x48] sm:$0xff] }
  0x3f   :  { %v65_v35 = vld [vmem:[%s6754_s0] sm:$0xff]  ;;  %v5549_v36 = vpack.c.bf16 %v411_v33, %v407_v32  ;;  %v413_v37 = vld [vmem:[#allocation6 + $0x30] sm:$0xff]  ;;  %v420_v40 = vld [vmem:[#allocation6 + $0x68] sm:$0xff] }
  0x40   :  { %6897 = vst [vmem:[#allocation13_spill] sm:$0xff] %v5540_v30  ;;  %6898 = vst [vmem:[#allocation14_spill] sm:$0xff] %v5542_v31  ;;  %3466 = vmatpush1.bf16.msk.msra.mxu0 %vm5532_vm2, %v3464_v23  ;;  %3476 = vmatpush1.bf16.msk.msra.mxu1 %vm5532_vm2, %v3474_v26  ;;  %v5554_v39 = vpack.c.bf16 %v413_v37, %v409_v34  ;;  %v418_v41 = vld [vmem:[#allocation6 + $0x58] sm:$0xff]  ;;  %v5557_v43 = vpack.c.bf16 %v420_v40, %v416_v38  ;;  %v415_v44 = vld [vmem:[#allocation6 + $0x40] sm:$0xff] }
  0x41   :  { %3478 = vmatprep.subr.bf16.mxu0 %v5540_v30  ;;  %v422_v42 = vld [vmem:[#allocation6 + $0x78] sm:$0xff]  ;;  %3510 = vmatprep.subr.bf16.mxu1 %v5542_v31  ;;  %v419_v45 = vld [vmem:[#allocation6 + $0x60] sm:$0xff]  ;;  %v417_v46 = vld [vmem:[#allocation6 + $0x50] sm:$0xff] }
  0x42   :  { %v66_v47 = vld [vmem:[%s6754_s0 + $0x8] sm:$0xff]  ;;  %v5563_v48 = vpack.c.bf16 %v422_v42, %v418_v41  ;;  %v421_v49 = vld [vmem:[#allocation6 + $0x70] sm:$0xff]  ;;  %v5567_v51 = vpack.c.bf16 %v419_v45, %v415_v44  ;;  %v426_v53 = vld [vmem:[#allocation6 + $0x98] sm:$0xff] }
  0x43   :  { %3391 = vmatmul.mubr.msk.f32.vlgmr.msra.gmra.mrb[0].mxu0 %vm111_vm3, %v65_v35  ;;  %v424_v50 = vld [vmem:[#allocation6 + $0x88] sm:$0xff]  ;;  %3401 = vmatmul.mubr.msk.f32.vlgmr.msra.gmra.mrb[0].mxu1 %vm111_vm3, %v65_v35  ;;  %v430_v54 = vld [vmem:[#allocation6 + $0xb8] sm:$0xff]  ;;  %v5571_v55 = vpack.c.bf16 %v421_v49, %v417_v46  ;;  %v423_v56 = vld [vmem:[#allocation6 + $0x80] sm:$0xff] }
  0x44   :  { %3480 = vmatpush1.bf16.msra.mxu0 %v5549_v36  ;;  %v428_v52 = vld [vmem:[#allocation6 + $0xa8] sm:$0xff]  ;;  %3512 = vmatpush1.bf16.msra.mxu1 %v5554_v39  ;;  %v427_v57 = vld [vmem:[#allocation6 + $0xa0] sm:$0xff]  ;;  %v425_v59 = vld [vmem:[#allocation6 + $0x90] sm:$0xff]  ;;  %v5579_v61 = vpack.c.bf16 %v430_v54, %v426_v53 }
  0x45   :  { %219 = vmatprep.mubr.f32.mxu0 %v6761_v0  ;;  %332 = vmatprep.mubr.f32.mxu1 %v6761_v0  ;;  %v5575_v58 = vpack.c.bf16 %v428_v52, %v424_v50  ;;  %v429_v60 = vld [vmem:[#allocation6 + $0xb0] sm:$0xff]  ;;  %v432_v62 = vld [vmem:[#allocation6 + $0xc8] sm:$0xff]  ;;  %v5586_v2 = vpack.c.bf16 %v427_v57, %v423_v56  ;;  %v434_v3 = vld [vmem:[#allocation6 + $0xd8] sm:$0xff] }
  0x46   :  { %3482 = vmatprep.subr.bf16.mxu0 %v5557_v43  ;;  %3514 = vmatprep.subr.bf16.mxu1 %v5563_v48  ;;  %v436_v63 = vld [vmem:[#allocation6 + $0xe8] sm:$0xff]  ;;  %v67_v1 = vld [vmem:[%s6754_s0 + $0x10] sm:$0xff]  ;;  %v438_v4 = vld [vmem:[#allocation6 + $0xf8] sm:$0xff]  ;;  %v5590_v5 = vpack.c.bf16 %v429_v60, %v425_v59 }
  0x47   :  { %3392 = vmatmul.mubr.msk.f32.gmra.mrb[2].mxu0 %vm111_vm3, %v66_v47  ;;  %3402 = vmatmul.mubr.msk.f32.gmra.mrb[2].mxu1 %vm111_vm3, %v66_v47  ;;  %v431_v6 = vld [vmem:[#allocation6 + $0xc0] sm:$0xff]  ;;  %v5594_v8 = vpack.c.bf16 %v436_v63, %v432_v62  ;;  %v433_v9 = vld [vmem:[#allocation6 + $0xd0] sm:$0xff]  ;;  %v5598_v11 = vpack.c.bf16 %v438_v4, %v434_v3  ;;  %v440_v12 = vld [vmem:[#allocation6 + $0x108] sm:$0xff] }
  0x48   :  { %3484 = vmatpush1.bf16.msra.mxu0 %v5567_v51  ;;  %3516 = vmatpush1.bf16.msra.mxu1 %v5571_v55  ;;  %v435_v7 = vld [vmem:[#allocation6 + $0xe0] sm:$0xff]  ;;  %v437_v10 = vld [vmem:[#allocation6 + $0xf0] sm:$0xff]  ;;  %v444_v13 = vld [vmem:[#allocation6 + $0x128] sm:$0xff] }
  0x49   :  { %225 = vmatprep.mubr.f32.mxu0 %v6761_v0  ;;  %338 = vmatprep.mubr.f32.mxu1 %v6761_v0  ;;  %v68_v14 = vld [vmem:[%s6754_s0 + $0x18] sm:$0xff]  ;;  %v5605_v15 = vpack.c.bf16 %v435_v7, %v431_v6  ;;  %v5609_v18 = vpack.c.bf16 %v437_v10, %v433_v9  ;;  %v439_v19 = vld [vmem:[#allocation6 + $0x100] sm:$0xff]  ;;  %v5613_v21 = vpack.c.bf16 %v444_v13, %v440_v12  ;;  %v441_v22 = vld [vmem:[#allocation6 + $0x110] sm:$0xff] }
  0x4a   :  { %3486 = vmatprep.subr.bf16.mxu0 %v5575_v58  ;;  %3518 = vmatprep.subr.bf16.mxu1 %v5579_v61  ;;  %v442_v16 = vld [vmem:[#allocation6 + $0x118] sm:$0xff]  ;;  %v443_v20 = vld [vmem:[#allocation6 + $0x120] sm:$0xff]  ;;  %v445_v23 = vld [vmem:[#allocation6 + $0x130] sm:$0xff] }
  0x4b   :  { %3393 = vmatmul.mubr.msk.f32.gmra.mrb[4].mxu0 %vm111_vm3, %v67_v1  ;;  %3403 = vmatmul.mubr.msk.f32.gmra.mrb[4].mxu1 %vm111_vm3, %v67_v1  ;;  %v446_v17 = vld [vmem:[#allocation6 + $0x138] sm:$0xff]  ;;  %v448_v25 = vld [vmem:[#allocation6 + $0x148] sm:$0xff]  ;;  %v69_v27 = vld [vmem:[%s6754_s0 + $0x20] sm:$0xff]  ;;  %v5624_v28 = vpack.c.bf16 %v443_v20, %v439_v19  ;;  %v5628_v33 = vpack.c.bf16 %v445_v23, %v441_v22 }
  0x4c   :  { %3488 = vmatpush1.bf16.msra.mxu0 %v5586_v2  ;;  %3520 = vmatpush1.bf16.msra.mxu1 %v5590_v5  ;;  %v5617_v24 = vpack.c.bf16 %v446_v17, %v442_v16  ;;  %v452_v26 = vld [vmem:[#allocation6 + $0x168] sm:$0xff]  ;;  %v450_v29 = vld [vmem:[#allocation6 + $0x158] sm:$0xff]  ;;  %v447_v34 = vld [vmem:[#allocation6 + $0x140] sm:$0xff] }
  0x4d   :  { %231 = vmatprep.mubr.f32.mxu0 %v6761_v0  ;;  %344 = vmatprep.mubr.f32.mxu1 %v6761_v0  ;;  %v454_v32 = vld [vmem:[#allocation6 + $0x178] sm:$0xff]  ;;  %v451_v35 = vld [vmem:[#allocation6 + $0x160] sm:$0xff]  ;;  %v5632_v37 = vpack.c.bf16 %v452_v26, %v448_v25  ;;  %v449_v38 = vld [vmem:[#allocation6 + $0x150] sm:$0xff] }
  0x4e   :  { %3490 = vmatprep.subr.bf16.mxu0 %v5594_v8  ;;  %3522 = vmatprep.subr.bf16.mxu1 %v5598_v11  ;;  %v453_v40 = vld [vmem:[#allocation6 + $0x170] sm:$0xff]  ;;  %v5636_v41 = vpack.c.bf16 %v454_v32, %v450_v29  ;;  %v456_v42 = vld [vmem:[#allocation6 + $0x188] sm:$0xff]  ;;  %v5643_v46 = vpack.c.bf16 %v451_v35, %v447_v34  ;;  %v458_v47 = vld [vmem:[#allocation6 + $0x198] sm:$0xff] }
  0x4f   :  { %3394 = vmatmul.mubr.msk.f32.gmra.mrb[6].mxu0 %vm111_vm3, %v68_v14  ;;  %3404 = vmatmul.mubr.msk.f32.gmra.mrb[6].mxu1 %vm111_vm3, %v68_v14  ;;  %v460_v44 = vld [vmem:[#allocation6 + $0x1a8] sm:$0xff]  ;;  %v462_v49 = vld [vmem:[#allocation6 + $0x1b8] sm:$0xff]  ;;  %v5647_v50 = vpack.c.bf16 %v453_v40, %v449_v38  ;;  %v455_v52 = vld [vmem:[#allocation6 + $0x180] sm:$0xff] }
  0x50   :  { %3492 = vmatpush1.bf16.msra.mxu0 %v5605_v15  ;;  %3524 = vmatpush1.bf16.msra.mxu1 %v5609_v18  ;;  %v70_v45 = vld [vmem:[%s6754_s0 + $0x28] sm:$0xff]  ;;  %v459_v53 = vld [vmem:[#allocation6 + $0x1a0] sm:$0xff]  ;;  %v5651_v54 = vpack.c.bf16 %v460_v44, %v456_v42  ;;  %v457_v56 = vld [vmem:[#allocation6 + $0x190] sm:$0xff]  ;;  %v5655_v59 = vpack.c.bf16 %v462_v49, %v458_v47 }
  0x51   :  { %237 = vmatprep.mubr.f32.mxu0 %v6761_v0  ;;  %350 = vmatprep.mubr.f32.mxu1 %v6761_v0  ;;  %v461_v57 = vld [vmem:[#allocation6 + $0x1b0] sm:$0xff]  ;;  %v464_v60 = vld [vmem:[#allocation6 + $0x1c8] sm:$0xff]  ;;  %v5662_v1 = vpack.c.bf16 %v459_v53, %v455_v52  ;;  %v466_v3 = vld [vmem:[#allocation6 + $0x1d8] sm:$0xff] }
  0x52   :  { %3494 = vmatprep.subr.bf16.mxu0 %v5613_v21  ;;  %3526 = vmatprep.subr.bf16.mxu1 %v5617_v24  ;;  %v468_v62 = vld [vmem:[#allocation6 + $0x1e8] sm:$0xff]  ;;  %v71_v63 = vld [vmem:[%s6754_s0 + $0x30] sm:$0xff]  ;;  %v470_v4 = vld [vmem:[#allocation6 + $0x1f8] sm:$0xff]  ;;  %v5666_v6 = vpack.c.bf16 %v461_v57, %v457_v56 }
  0x53   :  { %3395 = vmatmul.mubr.msk.f32.gmra.mrb[8].mxu0 %vm111_vm3, %v69_v27  ;;  %3405 = vmatmul.mubr.msk.f32.gmra.mrb[8].mxu1 %vm111_vm3, %v69_v27  ;;  %v463_v7 = vld [vmem:[#allocation6 + $0x1c0] sm:$0xff]  ;;  %v5670_v10 = vpack.c.bf16 %v468_v62, %v464_v60  ;;  %v465_v12 = vld [vmem:[#allocation6 + $0x1d0] sm:$0xff]  ;;  %v5674_v14 = vpack.c.bf16 %v470_v4, %v466_v3  ;;  %v472_v16 = vld [vmem:[#allocation8 + $0x8] sm:$0xff] }
  0x54   :  { %3496 = vmatpush1.bf16.msra.mxu0 %v5624_v28  ;;  %3528 = vmatpush1.bf16.msra.mxu1 %v5628_v33  ;;  %v467_v9 = vld [vmem:[#allocation6 + $0x1e0] sm:$0xff]  ;;  %v469_v13 = vld [vmem:[#allocation6 + $0x1f0] sm:$0xff]  ;;  %v476_v17 = vld [vmem:[#allocation8 + $0x28] sm:$0xff] }
  0x55   :  { %243 = vmatprep.mubr.f32.mxu0 %v6761_v0  ;;  %356 = vmatprep.mubr.f32.mxu1 %v6761_v0  ;;  %v72_v19 = vld [vmem:[%s6754_s0 + $0x38] sm:$0xff]  ;;  %v5681_v20 = vpack.c.bf16 %v467_v9, %v463_v7  ;;  %v5685_v25 = vpack.c.bf16 %v469_v13, %v465_v12  ;;  %v471_v26 = vld [vmem:[#allocation8] sm:$0xff]  ;;  %v473_v29 = vld [vmem:[#allocation8 + $0x10] sm:$0xff]  ;;  %v5689_v32 = vpack.c.bf16 %v476_v17, %v472_v16 }
  0x56   :  { %3498 = vmatprep.subr.bf16.mxu0 %v5632_v37  ;;  %3530 = vmatprep.subr.bf16.mxu1 %v5636_v41  ;;  %v474_v22 = vld [vmem:[#allocation8 + $0x18] sm:$0xff]  ;;  %v475_v27 = vld [vmem:[#allocation8 + $0x20] sm:$0xff]  ;;  %v477_v34 = vld [vmem:[#allocation8 + $0x30] sm:$0xff] }
  0x57   :  { %3396 = vmatmul.mubr.msk.f32.gmra.mrb[10].mxu0 %vm111_vm3, %v70_v45  ;;  %3406 = vmatmul.mubr.msk.f32.gmra.mrb[10].mxu1 %vm111_vm3, %v70_v45  ;;  %v478_v23 = vld [vmem:[#allocation8 + $0x38] sm:$0xff]  ;;  %v480_v35 = vld [vmem:[#allocation8 + $0x48] sm:$0xff]  ;;  %v5697_v45 = vpack.c.bf16 %v475_v27, %v471_v26  ;;  %v5701_v47 = vpack.c.bf16 %v477_v34, %v473_v29  ;;  %v479_v52 = vld [vmem:[#allocation8 + $0x40] sm:$0xff] }
  0x58   :  { %3500 = vmatpush1.bf16.msra.mxu0 %v5643_v46  ;;  %3532 = vmatpush1.bf16.msra.mxu1 %v5647_v50  ;;  %v484_v38 = vld [vmem:[#allocation8 + $0x68] sm:$0xff]  ;;  %v5693_v40 = vpack.c.bf16 %v478_v23, %v474_v22  ;;  %v482_v42 = vld [vmem:[#allocation8 + $0x58] sm:$0xff]  ;;  %v483_v53 = vld [vmem:[#allocation8 + $0x60] sm:$0xff] }
  0x59   :  { %249 = vmatprep.mubr.f32.mxu0 %v6761_v0  ;;  %362 = vmatprep.mubr.f32.mxu1 %v6761_v0  ;;  %v486_v44 = vld [vmem:[#allocation8 + $0x78] sm:$0xff]  ;;  %v5703_v49 = vpack.c.bf16 %v484_v38, %v480_v35  ;;  %v481_v56 = vld [vmem:[#allocation8 + $0x50] sm:$0xff]  ;;  %v488_v62 = vld [vmem:[#allocation8 + $0x88] sm:$0xff]  ;;  %v5713_v7 = vpack.c.bf16 %v483_v53, %v479_v52 }
  0x5a   :  { %3502 = vmatprep.subr.bf16.mxu0 %v5651_v54  ;;  %3534 = vmatprep.subr.bf16.mxu1 %v5655_v59  ;;  %v5707_v57 = vpack.c.bf16 %v486_v44, %v482_v42  ;;  %v485_v60 = vld [vmem:[#allocation8 + $0x70] sm:$0xff]  ;;  %v490_v3 = vld [vmem:[#allocation8 + $0x98] sm:$0xff]  ;;  %v487_v13 = vld [vmem:[#allocation8 + $0x80] sm:$0xff] }
  0x5b   :  { %3397 = vmatmul.mubr.msk.f32.gmra.mrb[12].mxu0 %vm111_vm3, %v71_v63  ;;  %3407 = vmatmul.mubr.msk.f32.gmra.mrb[12].mxu1 %vm111_vm3, %v71_v63  ;;  %v492_v63 = vld [vmem:[#allocation8 + $0xa8] sm:$0xff]  ;;  %v494_v4 = vld [vmem:[#allocation8 + $0xb8] sm:$0xff]  ;;  %v5717_v9 = vpack.c.bf16 %v485_v60, %v481_v56  ;;  %v491_v16 = vld [vmem:[#allocation8 + $0xa0] sm:$0xff] }
  0x5c   :  { %3504 = vmatpush1.bf16.msra.mxu0 %v5662_v1  ;;  %3536 = vmatpush1.bf16.msra.mxu1 %v5666_v6  ;;  %v5719_v12 = vpack.c.bf16 %v492_v63, %v488_v62  ;;  %v489_v17 = vld [vmem:[#allocation8 + $0x90] sm:$0xff]  ;;  %v496_v23 = vld [vmem:[#allocation8 + $0xc8] sm:$0xff]  ;;  %v498_v27 = vld [vmem:[#allocation8 + $0xd8] sm:$0xff]  ;;  %v5727_v34 = vpack.c.bf16 %v491_v16, %v487_v13 }
  0x5d   :  { %255 = vmatprep.mubr.f32.mxu0 %v6761_v0  ;;  %368 = vmatprep.mubr.f32.mxu1 %v6761_v0  ;;  %v493_v22 = vld [vmem:[#allocation8 + $0xb0] sm:$0xff]  ;;  %v500_v26 = vld [vmem:[#allocation8 + $0xe8] sm:$0xff]  ;;  %v502_v29 = vld [vmem:[#allocation8 + $0xf8] sm:$0xff] }
  0x5e   :  { %3506 = vmatprep.subr.bf16.mxu0 %v5670_v10  ;;  %3538 = vmatprep.subr.bf16.mxu1 %v5674_v14  ;;  %6899 = vst [vmem:[#allocation15_spill] sm:$0xff] %v5727_v34  ;;  %v5731_v35 = vpack.c.bf16 %v493_v22, %v489_v17  ;;  %v5733_v38 = vpack.c.bf16 %v500_v26, %v496_v23  ;;  %v495_v42 = vld [vmem:[#allocation8 + $0xc0] sm:$0xff]  ;;  %v497_v52 = vld [vmem:[#allocation8 + $0xd0] sm:$0xff]  ;;  %v504_v60 = vld [vmem:[#allocation8 + $0x108] sm:$0xff] }
  0x5f   :  { %3398 = vmatmul.mubr.msk.f32.gmra.mrb[14].mxu0 %vm111_vm3, %v72_v19  ;;  %3408 = vmatmul.mubr.msk.f32.gmra.mrb[14].mxu1 %vm111_vm3, %v72_v19  ;;  %v5722_v19 = vpack.c.bf16 %v494_v4, %v490_v3  ;;  %v499_v44 = vld [vmem:[#allocation8 + $0xe0] sm:$0xff]  ;;  %v5736_v53 = vpack.c.bf16 %v502_v29, %v498_v27  ;;  %v501_v56 = vld [vmem:[#allocation8 + $0xf0] sm:$0xff]  ;;  %v508_v62 = vld [vmem:[#allocation8 + $0x128] sm:$0xff] }
  0x60   :  { %3508 = vmatpush1.bf16.msra.mxu0 %v5681_v20  ;;  %3540 = vmatpush1.bf16.msra.mxu1 %v5685_v25  ;;  %6900 = vst [vmem:[#allocation16_spill] sm:$0xff] %v5731_v35  ;;  %6901 = vst [vmem:[#allocation17_spill] sm:$0xff] %v5733_v38  ;;  %v506_v63 = vld [vmem:[#allocation8 + $0x118] sm:$0xff]  ;;  %v5739_v4 = vpack.c.bf16 %v499_v44, %v495_v42  ;;  %v5743_v13 = vpack.c.bf16 %v501_v56, %v497_v52  ;;  %v503_v17 = vld [vmem:[#allocation8 + $0x100] sm:$0xff] }
  0x61   :  { %692 = vmatprep.mubr.f32.mxu0 %v6761_v0  ;;  %763 = vmatprep.mubr.f32.mxu1 %v6761_v0  ;;  %6902 = vst [vmem:[#allocation18_spill] sm:$0xff] %v5736_v53  ;;  %v510_v3 = vld [vmem:[#allocation8 + $0x138] sm:$0xff]  ;;  %v5745_v16 = vpack.c.bf16 %v508_v62, %v504_v60  ;;  %v507_v22 = vld [vmem:[#allocation8 + $0x120] sm:$0xff]  ;;  %v505_v26 = vld [vmem:[#allocation8 + $0x110] sm:$0xff] }
  0x62   :  { %3542 = vmatprep.subr.bf16.mxu0 %v5689_v32  ;;  %3606 = vmatprep.subr.bf16.mxu1 %v5693_v40  ;;  %6903 = vst [vmem:[#allocation19_spill] sm:$0xff] %v5739_v4  ;;  %6904 = vst [vmem:[#allocation20_spill] sm:$0xff] %v5743_v13  ;;  %v5748_v23 = vpack.c.bf16 %v510_v3, %v506_v63  ;;  %v509_v27 = vld [vmem:[#allocation8 + $0x130] sm:$0xff]  ;;  %v5751_v29 = vpack.c.bf16 %v507_v22, %v503_v17  ;;  %v512_v44 = vld [vmem:[#allocation8 + $0x148] sm:$0xff] }
  0x63   :  { %693 = vmatmul.mubr.f32.vlgmr.msra.gmra.mrb[0].mxu0 %v6761_v0  ;;  %764 = vmatmul.mubr.f32.vlgmr.msra.gmra.mrb[0].mxu1 %v6761_v0  ;;  %6905 = vst [vmem:[#allocation21_spill] sm:$0xff] %v5745_v16  ;;  %v5755_v42 = vpack.c.bf16 %v509_v27, %v505_v26  ;;  %v516_v52 = vld [vmem:[#allocation8 + $0x168] sm:$0xff]  ;;  %v514_v56 = vld [vmem:[#allocation8 + $0x158] sm:$0xff]  ;;  %v511_v63 = vld [vmem:[#allocation8 + $0x140] sm:$0xff] }
  0x64   :  { %3544 = vmatpush1.bf16.msra.mxu0 %v5697_v45  ;;  %3608 = vmatpush1.bf16.msra.mxu1 %v5701_v47  ;;  %6906 = vst [vmem:[#allocation22_spill] sm:$0xff] %v5748_v23  ;;  %6907 = vst [vmem:[#allocation23_spill] sm:$0xff] %v5751_v29  ;;  %v5760_v60 = vpack.c.bf16 %v516_v52, %v512_v44  ;;  %v518_v62 = vld [vmem:[#allocation8 + $0x178] sm:$0xff]  ;;  %v515_v3 = vld [vmem:[#allocation8 + $0x160] sm:$0xff] }
  0x65   :  { %3546 = vmatprep.subr.bf16.mxu0 %v5703_v49  ;;  %3610 = vmatprep.subr.bf16.mxu1 %v5707_v57  ;;  %6908 = vst [vmem:[#allocation24_spill] sm:$0xff] %v5755_v42  ;;  %v5762_v17 = vpack.c.bf16 %v518_v62, %v514_v56  ;;  %v5764_v22 = vpack.c.bf16 %v515_v3, %v511_v63  ;;  %v513_v26 = vld [vmem:[#allocation8 + $0x150] sm:$0xff]  ;;  %v524_v44 = vld [vmem:[#allocation8 + $0x1a8] sm:$0xff]  ;;  %v522_v52 = vld [vmem:[#allocation8 + $0x198] sm:$0xff] }
  0x66   :  { %862 = vmatprep.mubr.f32.mxu0 %v6761_v0  ;;  %933 = vmatprep.mubr.f32.mxu1 %v6761_v0  ;;  %6909 = vst [vmem:[#allocation25_spill] sm:$0xff] %v5760_v60  ;;  %v517_v27 = vld [vmem:[#allocation8 + $0x170] sm:$0xff]  ;;  %v526_v56 = vld [vmem:[#allocation8 + $0x1b8] sm:$0xff]  ;;  %v519_v62 = vld [vmem:[#allocation8 + $0x180] sm:$0xff] }
  0x67   :  { %6910 = vst [vmem:[#allocation26_spill] sm:$0xff] %v5762_v17  ;;  %6911 = vst [vmem:[#allocation27_spill] sm:$0xff] %v5764_v22  ;;  %v5767_v0 = vpack.c.bf16 %v517_v27, %v513_v26  ;;  %v523_v63 = vld [vmem:[#allocation8 + $0x1a0] sm:$0xff]  ;;  %v5774_v3 = vpack.c.bf16 %v526_v56, %v522_v52  ;;  %v521_v26 = vld [vmem:[#allocation8 + $0x190] sm:$0xff] }
  0x68   :  { %3548 = vmatpush1.bf16.msra.mxu0 %v5713_v7  ;;  %3612 = vmatpush1.bf16.msra.mxu1 %v5717_v9  ;;  %v525_v27 = vld [vmem:[#allocation8 + $0x1b0] sm:$0xff]  ;;  %v534_v52 = vld [vmem:[#allocation8 + $0x1f8] sm:$0xff]  ;;  %v527_v56 = vld [vmem:[#allocation8 + $0x1c0] sm:$0xff] }
  0x69   :  { %3550 = vmatprep.subr.bf16.mxu0 %v5719_v12  ;;  %3614 = vmatprep.subr.bf16.mxu1 %v5722_v19  ;;  %6912 = vst [vmem:[#allocation28_spill] sm:$0xff] %v5767_v0  ;;  %6914 = vst [vmem:[#allocation30_spill] sm:$0xff] %v5774_v3 }
  0x6c   :  { %3552 = vmatpush1.bf16.msra.mxu0 %v5727_v34  ;;  %3616 = vmatpush1.bf16.msra.mxu1 %v5731_v35 }
  0x6d   :  { %3554 = vmatprep.subr.bf16.mxu0 %v5733_v38  ;;  %3618 = vmatprep.subr.bf16.mxu1 %v5736_v53 }
  0x70   :  { %3556 = vmatpush1.bf16.msra.mxu0 %v5739_v4  ;;  %3620 = vmatpush1.bf16.msra.mxu1 %v5743_v13  ;;  %v590_v13 = vld [vmem:[#allocation8 + $0x3b8] sm:$0xff] }
  0x71   :  { %3558 = vmatprep.subr.bf16.mxu0 %v5745_v16  ;;  %3622 = vmatprep.subr.bf16.mxu1 %v5748_v23  ;;  %v5776_v23 = vpack.c.bf16 %v523_v63, %v519_v62  ;;  %v531_v62 = vld [vmem:[#allocation8 + $0x1e0] sm:$0xff]  ;;  %v586_v16 = vld [vmem:[#allocation8 + $0x398] sm:$0xff] }
  0x73   :  { %6915 = vst [vmem:[#allocation31_spill] sm:$0xff] %v5776_v23 }
  0x74   :  { %3560 = vmatpush1.bf16.msra.mxu0 %v5751_v29  ;;  %3624 = vmatpush1.bf16.msra.mxu1 %v5755_v42  ;;  %v520_v42 = vld [vmem:[#allocation8 + $0x188] sm:$0xff] }
  0x75   :  { %3562 = vmatprep.subr.bf16.mxu0 %v5760_v60  ;;  %3626 = vmatprep.subr.bf16.mxu1 %v5762_v17  ;;  %v5772_v29 = vpack.c.bf16 %v524_v44, %v520_v42  ;;  %v5779_v17 = vpack.c.bf16 %v525_v27, %v521_v26  ;;  %v532_v42 = vld [vmem:[#allocation8 + $0x1e8] sm:$0xff]  ;;  %v530_v44 = vld [vmem:[#allocation8 + $0x1d8] sm:$0xff]  ;;  %v5788_v60 = vpack.c.bf16 %v531_v62, %v527_v56  ;;  %v529_v26 = vld [vmem:[#allocation8 + $0x1d0] sm:$0xff] }
  0x76   :  { %v5786_v63 = vpack.c.bf16 %v534_v52, %v530_v44  ;;  %v533_v27 = vld [vmem:[#allocation8 + $0x1f0] sm:$0xff]  ;;  %v542_v44 = vld [vmem:[#allocation8 + $0x238] sm:$0xff]  ;;  %v535_v52 = vld [vmem:[#allocation8 + $0x200] sm:$0xff] }
  0x77   :  { %6913 = vst [vmem:[#allocation29_spill] sm:$0xff] %v5772_v29  ;;  %6916 = vst [vmem:[#allocation32_spill] sm:$0xff] %v5779_v17  ;;  %v539_v56 = vld [vmem:[#allocation8 + $0x220] sm:$0xff] }
  0x78   :  { %3564 = vmatpush1.bf16.msra.mxu0 %v5764_v22  ;;  %3628 = vmatpush1.bf16.msra.mxu1 %v5767_v0  ;;  %v528_v0 = vld [vmem:[#allocation8 + $0x1c8] sm:$0xff]  ;;  %6918 = vst [vmem:[#allocation34_spill] sm:$0xff] %v5786_v63  ;;  %6919 = vst [vmem:[#allocation35_spill] sm:$0xff] %v5788_v60 }
  0x79   :  { %3566 = vmatprep.subr.bf16.mxu0 %v5772_v29  ;;  %3630 = vmatprep.subr.bf16.mxu1 %v5774_v3  ;;  %v5784_v22 = vpack.c.bf16 %v532_v42, %v528_v0  ;;  %v5791_v3 = vpack.c.bf16 %v533_v27, %v529_v26  ;;  %v540_v0 = vld [vmem:[#allocation8 + $0x228] sm:$0xff]  ;;  %v538_v42 = vld [vmem:[#allocation8 + $0x218] sm:$0xff]  ;;  %v5800_v29 = vpack.c.bf16 %v539_v56, %v535_v52  ;;  %v537_v26 = vld [vmem:[#allocation8 + $0x210] sm:$0xff] }
  0x7a   :  { %v5798_v62 = vpack.c.bf16 %v542_v44, %v538_v42  ;;  %v541_v27 = vld [vmem:[#allocation8 + $0x230] sm:$0xff]  ;;  %v550_v42 = vld [vmem:[#allocation8 + $0x278] sm:$0xff]  ;;  %v543_v44 = vld [vmem:[#allocation8 + $0x240] sm:$0xff] }
  0x7b   :  { %6917 = vst [vmem:[#allocation33_spill] sm:$0xff] %v5784_v22  ;;  %6920 = vst [vmem:[#allocation36_spill] sm:$0xff] %v5791_v3  ;;  %v547_v52 = vld [vmem:[#allocation8 + $0x260] sm:$0xff] }
  0x7c   :  { %3568 = vmatpush1.bf16.msra.mxu0 %v5776_v23  ;;  %3632 = vmatpush1.bf16.msra.mxu1 %v5779_v17  ;;  %v536_v17 = vld [vmem:[#allocation8 + $0x208] sm:$0xff]  ;;  %6922 = vst [vmem:[#allocation38_spill] sm:$0xff] %v5798_v62  ;;  %6923 = vst [vmem:[#allocation39_spill] sm:$0xff] %v5800_v29 }
  0x7d   :  { %3570 = vmatprep.subr.bf16.mxu0 %v5784_v22  ;;  %3634 = vmatprep.subr.bf16.mxu1 %v5786_v63  ;;  %v5796_v23 = vpack.c.bf16 %v540_v0, %v536_v17  ;;  %v5803_v63 = vpack.c.bf16 %v541_v27, %v537_v26  ;;  %v548_v17 = vld [vmem:[#allocation8 + $0x268] sm:$0xff]  ;;  %v546_v0 = vld [vmem:[#allocation8 + $0x258] sm:$0xff]  ;;  %v5812_v22 = vpack.c.bf16 %v547_v52, %v543_v44  ;;  %v545_v26 = vld [vmem:[#allocation8 + $0x250] sm:$0xff] }
  0x7e   :  { %v5810_v56 = vpack.c.bf16 %v550_v42, %v546_v0  ;;  %v549_v27 = vld [vmem:[#allocation8 + $0x270] sm:$0xff]  ;;  %v558_v0 = vld [vmem:[#allocation8 + $0x2b8] sm:$0xff]  ;;  %v551_v42 = vld [vmem:[#allocation8 + $0x280] sm:$0xff] }
  0x7f   :  { %6921 = vst [vmem:[#allocation37_spill] sm:$0xff] %v5796_v23  ;;  %6924 = vst [vmem:[#allocation40_spill] sm:$0xff] %v5803_v63  ;;  %v555_v44 = vld [vmem:[#allocation8 + $0x2a0] sm:$0xff] }
  0x80   :  { %3572 = vmatpush1.bf16.msra.mxu0 %v5788_v60  ;;  %3636 = vmatpush1.bf16.msra.mxu1 %v5791_v3  ;;  %v544_v3 = vld [vmem:[#allocation8 + $0x248] sm:$0xff]  ;;  %6926 = vst [vmem:[#allocation42_spill] sm:$0xff] %v5810_v56  ;;  %6927 = vst [vmem:[#allocation43_spill] sm:$0xff] %v5812_v22 }
  0x81   :  { %3574 = vmatprep.subr.bf16.mxu0 %v5796_v23  ;;  %3638 = vmatprep.subr.bf16.mxu1 %v5798_v62  ;;  %v5808_v60 = vpack.c.bf16 %v548_v17, %v544_v3  ;;  %v5815_v62 = vpack.c.bf16 %v549_v27, %v545_v26  ;;  %v556_v3 = vld [vmem:[#allocation8 + $0x2a8] sm:$0xff]  ;;  %v554_v17 = vld [vmem:[#allocation8 + $0x298] sm:$0xff]  ;;  %v5824_v23 = vpack.c.bf16 %v555_v44, %v551_v42  ;;  %v553_v26 = vld [vmem:[#allocation8 + $0x290] sm:$0xff] }
  0x82   :  { %v5822_v52 = vpack.c.bf16 %v558_v0, %v554_v17  ;;  %v557_v27 = vld [vmem:[#allocation8 + $0x2b0] sm:$0xff]  ;;  %v566_v17 = vld [vmem:[#allocation8 + $0x2f8] sm:$0xff]  ;;  %v559_v0 = vld [vmem:[#allocation8 + $0x2c0] sm:$0xff] }
  0x83   :  { %6925 = vst [vmem:[#allocation41_spill] sm:$0xff] %v5808_v60  ;;  %6928 = vst [vmem:[#allocation44_spill] sm:$0xff] %v5815_v62  ;;  %v563_v42 = vld [vmem:[#allocation8 + $0x2e0] sm:$0xff] }
  0x84   :  { %3576 = vmatpush1.bf16.msra.mxu0 %v5800_v29  ;;  %3640 = vmatpush1.bf16.msra.mxu1 %v5803_v63  ;;  %v552_v63 = vld [vmem:[#allocation8 + $0x288] sm:$0xff]  ;;  %6930 = vst [vmem:[#allocation46_spill] sm:$0xff] %v5822_v52  ;;  %6931 = vst [vmem:[#allocation47_spill] sm:$0xff] %v5824_v23 }
  0x85   :  { %3578 = vmatprep.subr.bf16.mxu0 %v5808_v60  ;;  %3642 = vmatprep.subr.bf16.mxu1 %v5810_v56  ;;  %v5820_v29 = vpack.c.bf16 %v556_v3, %v552_v63  ;;  %v5827_v56 = vpack.c.bf16 %v557_v27, %v553_v26  ;;  %v564_v63 = vld [vmem:[#allocation8 + $0x2e8] sm:$0xff]  ;;  %v562_v3 = vld [vmem:[#allocation8 + $0x2d8] sm:$0xff]  ;;  %v5836_v60 = vpack.c.bf16 %v563_v42, %v559_v0  ;;  %v561_v26 = vld [vmem:[#allocation8 + $0x2d0] sm:$0xff] }
  0x86   :  { %v5834_v44 = vpack.c.bf16 %v566_v17, %v562_v3  ;;  %v565_v27 = vld [vmem:[#allocation8 + $0x2f0] sm:$0xff]  ;;  %v574_v3 = vld [vmem:[#allocation8 + $0x338] sm:$0xff]  ;;  %v567_v17 = vld [vmem:[#allocation8 + $0x300] sm:$0xff] }
  0x87   :  { %6929 = vst [vmem:[#allocation45_spill] sm:$0xff] %v5820_v29  ;;  %6932 = vst [vmem:[#allocation48_spill] sm:$0xff] %v5827_v56  ;;  %v571_v0 = vld [vmem:[#allocation8 + $0x320] sm:$0xff] }
  0x88   :  { %3580 = vmatpush1.bf16.msra.mxu0 %v5812_v22  ;;  %3644 = vmatpush1.bf16.msra.mxu1 %v5815_v62  ;;  %v560_v62 = vld [vmem:[#allocation8 + $0x2c8] sm:$0xff]  ;;  %6934 = vst [vmem:[#allocation50_spill] sm:$0xff] %v5834_v44  ;;  %6935 = vst [vmem:[#allocation51_spill] sm:$0xff] %v5836_v60 }
  0x89   :  { %3582 = vmatprep.subr.bf16.mxu0 %v5820_v29  ;;  %3646 = vmatprep.subr.bf16.mxu1 %v5822_v52  ;;  %v5832_v22 = vpack.c.bf16 %v564_v63, %v560_v62  ;;  %v5839_v52 = vpack.c.bf16 %v565_v27, %v561_v26  ;;  %v572_v62 = vld [vmem:[#allocation8 + $0x328] sm:$0xff]  ;;  %v570_v63 = vld [vmem:[#allocation8 + $0x318] sm:$0xff]  ;;  %v5848_v29 = vpack.c.bf16 %v571_v0, %v567_v17  ;;  %v569_v26 = vld [vmem:[#allocation8 + $0x310] sm:$0xff] }
  0x8a   :  { %v5846_v42 = vpack.c.bf16 %v574_v3, %v570_v63  ;;  %v573_v27 = vld [vmem:[#allocation8 + $0x330] sm:$0xff]  ;;  %v582_v63 = vld [vmem:[#allocation8 + $0x378] sm:$0xff]  ;;  %v575_v3 = vld [vmem:[#allocation8 + $0x340] sm:$0xff] }
  0x8b   :  { %6933 = vst [vmem:[#allocation49_spill] sm:$0xff] %v5832_v22  ;;  %6936 = vst [vmem:[#allocation52_spill] sm:$0xff] %v5839_v52  ;;  %v579_v17 = vld [vmem:[#allocation8 + $0x360] sm:$0xff] }
  0x8c   :  { %3584 = vmatpush1.bf16.msra.mxu0 %v5824_v23  ;;  %3648 = vmatpush1.bf16.msra.mxu1 %v5827_v56  ;;  %v568_v56 = vld [vmem:[#allocation8 + $0x308] sm:$0xff]  ;;  %6938 = vst [vmem:[#allocation54_spill] sm:$0xff] %v5846_v42  ;;  %6939 = vst [vmem:[#allocation55_spill] sm:$0xff] %v5848_v29 }
  0x8d   :  { %3586 = vmatprep.subr.bf16.mxu0 %v5832_v22  ;;  %3650 = vmatprep.subr.bf16.mxu1 %v5834_v44  ;;  %v5844_v23 = vpack.c.bf16 %v572_v62, %v568_v56  ;;  %v5851_v44 = vpack.c.bf16 %v573_v27, %v569_v26  ;;  %v580_v56 = vld [vmem:[#allocation8 + $0x368] sm:$0xff]  ;;  %v578_v62 = vld [vmem:[#allocation8 + $0x358] sm:$0xff]  ;;  %v5860_v22 = vpack.c.bf16 %v579_v17, %v575_v3  ;;  %v577_v26 = vld [vmem:[#allocation8 + $0x350] sm:$0xff] }
  0x8e   :  { %v5858_v0 = vpack.c.bf16 %v582_v63, %v578_v62  ;;  %v581_v27 = vld [vmem:[#allocation8 + $0x370] sm:$0xff]  ;;  %v583_v62 = vld [vmem:[#allocation8 + $0x380] sm:$0xff] }
  0x8f   :  { %6937 = vst [vmem:[#allocation53_spill] sm:$0xff] %v5844_v23  ;;  %6940 = vst [vmem:[#allocation56_spill] sm:$0xff] %v5851_v44  ;;  %v587_v63 = vld [vmem:[#allocation8 + $0x3a0] sm:$0xff]  ;;  %v585_v3 = vld [vmem:[#allocation8 + $0x390] sm:$0xff] }
  0x90   :  { %3588 = vmatpush1.bf16.msra.mxu0 %v5836_v60  ;;  %3652 = vmatpush1.bf16.msra.mxu1 %v5839_v52  ;;  %v576_v52 = vld [vmem:[#allocation8 + $0x348] sm:$0xff]  ;;  %6942 = vst [vmem:[#allocation58_spill] sm:$0xff] %v5858_v0  ;;  %6943 = vst [vmem:[#allocation59_spill] sm:$0xff] %v5860_v22  ;;  %v5872_v17 = vpack.c.bf16 %v587_v63, %v583_v62  ;;  %v597_v62 = vld [vmem:[#allocation8 + $0x3f0] sm:$0xff] }
  0x91   :  { %3590 = vmatprep.subr.bf16.mxu0 %v5844_v23  ;;  %3654 = vmatprep.subr.bf16.mxu1 %v5846_v42  ;;  %v5856_v60 = vpack.c.bf16 %v580_v56, %v576_v52  ;;  %v584_v23 = vld [vmem:[#allocation8 + $0x388] sm:$0xff]  ;;  %v5869_v56 = vpack.c.bf16 %v590_v13, %v586_v16  ;;  %v594_v13 = vld [vmem:[#allocation8 + $0x3d8] sm:$0xff] }
  0x92   :  { %v588_v42 = vld [vmem:[#allocation8 + $0x3a8] sm:$0xff]  ;;  %6947 = vst [vmem:[#allocation63_spill] sm:$0xff] %v5872_v17  ;;  %v598_v16 = vld [vmem:[#allocation8 + $0x3f8] sm:$0xff] }
  0x93   :  { %6941 = vst [vmem:[#allocation57_spill] sm:$0xff] %v5856_v60  ;;  %v5867_v52 = vpack.c.bf16 %v588_v42, %v584_v23  ;;  %6946 = vst [vmem:[#allocation62_spill] sm:$0xff] %v5869_v56  ;;  %v591_v42 = vld [vmem:[#allocation8 + $0x3c0] sm:$0xff] }
  0x94   :  { %3592 = vmatpush1.bf16.msra.mxu0 %v5848_v29  ;;  %3656 = vmatpush1.bf16.msra.mxu1 %v5851_v44  ;;  %v5863_v29 = vpack.c.bf16 %v581_v27, %v577_v26  ;;  %v589_v26 = vld [vmem:[#allocation8 + $0x3b0] sm:$0xff]  ;;  %v592_v27 = vld [vmem:[#allocation8 + $0x3c8] sm:$0xff]  ;;  %v595_v44 = vld [vmem:[#allocation8 + $0x3e0] sm:$0xff] }
  0x95   :  { %3594 = vmatprep.subr.bf16.mxu0 %v5856_v60  ;;  %3658 = vmatprep.subr.bf16.mxu1 %v5858_v0  ;;  %6945 = vst [vmem:[#allocation61_spill] sm:$0xff] %v5867_v52  ;;  %v596_v60 = vld [vmem:[#allocation8 + $0x3e8] sm:$0xff]  ;;  %v5876_v0 = vpack.c.bf16 %v589_v26, %v585_v3  ;;  %v5883_v63 = vpack.c.bf16 %v595_v44, %v591_v42 }
  0x96   :  { %6944 = vst [vmem:[#allocation60_spill] sm:$0xff] %v5863_v29  ;;  %v5878_v23 = vpack.c.bf16 %v596_v60, %v592_v27  ;;  %v91_v60 = vlaneseq }
  0x97   :  { %6948 = vst [vmem:[#allocation64_spill] sm:$0xff] %v5876_v0  ;;  %6951 = vst [vmem:[#allocation67_spill] sm:$0xff] %v5883_v63 }
  0x98   :  { %3596 = vmatpush1.bf16.msra.mxu0 %v5860_v22  ;;  %3660 = vmatpush1.bf16.msra.mxu1 %v5863_v29  ;;  %6949 = vst [vmem:[#allocation65_spill] sm:$0xff] %v5878_v23  ;;  %v5880_v22 = vpack.c.bf16 %v598_v16, %v594_v13  ;;  %v593_v29 = vld [vmem:[#allocation8 + $0x3d0] sm:$0xff]  ;;  %v5894_v26 = vshrl.u32 %v91_v60, 7 }
  0x99   :  { %3598 = vmatprep.subr.bf16.mxu0 %v5867_v52  ;;  %3662 = vmatprep.subr.bf16.mxu1 %v5869_v56  ;;  %v5887_v3 = vpack.c.bf16 %v597_v62, %v593_v29  ;;  %v89_v29 = vld [vmem:[%s6756_s2] sm:$0xf] }
  0x9a   :  { %6950 = vst [vmem:[#allocation66_spill] sm:$0xff] %v5880_v22  ;;  %6953 = vst [vmem:[#allocation69_spill] sm:$0xff] %v5894_v26  ;;  %v6857_v44 = vsub.s32 0, %v5894_v26  ;;  %v6858_v27 = vsub.s32 1, %v5894_v26  ;;  %v6865_v62 = vsub.s32 3, %v5894_v26 }
  0x9b   :  { %6952 = vst [vmem:[#allocation68_spill] sm:$0xff] %v5887_v3 }
  0x9c   :  { %3600 = vmatpush1.bf16.msra.mxu0 %v5872_v17  ;;  %3664 = vmatpush1.bf16.msra.mxu1 %v5876_v0  ;;  %v5903_v13 = vrot.slane %v89_v29, %v6857_v44  ;;  %v5907_v16 = vrot.slane %v89_v29, %v6858_v27  ;;  %v5914_v44 = vrot.slane %v89_v29, %v6865_v62  ;;  %v6874_v27 = vsub.s32 2, %v5894_v26 }
  0x9d   :  { %3602 = vmatprep.subr.bf16.mxu0 %v5878_v23  ;;  %3666 = vmatprep.subr.bf16.mxu1 %v5880_v22 }
  0x9e   :  { %6954 = vst [vmem:[#allocation70_spill] sm:$0xff] %v5903_v13  ;;  %6955 = vst [vmem:[#allocation71_spill] sm:$0xff] %v5907_v16 }
  0x9f   :  { %6956 = vst [vmem:[#allocation72_spill] sm:$0xff] %v5914_v44 }
  0xa0   :  { %3604 = vmatpush1.bf16.msra.mxu0 %v5883_v63  ;;  %3668 = vmatpush1.bf16.msra.mxu1 %v5887_v3 }
  0xa1   :  { %3670 = vmatprep.subr.bf16.mxu0 %v5540_v30  ;;  %3702 = vmatprep.subr.bf16.mxu1 %v5542_v31 }
 0x136   :  { %v694_v42 = vpop.f32.mrb[0].mxu0  ;;  %v765_v31 = vpop.f32.mrb[0].mxu1 }
 0x137   :  { %v5013_v60 = vadd.f32 %v694_v42, %v5903_v13  ;;  %v696_v30 = vpop.f32.mrb[1].mxu0  ;;  %v767_v63 = vpop.f32.mrb[1].mxu1  ;;  %v5920_v42 = vrot.slane %v89_v29, %v6874_v27  ;;  %v6972_v27 = vld [vmem:[#allocation34_spill] sm:$0xff] }
 0x138   :  { %v5014_v3 = vadd.f32 %v696_v30, %v5907_v16  ;;  %v5030_v0 = vadd.f32 %v767_v63, %v5914_v44 }
 0x139   :  { %v3409_v22 = vmul.f32 -1.442695, %v5013_v60  ;;  %v5029_v30 = vadd.f32 %v765_v31, %v5920_v42 }
 0x13a   :  { %v3410_v23 = vmul.f32 -1.442695, %v5014_v3  ;;  %v3411_v13 = vmul.f32 -1.442695, %v5030_v0 }
 0x13b   :  { %5085 = vpow2.f32 %v3409_v22 }
 0x13c   :  { %5087 = vpow2.f32 %v3410_v23 }
 0x13d   :  { %5089 = vpow2.f32 %v3411_v13  ;;  %v6961_v13 = vld [vmem:[#allocation23_spill] sm:$0xff] }
 0x13e   :  { %5091 = vtanh.f32 %v5029_v30  ;;  %v6963_v30 = vld [vmem:[#allocation25_spill] sm:$0xff] }
 0x145   :  { %v5086_v16 = vpop.eup %5085 }
 0x146   :  { %v5088_v60 = vpop.eup %5087  ;;  %v777_v3 = vadd.f32 1.0, %v5086_v16 }
 0x147   :  { %v783_v62 = vadd.f32 1.0, %v5088_v60  ;;  %v5090_v22 = vpop.eup %5089  ;;  %v6964_v60 = vld [vmem:[#allocation26_spill] sm:$0xff] }
 0x148   :  { %5093 = vrcp.f32 %v777_v3  ;;  %v5092_v17 = vpop.eup %5091  ;;  %v790_v44 = vadd.f32 1.0, %v5090_v22  ;;  %v6965_v3 = vld [vmem:[#allocation27_spill] sm:$0xff]  ;;  %v6966_v22 = vld [vmem:[#allocation28_spill] sm:$0xff] }
 0x149   :  { %5095 = vrcp.f32 %v783_v62  ;;  %v6962_v62 = vld [vmem:[#allocation24_spill] sm:$0xff] }
 0x14a   :  { %5097 = vrcp.f32 %v790_v44  ;;  %v6960_v44 = vld [vmem:[#allocation22_spill] sm:$0xff] }
 0x152   :  { %v5094_v23 = vpop.eup %5093 }
 0x153   :  { %v5096_v56 = vpop.eup %5095  ;;  %v794_v63 = vmul.f32 %v5094_v23, %v5092_v17  ;;  %v6957_v17 = vmov 0.0   ;;  %v6967_v23 = vld [vmem:[#allocation29_spill] sm:$0xff] }
 0x154   :  { %v793_v26 = vmul.f32 0.0, %v5096_v56  ;;  %v5098_v31 = vpop.eup %5097  ;;  %v6958_v56 = vld [vmem:[#allocation20_spill] sm:$0xff] }
 0x156   :  { %v5923_v29 = vadd.f32 %v794_v63, %v793_v26  ;;  %v6959_v26 = vld [vmem:[#allocation21_spill] sm:$0xff]  ;;  %v6968_v63 = vld [vmem:[#allocation30_spill] sm:$0xff] }
 0x158   :  { %5099 = vtanh.f32 %v5923_v29 }
 0x162   :  { %v5100_v0 = vpop.eup %5099 }
 0x163   :  { %v797_v16 = vmul.f32 %v5100_v0, %v5098_v31  ;;  %v6969_v31 = vld [vmem:[#allocation31_spill] sm:$0xff]  ;;  %v6970_v0 = vld [vmem:[#allocation32_spill] sm:$0xff] }
 0x165   :  { %863 = vmatmul.mubr.f32.vlgmr.msra.gmra.mrb[16].mxu0 %v797_v16  ;;  %934 = vmatmul.mubr.f32.vlgmr.msra.gmra.mrb[16].mxu1 %v797_v16 }
 0x166   :  { %3672 = vmatpush1.bf16.msra.mxu0 %v5549_v36  ;;  %3704 = vmatpush1.bf16.msra.mxu1 %v5554_v39 }
 0x167   :  { %3674 = vmatprep.subr.bf16.mxu0 %v5557_v43  ;;  %3706 = vmatprep.subr.bf16.mxu1 %v5563_v48 }
 0x168   :  { %1035 = vmatprep.mubr.f32.mxu0 %v6957_v17  ;;  %1106 = vmatprep.mubr.f32.mxu1 %v6957_v17 }
 0x16a   :  { %3676 = vmatpush1.bf16.msra.mxu0 %v5567_v51  ;;  %3708 = vmatpush1.bf16.msra.mxu1 %v5571_v55 }
 0x16b   :  { %3678 = vmatprep.subr.bf16.mxu0 %v5575_v58  ;;  %3710 = vmatprep.subr.bf16.mxu1 %v5579_v61 }
 0x16e   :  { %3680 = vmatpush1.bf16.msra.mxu0 %v5586_v2  ;;  %3712 = vmatpush1.bf16.msra.mxu1 %v5590_v5 }
 0x16f   :  { %3682 = vmatprep.subr.bf16.mxu0 %v5594_v8  ;;  %3714 = vmatprep.subr.bf16.mxu1 %v5598_v11 }
 0x172   :  { %3684 = vmatpush1.bf16.msra.mxu0 %v5605_v15  ;;  %3716 = vmatpush1.bf16.msra.mxu1 %v5609_v18 }
 0x173   :  { %3686 = vmatprep.subr.bf16.mxu0 %v5613_v21  ;;  %3718 = vmatprep.subr.bf16.mxu1 %v5617_v24 }
 0x176   :  { %3688 = vmatpush1.bf16.msra.mxu0 %v5624_v28  ;;  %3720 = vmatpush1.bf16.msra.mxu1 %v5628_v33 }
 0x177   :  { %3690 = vmatprep.subr.bf16.mxu0 %v5632_v37  ;;  %3722 = vmatprep.subr.bf16.mxu1 %v5636_v41 }
 0x17a   :  { %3692 = vmatpush1.bf16.msra.mxu0 %v5643_v46  ;;  %3724 = vmatpush1.bf16.msra.mxu1 %v5647_v50 }
 0x17b   :  { %3694 = vmatprep.subr.bf16.mxu0 %v5651_v54  ;;  %3726 = vmatprep.subr.bf16.mxu1 %v5655_v59 }
 0x17e   :  { %3696 = vmatpush1.bf16.msra.mxu0 %v5662_v1  ;;  %3728 = vmatpush1.bf16.msra.mxu1 %v5666_v6 }
 0x17f   :  { %3698 = vmatprep.subr.bf16.mxu0 %v5670_v10  ;;  %3730 = vmatprep.subr.bf16.mxu1 %v5674_v14 }
 0x182   :  { %3700 = vmatpush1.bf16.msra.mxu0 %v5681_v20  ;;  %3732 = vmatpush1.bf16.msra.mxu1 %v5685_v25 }
 0x183   :  { %3734 = vmatprep.subr.bf16.mxu0 %v5689_v32  ;;  %3798 = vmatprep.subr.bf16.mxu1 %v5693_v40 }
 0x185   :  { %1036 = vmatmul.mubr.f32.vlgmr.msra.gmra.mrb[2].mxu0 %v797_v16  ;;  %1107 = vmatmul.mubr.f32.vlgmr.msra.gmra.mrb[2].mxu1 %v797_v16  ;;  %v6971_v16 = vld [vmem:[#allocation33_spill] sm:$0xff] }
 0x186   :  { %3736 = vmatpush1.bf16.msra.mxu0 %v5697_v45  ;;  %3800 = vmatpush1.bf16.msra.mxu1 %v5701_v47 }
 0x187   :  { %3738 = vmatprep.subr.bf16.mxu0 %v5703_v49  ;;  %3802 = vmatprep.subr.bf16.mxu1 %v5707_v57 }
 0x18a   :  { %3740 = vmatpush1.bf16.msra.mxu0 %v5713_v7  ;;  %3804 = vmatpush1.bf16.msra.mxu1 %v5717_v9 }
 0x18b   :  { %3742 = vmatprep.subr.bf16.mxu0 %v5719_v12  ;;  %3806 = vmatprep.subr.bf16.mxu1 %v5722_v19 }
 0x18e   :  { %3744 = vmatpush1.bf16.msra.mxu0 %v5727_v34  ;;  %3808 = vmatpush1.bf16.msra.mxu1 %v5731_v35 }
 0x18f   :  { %3746 = vmatprep.subr.bf16.mxu0 %v5733_v38  ;;  %3810 = vmatprep.subr.bf16.mxu1 %v5736_v53 }
 0x192   :  { %3748 = vmatpush1.bf16.msra.mxu0 %v5739_v4  ;;  %3812 = vmatpush1.bf16.msra.mxu1 %v6958_v56 }
 0x193   :  { %3750 = vmatprep.subr.bf16.mxu0 %v6959_v26  ;;  %3814 = vmatprep.subr.bf16.mxu1 %v6960_v44 }
 0x196   :  { %3752 = vmatpush1.bf16.msra.mxu0 %v6961_v13  ;;  %3816 = vmatpush1.bf16.msra.mxu1 %v6962_v62  ;;  %v6973_v62 = vld [vmem:[#allocation35_spill] sm:$0xff] }
 0x197   :  { %3754 = vmatprep.subr.bf16.mxu0 %v6963_v30  ;;  %3818 = vmatprep.subr.bf16.mxu1 %v6964_v60  ;;  %v6974_v30 = vld [vmem:[#allocation36_spill] sm:$0xff]  ;;  %v6975_v60 = vld [vmem:[#allocation37_spill] sm:$0xff] }
 0x19a   :  { %3756 = vmatpush1.bf16.msra.mxu0 %v6965_v3  ;;  %3820 = vmatpush1.bf16.msra.mxu1 %v6966_v22  ;;  %v6976_v3 = vld [vmem:[#allocation38_spill] sm:$0xff]  ;;  %v6977_v22 = vld [vmem:[#allocation39_spill] sm:$0xff] }
 0x19b   :  { %3758 = vmatprep.subr.bf16.mxu0 %v6967_v23  ;;  %3822 = vmatprep.subr.bf16.mxu1 %v6968_v63  ;;  %v6978_v23 = vld [vmem:[#allocation40_spill] sm:$0xff]  ;;  %v6979_v63 = vld [vmem:[#allocation41_spill] sm:$0xff] }
 0x19e   :  { %3760 = vmatpush1.bf16.msra.mxu0 %v6969_v31  ;;  %3824 = vmatpush1.bf16.msra.mxu1 %v6970_v0  ;;  %v6980_v31 = vld [vmem:[#allocation42_spill] sm:$0xff]  ;;  %v6981_v0 = vld [vmem:[#allocation43_spill] sm:$0xff] }
 0x19f   :  { %3762 = vmatprep.subr.bf16.mxu0 %v6971_v16  ;;  %3826 = vmatprep.subr.bf16.mxu1 %v6972_v27  ;;  %v6982_v16 = vld [vmem:[#allocation44_spill] sm:$0xff]  ;;  %v6983_v27 = vld [vmem:[#allocation45_spill] sm:$0xff] }
 0x1a2   :  { %3764 = vmatpush1.bf16.msra.mxu0 %v6973_v62  ;;  %3828 = vmatpush1.bf16.msra.mxu1 %v6974_v30  ;;  %v6984_v62 = vld [vmem:[#allocation46_spill] sm:$0xff]  ;;  %v6985_v30 = vld [vmem:[#allocation47_spill] sm:$0xff] }
 0x1a3   :  { %3766 = vmatprep.subr.bf16.mxu0 %v6975_v60  ;;  %3830 = vmatprep.subr.bf16.mxu1 %v6976_v3  ;;  %v6986_v60 = vld [vmem:[#allocation48_spill] sm:$0xff]  ;;  %v6987_v3 = vld [vmem:[#allocation49_spill] sm:$0xff] }
 0x1a6   :  { %3768 = vmatpush1.bf16.msra.mxu0 %v6977_v22  ;;  %3832 = vmatpush1.bf16.msra.mxu1 %v6978_v23  ;;  %v6988_v22 = vld [vmem:[#allocation50_spill] sm:$0xff]  ;;  %v6989_v23 = vld [vmem:[#allocation51_spill] sm:$0xff] }
 0x1a7   :  { %3770 = vmatprep.subr.bf16.mxu0 %v6979_v63  ;;  %3834 = vmatprep.subr.bf16.mxu1 %v6980_v31  ;;  %v6990_v63 = vld [vmem:[#allocation52_spill] sm:$0xff]  ;;  %v6991_v31 = vld [vmem:[#allocation53_spill] sm:$0xff] }
 0x1aa   :  { %3772 = vmatpush1.bf16.msra.mxu0 %v6981_v0  ;;  %3836 = vmatpush1.bf16.msra.mxu1 %v6982_v16  ;;  %v6992_v0 = vld [vmem:[#allocation54_spill] sm:$0xff]  ;;  %v6993_v16 = vld [vmem:[#allocation55_spill] sm:$0xff] }
 0x1ab   :  { %3774 = vmatprep.subr.bf16.mxu0 %v6983_v27  ;;  %3838 = vmatprep.subr.bf16.mxu1 %v6984_v62  ;;  %v6994_v27 = vld [vmem:[#allocation56_spill] sm:$0xff]  ;;  %v6995_v62 = vld [vmem:[#allocation57_spill] sm:$0xff] }
 0x1ae   :  { %3776 = vmatpush1.bf16.msra.mxu0 %v6985_v30  ;;  %3840 = vmatpush1.bf16.msra.mxu1 %v6986_v60  ;;  %v6996_v30 = vld [vmem:[#allocation58_spill] sm:$0xff]  ;;  %v6997_v60 = vld [vmem:[#allocation59_spill] sm:$0xff] }
 0x1af   :  { %3778 = vmatprep.subr.bf16.mxu0 %v6987_v3  ;;  %3842 = vmatprep.subr.bf16.mxu1 %v6988_v22  ;;  %v6998_v3 = vld [vmem:[#allocation60_spill] sm:$0xff] }
 0x1b2   :  { %3780 = vmatpush1.bf16.msra.mxu0 %v6989_v23  ;;  %3844 = vmatpush1.bf16.msra.mxu1 %v6990_v63  ;;  %v6999_v23 = vld [vmem:[#allocation62_spill] sm:$0xff]  ;;  %v7000_v63 = vld [vmem:[#allocation63_spill] sm:$0xff] }
 0x1b3   :  { %3782 = vmatprep.subr.bf16.mxu0 %v6991_v31  ;;  %3846 = vmatprep.subr.bf16.mxu1 %v6992_v0  ;;  %v7001_v31 = vld [vmem:[#allocation64_spill] sm:$0xff]  ;;  %v7002_v0 = vld [vmem:[#allocation65_spill] sm:$0xff] }
 0x1b6   :  { %3784 = vmatpush1.bf16.msra.mxu0 %v6993_v16  ;;  %3848 = vmatpush1.bf16.msra.mxu1 %v6994_v27  ;;  %v7003_v16 = vld [vmem:[#allocation66_spill] sm:$0xff]  ;;  %v7004_v27 = vld [vmem:[#allocation67_spill] sm:$0xff] }
 0x1b7   :  { %3786 = vmatprep.subr.bf16.mxu0 %v6995_v62  ;;  %3850 = vmatprep.subr.bf16.mxu1 %v6996_v30  ;;  %v7005_v62 = vld [vmem:[#allocation68_spill] sm:$0xff]  ;;  %v7006_v30 = vld [vmem:[#allocation13_spill] sm:$0xff] }
 0x1ba   :  { %3788 = vmatpush1.bf16.msra.mxu0 %v6997_v60  ;;  %3852 = vmatpush1.bf16.msra.mxu1 %v6998_v3  ;;  %v7007_v60 = vld [vmem:[#allocation14_spill] sm:$0xff] }
 0x1bb   :  { %3790 = vmatprep.subr.bf16.mxu0 %v5867_v52  ;;  %3854 = vmatprep.subr.bf16.mxu1 %v6999_v23  ;;  %v599_v23 = vld [vmem:[%s6759_s5] sm:$0xf]  ;;  %v7008_v52 = vld [vmem:[#allocation69_spill] sm:$0xff]  ;;  %s5442_s5 = smov [#allocation9]  }
 0x1bc   :  { %v7013_v26 = vsub.s32 3, %v7008_v52  ;;  %s3372_s26 = sshll.u32 %s5442_s5, 4  ;;  %s3373_s26 = int_to_ptr.vmem [resolvable:$true] %s3372_s26 }
 0x1bd   :  { %s5407_s27 = scalar_lea.vmem %s3373_s26, 128  ;;  %p5412_p11 = scmp.lt.s32.totalorder %s3373_s26, %s3373_s26 }
 0x1be   :  { %3792 = vmatpush1.bf16.msra.mxu0 %v7000_v63  ;;  %3856 = vmatpush1.bf16.msra.mxu1 %v7001_v31  ;;  %v7009_v63 = vsub.s32 0, %v7008_v52  ;;  %v6039_v56 = vrot.slane %v599_v23, %v7013_v26  ;;  %p5408_p10 = scmp.ne.s32.totalorder %s3373_s26, %s5407_s27  ;;  %p5413_p12 = scmp.lt.s32.totalorder %s5407_s27, %s5407_s27 }
 0x1bf   :  { %3794 = vmatprep.subr.bf16.mxu0 %v7002_v0  ;;  %3858 = vmatprep.subr.bf16.mxu1 %v7003_v16  ;;  %v7011_v0 = vsub.s32 1, %v7008_v52 }
 0x1c0   :  { %v6029_v3 = vrot.slane %v599_v23, %v7009_v63  ;;  %7014 = vst [vmem:[#allocation74_spill] sm:$0xff] %v6039_v56  ;;  %p5414_p13 = por %p5413_p12, %p5412_p11 }
 0x1c1   :  { %v6033_v31 = vrot.slane %v599_v23, %v7011_v0  ;;  %v7015_v0 = vsub.s32 2, %v7008_v52 }
 0x1c2   :  { %3796 = vmatpush1.bf16.msra.mxu0 %v7004_v27  ;;  %3860 = vmatpush1.bf16.msra.mxu1 %v7005_v62  ;;  %7010 = vst [vmem:[#allocation69_spill] sm:$0xff] %v6029_v3  ;;  %p5415_p0 = pnand %p5414_p13, %p5408_p10 }
 0x1c3   :  { %3862 = vmatprep.subr.bf16.mxu0 %v7006_v30  ;;  %3894 = vmatprep.subr.bf16.mxu1 %v7007_v60  ;;  %7012 = vst [vmem:[#allocation73_spill] sm:$0xff] %v6033_v31  ;;  %v6044_v4 = vrot.slane %v599_v23, %v7015_v0 }
 0x1c5   :  { %7016 = vst [vmem:[#allocation75_spill] sm:$0xff] %v6044_v4 }
 0x238   :  { %v864_v16 = vpop.f32.mrb[16].mxu0  ;;  %v935_v27 = vpop.f32.mrb[16].mxu1 }
 0x239   :  { %v865_v62 = vadd.f32 %v864_v16, %v6029_v3  ;;  %v866_v22 = vpop.f32.mrb[17].mxu0  ;;  %v937_v30 = vpop.f32.mrb[17].mxu1  ;;  %v936_v16 = vadd.f32 %v935_v27, %v6044_v4  ;;  %v7017_v27 = vld [vmem:[#allocation70_spill] sm:$0xff] }
 0x23a   :  { %v867_v60 = vadd.f32 %v866_v22, %v6033_v31  ;;  %v938_v63 = vadd.f32 %v937_v30, %v6039_v56 }
 0x23b   :  { %v3412_v13 = vmul.f32 -1.442695, %v865_v62 }
 0x23c   :  { %v3413_v44 = vmul.f32 -1.442695, %v867_v60  ;;  %v3414_v53 = vmul.f32 -1.442695, %v938_v63 }
 0x23d   :  { %5101 = vpow2.f32 %v3412_v13 }
 0x23e   :  { %5103 = vpow2.f32 %v3413_v44 }
 0x23f   :  { %5105 = vpow2.f32 %v3414_v53 }
 0x240   :  { %5107 = vtanh.f32 %v936_v16 }
 0x247   :  { %v5102_v3 = vpop.eup %5101 }
 0x248   :  { %v5104_v38 = vpop.eup %5103  ;;  %v943_v22 = vadd.f32 1.0, %v5102_v3 }
 0x249   :  { %v949_v62 = vadd.f32 1.0, %v5104_v38  ;;  %v5106_v26 = vpop.eup %5105  ;;  %v7018_v38 = vld [vmem:[#allocation71_spill] sm:$0xff] }
 0x24a   :  { %5109 = vrcp.f32 %v943_v22  ;;  %v5108_v13 = vpop.eup %5107  ;;  %v956_v56 = vadd.f32 1.0, %v5106_v26 }
 0x24b   :  { %5111 = vrcp.f32 %v949_v62 }
 0x24c   :  { %5113 = vrcp.f32 %v956_v56 }
 0x254   :  { %v5110_v44 = vpop.eup %5109 }
 0x255   :  { %v5112_v60 = vpop.eup %5111  ;;  %v960_v30 = vmul.f32 %v5110_v44, %v5108_v13  ;;  %v7019_v13 = vld [vmem:[#allocation72_spill] sm:$0xff] }
 0x256   :  { %v959_v52 = vmul.f32 0.0, %v5112_v60  ;;  %v5114_v44 = vpop.eup %5113 }
 0x258   :  { %v6047_v23 = vadd.f32 %v960_v30, %v959_v52  ;;  %v1037_v63 = vpop.f32.mrb[2].mxu0  ;;  %v1108_v0 = vpop.f32.mrb[2].mxu1 }
 0x259   :  { %v5015_v4 = vadd.f32 %v1037_v63, %v7017_v27  ;;  %v1039_v3 = vpop.f32.mrb[3].mxu0  ;;  %v1110_v53 = vpop.f32.mrb[3].mxu1  ;;  %v5031_v52 = vadd.f32 %v1108_v0, %v5920_v42 }
 0x25a   :  { %5115 = vtanh.f32 %v6047_v23  ;;  %v5016_v16 = vadd.f32 %v1039_v3, %v7018_v38  ;;  %v5032_v26 = vadd.f32 %v1110_v53, %v7019_v13 }
 0x25b   :  { %v3415_v22 = vmul.f32 -1.442695, %v5015_v4 }
 0x25c   :  { %v3416_v62 = vmul.f32 -1.442695, %v5016_v16  ;;  %v3417_v30 = vmul.f32 -1.442695, %v5032_v26 }
 0x25d   :  { %5117 = vpow2.f32 %v3415_v22 }
 0x25e   :  { %5119 = vpow2.f32 %v3416_v62 }
 0x25f   :  { %5121 = vpow2.f32 %v3417_v30  ;;  %v7023_v30 = vld [vmem:[#allocation20_spill] sm:$0xff] }
 0x260   :  { %5123 = vtanh.f32 %v5031_v52  ;;  %v7024_v52 = vld [vmem:[#allocation21_spill] sm:$0xff] }
 0x264   :  { %v5116_v60 = vpop.eup %5115 }
 0x265   :  { %v963_v56 = vmul.f32 %v5116_v60, %v5114_v44 }
 0x267   :  { %v5118_v31 = vpop.eup %5117  ;;  %1205 = vmatprep.mubr.f32.mxu0 %v963_v56  ;;  %1276 = vmatprep.mubr.f32.mxu1 %v963_v56  ;;  %v7025_v56 = vld [vmem:[#allocation22_spill] sm:$0xff] }
 0x268   :  { %v5120_v63 = vpop.eup %5119  ;;  %v1120_v27 = vadd.f32 1.0, %v5118_v31 }
 0x269   :  { %v1126_v3 = vadd.f32 1.0, %v5120_v63  ;;  %v5122_v4 = vpop.eup %5121  ;;  %v7026_v63 = vld [vmem:[#allocation23_spill] sm:$0xff] }
 0x26a   :  { %5125 = vrcp.f32 %v1120_v27  ;;  %v5124_v16 = vpop.eup %5123  ;;  %v1133_v13 = vadd.f32 1.0, %v5122_v4  ;;  %v7021_v27 = vld [vmem:[#allocation18_spill] sm:$0xff]  ;;  %v7028_v4 = vld [vmem:[#allocation25_spill] sm:$0xff] }
 0x26b   :  { %5127 = vrcp.f32 %v1126_v3  ;;  %v7027_v3 = vld [vmem:[#allocation24_spill] sm:$0xff] }
 0x26c   :  { %5129 = vrcp.f32 %v1133_v13  ;;  %v7022_v13 = vld [vmem:[#allocation19_spill] sm:$0xff] }
 0x274   :  { %v5126_v22 = vpop.eup %5125 }
 0x275   :  { %v5128_v53 = vpop.eup %5127  ;;  %v1137_v62 = vmul.f32 %v5126_v22, %v5124_v16  ;;  %v7029_v16 = vld [vmem:[#allocation26_spill] sm:$0xff]  ;;  %v7030_v22 = vld [vmem:[#allocation27_spill] sm:$0xff] }
 0x276   :  { %v1136_v26 = vmul.f32 %v5128_v53, %v5923_v29  ;;  %v5130_v44 = vpop.eup %5129  ;;  %v7020_v29 = vld [vmem:[#allocation17_spill] sm:$0xff]  ;;  %v7031_v53 = vld [vmem:[#allocation28_spill] sm:$0xff] }
 0x278   :  { %v6055_v0 = vadd.f32 %v1137_v62, %v1136_v26  ;;  %v7032_v62 = vld [vmem:[#allocation29_spill] sm:$0xff]  ;;  %v7033_v26 = vld [vmem:[#allocation30_spill] sm:$0xff] }
 0x27a   :  { %5131 = vtanh.f32 %v6055_v0 }
 0x284   :  { %v5132_v31 = vpop.eup %5131 }
 0x285   :  { %v1140_v60 = vmul.f32 %v5132_v31, %v5130_v44  ;;  %v7034_v44 = vld [vmem:[#allocation31_spill] sm:$0xff]  ;;  %v7035_v31 = vld [vmem:[#allocation32_spill] sm:$0xff] }
 0x287   :  { %1206 = vmatmul.mubr.f32.vlgmr.msra.gmra.mrb[18].mxu0 %v1140_v60  ;;  %1277 = vmatmul.mubr.f32.vlgmr.msra.gmra.mrb[18].mxu1 %v1140_v60 }
 0x288   :  { %3864 = vmatpush1.bf16.msra.mxu0 %v5549_v36  ;;  %3896 = vmatpush1.bf16.msra.mxu1 %v5554_v39 }
 0x289   :  { %3866 = vmatprep.subr.bf16.mxu0 %v5557_v43  ;;  %3898 = vmatprep.subr.bf16.mxu1 %v5563_v48 }
 0x28a   :  { %1378 = vmatprep.mubr.f32.mxu0 %v6957_v17  ;;  %1449 = vmatprep.mubr.f32.mxu1 %v6957_v17 }
 0x28c   :  { %3868 = vmatpush1.bf16.msra.mxu0 %v5567_v51  ;;  %3900 = vmatpush1.bf16.msra.mxu1 %v5571_v55 }
 0x28d   :  { %3870 = vmatprep.subr.bf16.mxu0 %v5575_v58  ;;  %3902 = vmatprep.subr.bf16.mxu1 %v5579_v61 }
 0x290   :  { %3872 = vmatpush1.bf16.msra.mxu0 %v5586_v2  ;;  %3904 = vmatpush1.bf16.msra.mxu1 %v5590_v5 }
 0x291   :  { %3874 = vmatprep.subr.bf16.mxu0 %v5594_v8  ;;  %3906 = vmatprep.subr.bf16.mxu1 %v5598_v11 }
 0x294   :  { %3876 = vmatpush1.bf16.msra.mxu0 %v5605_v15  ;;  %3908 = vmatpush1.bf16.msra.mxu1 %v5609_v18 }
 0x295   :  { %3878 = vmatprep.subr.bf16.mxu0 %v5613_v21  ;;  %3910 = vmatprep.subr.bf16.mxu1 %v5617_v24 }
 0x298   :  { %3880 = vmatpush1.bf16.msra.mxu0 %v5624_v28  ;;  %3912 = vmatpush1.bf16.msra.mxu1 %v5628_v33 }
 0x299   :  { %3882 = vmatprep.subr.bf16.mxu0 %v5632_v37  ;;  %3914 = vmatprep.subr.bf16.mxu1 %v5636_v41 }
 0x29c   :  { %3884 = vmatpush1.bf16.msra.mxu0 %v5643_v46  ;;  %3916 = vmatpush1.bf16.msra.mxu1 %v5647_v50 }
 0x29d   :  { %3886 = vmatprep.subr.bf16.mxu0 %v5651_v54  ;;  %3918 = vmatprep.subr.bf16.mxu1 %v5655_v59 }
 0x2a0   :  { %3888 = vmatpush1.bf16.msra.mxu0 %v5662_v1  ;;  %3920 = vmatpush1.bf16.msra.mxu1 %v5666_v6 }
 0x2a1   :  { %3890 = vmatprep.subr.bf16.mxu0 %v5670_v10  ;;  %3922 = vmatprep.subr.bf16.mxu1 %v5674_v14 }
 0x2a4   :  { %3892 = vmatpush1.bf16.msra.mxu0 %v5681_v20  ;;  %3924 = vmatpush1.bf16.msra.mxu1 %v5685_v25 }
 0x2a5   :  { %3926 = vmatprep.subr.bf16.mxu0 %v5689_v32  ;;  %3990 = vmatprep.subr.bf16.mxu1 %v5693_v40 }
 0x2a7   :  { %1379 = vmatmul.mubr.f32.vlgmr.msra.gmra.mrb[4].mxu0 %v1140_v60  ;;  %1450 = vmatmul.mubr.f32.vlgmr.msra.gmra.mrb[4].mxu1 %v1140_v60  ;;  %v7036_v60 = vld [vmem:[#allocation33_spill] sm:$0xff] }
 0x2a8   :  { %3928 = vmatpush1.bf16.msra.mxu0 %v5697_v45  ;;  %3992 = vmatpush1.bf16.msra.mxu1 %v5701_v47 }
 0x2a9   :  { %3930 = vmatprep.subr.bf16.mxu0 %v5703_v49  ;;  %3994 = vmatprep.subr.bf16.mxu1 %v5707_v57 }
 0x2ac   :  { %3932 = vmatpush1.bf16.msra.mxu0 %v5713_v7  ;;  %3996 = vmatpush1.bf16.msra.mxu1 %v5717_v9 }
 0x2ad   :  { %3934 = vmatprep.subr.bf16.mxu0 %v5719_v12  ;;  %3998 = vmatprep.subr.bf16.mxu1 %v5722_v19 }
 0x2b0   :  { %3936 = vmatpush1.bf16.msra.mxu0 %v5727_v34  ;;  %4000 = vmatpush1.bf16.msra.mxu1 %v5731_v35 }
 0x2b1   :  { %3938 = vmatprep.subr.bf16.mxu0 %v7020_v29  ;;  %4002 = vmatprep.subr.bf16.mxu1 %v7021_v27 }
 0x2b4   :  { %3940 = vmatpush1.bf16.msra.mxu0 %v7022_v13  ;;  %4004 = vmatpush1.bf16.msra.mxu1 %v7023_v30  ;;  %v7075_v30 = vld [vmem:[#allocation73_spill] sm:$0xff] }
 0x2b5   :  { %3942 = vmatprep.subr.bf16.mxu0 %v7024_v52  ;;  %4006 = vmatprep.subr.bf16.mxu1 %v7025_v56  ;;  %v7074_v56 = vld [vmem:[#allocation69_spill] sm:$0xff] }
 0x2b8   :  { %3944 = vmatpush1.bf16.msra.mxu0 %v7026_v63  ;;  %4008 = vmatpush1.bf16.msra.mxu1 %v7027_v3  ;;  %v7037_v63 = vld [vmem:[#allocation34_spill] sm:$0xff]  ;;  %v7038_v3 = vld [vmem:[#allocation35_spill] sm:$0xff] }
 0x2b9   :  { %3946 = vmatprep.subr.bf16.mxu0 %v7028_v4  ;;  %4010 = vmatprep.subr.bf16.mxu1 %v7029_v16  ;;  %v7039_v4 = vld [vmem:[#allocation36_spill] sm:$0xff]  ;;  %v7040_v16 = vld [vmem:[#allocation37_spill] sm:$0xff] }
 0x2bc   :  { %3948 = vmatpush1.bf16.msra.mxu0 %v7030_v22  ;;  %4012 = vmatpush1.bf16.msra.mxu1 %v7031_v53  ;;  %v7041_v22 = vld [vmem:[#allocation38_spill] sm:$0xff]  ;;  %v7042_v53 = vld [vmem:[#allocation39_spill] sm:$0xff] }
 0x2bd   :  { %3950 = vmatprep.subr.bf16.mxu0 %v7032_v62  ;;  %4014 = vmatprep.subr.bf16.mxu1 %v7033_v26  ;;  %v7043_v62 = vld [vmem:[#allocation40_spill] sm:$0xff]  ;;  %v7044_v26 = vld [vmem:[#allocation41_spill] sm:$0xff] }
 0x2c0   :  { %3952 = vmatpush1.bf16.msra.mxu0 %v7034_v44  ;;  %4016 = vmatpush1.bf16.msra.mxu1 %v7035_v31  ;;  %v7045_v44 = vld [vmem:[#allocation42_spill] sm:$0xff]  ;;  %v7046_v31 = vld [vmem:[#allocation43_spill] sm:$0xff] }
 0x2c1   :  { %3954 = vmatprep.subr.bf16.mxu0 %v7036_v60  ;;  %4018 = vmatprep.subr.bf16.mxu1 %v7037_v63  ;;  %v7047_v60 = vld [vmem:[#allocation44_spill] sm:$0xff]  ;;  %v7048_v63 = vld [vmem:[#allocation45_spill] sm:$0xff] }
 0x2c4   :  { %3956 = vmatpush1.bf16.msra.mxu0 %v7038_v3  ;;  %4020 = vmatpush1.bf16.msra.mxu1 %v7039_v4  ;;  %v7049_v3 = vld [vmem:[#allocation46_spill] sm:$0xff]  ;;  %v7050_v4 = vld [vmem:[#allocation47_spill] sm:$0xff] }
 0x2c5   :  { %3958 = vmatprep.subr.bf16.mxu0 %v7040_v16  ;;  %4022 = vmatprep.subr.bf16.mxu1 %v7041_v22  ;;  %v7051_v16 = vld [vmem:[#allocation48_spill] sm:$0xff]  ;;  %v7052_v22 = vld [vmem:[#allocation49_spill] sm:$0xff] }
 0x2c8   :  { %3960 = vmatpush1.bf16.msra.mxu0 %v7042_v53  ;;  %4024 = vmatpush1.bf16.msra.mxu1 %v7043_v62  ;;  %v7053_v53 = vld [vmem:[#allocation50_spill] sm:$0xff]  ;;  %v7054_v62 = vld [vmem:[#allocation51_spill] sm:$0xff] }
 0x2c9   :  { %3962 = vmatprep.subr.bf16.mxu0 %v7044_v26  ;;  %4026 = vmatprep.subr.bf16.mxu1 %v7045_v44  ;;  %v7055_v26 = vld [vmem:[#allocation52_spill] sm:$0xff]  ;;  %v7056_v44 = vld [vmem:[#allocation53_spill] sm:$0xff] }
 0x2cc   :  { %3964 = vmatpush1.bf16.msra.mxu0 %v7046_v31  ;;  %4028 = vmatpush1.bf16.msra.mxu1 %v7047_v60  ;;  %v7057_v31 = vld [vmem:[#allocation54_spill] sm:$0xff]  ;;  %v7058_v60 = vld [vmem:[#allocation55_spill] sm:$0xff] }
 0x2cd   :  { %3966 = vmatprep.subr.bf16.mxu0 %v7048_v63  ;;  %4030 = vmatprep.subr.bf16.mxu1 %v7049_v3  ;;  %v7059_v63 = vld [vmem:[#allocation56_spill] sm:$0xff]  ;;  %v7060_v3 = vld [vmem:[#allocation57_spill] sm:$0xff] }
 0x2d0   :  { %3968 = vmatpush1.bf16.msra.mxu0 %v7050_v4  ;;  %4032 = vmatpush1.bf16.msra.mxu1 %v7051_v16  ;;  %v7061_v4 = vld [vmem:[#allocation58_spill] sm:$0xff]  ;;  %v7062_v16 = vld [vmem:[#allocation59_spill] sm:$0xff] }
 0x2d1   :  { %3970 = vmatprep.subr.bf16.mxu0 %v7052_v22  ;;  %4034 = vmatprep.subr.bf16.mxu1 %v7053_v53  ;;  %v7063_v22 = vld [vmem:[#allocation60_spill] sm:$0xff]  ;;  %v7064_v53 = vld [vmem:[#allocation61_spill] sm:$0xff] }
 0x2d4   :  { %3972 = vmatpush1.bf16.msra.mxu0 %v7054_v62  ;;  %4036 = vmatpush1.bf16.msra.mxu1 %v7055_v26  ;;  %v7065_v62 = vld [vmem:[#allocation62_spill] sm:$0xff]  ;;  %v7066_v26 = vld [vmem:[#allocation63_spill] sm:$0xff] }
 0x2d5   :  { %3974 = vmatprep.subr.bf16.mxu0 %v7056_v44  ;;  %4038 = vmatprep.subr.bf16.mxu1 %v7057_v31  ;;  %v7067_v44 = vld [vmem:[#allocation64_spill] sm:$0xff]  ;;  %v7068_v31 = vld [vmem:[#allocation65_spill] sm:$0xff] }
 0x2d8   :  { %3976 = vmatpush1.bf16.msra.mxu0 %v7058_v60  ;;  %4040 = vmatpush1.bf16.msra.mxu1 %v7059_v63  ;;  %v7069_v60 = vld [vmem:[#allocation66_spill] sm:$0xff]  ;;  %v7070_v63 = vld [vmem:[#allocation67_spill] sm:$0xff] }
 0x2d9   :  { %3978 = vmatprep.subr.bf16.mxu0 %v7060_v3  ;;  %4042 = vmatprep.subr.bf16.mxu1 %v7061_v4  ;;  %v7071_v3 = vld [vmem:[#allocation68_spill] sm:$0xff]  ;;  %v7072_v4 = vld [vmem:[#allocation13_spill] sm:$0xff] }
 0x2dc   :  { %3980 = vmatpush1.bf16.msra.mxu0 %v7062_v16  ;;  %4044 = vmatpush1.bf16.msra.mxu1 %v7063_v22  ;;  %v7073_v16 = vld [vmem:[#allocation14_spill] sm:$0xff] }
 0x2dd   :  { %3982 = vmatprep.subr.bf16.mxu0 %v7064_v53  ;;  %4046 = vmatprep.subr.bf16.mxu1 %v7065_v62 }
 0x2e0   :  { %3984 = vmatpush1.bf16.msra.mxu0 %v7066_v26  ;;  %4048 = vmatpush1.bf16.msra.mxu1 %v7067_v44 }
 0x2e1   :  { %3986 = vmatprep.subr.bf16.mxu0 %v7068_v31  ;;  %4050 = vmatprep.subr.bf16.mxu1 %v7069_v60  ;;  %v7076_v60 = vld [vmem:[#allocation74_spill] sm:$0xff] }
 0x2e4   :  { %3988 = vmatpush1.bf16.msra.mxu0 %v7070_v63  ;;  %4052 = vmatpush1.bf16.msra.mxu1 %v7071_v3  ;;  %v7077_v3 = vld [vmem:[#allocation75_spill] sm:$0xff] }
 0x2e5   :  { %4054 = vmatprep.subr.bf16.mxu0 %v7072_v4  ;;  %4086 = vmatprep.subr.bf16.mxu1 %v7073_v16 }
 0x35a   :  { %v1207_v22 = vpop.f32.mrb[18].mxu0  ;;  %v1278_v53 = vpop.f32.mrb[18].mxu1 }
 0x35b   :  { %v1208_v62 = vadd.f32 %v1207_v22, %v7074_v56  ;;  %v1209_v52 = vpop.f32.mrb[19].mxu0  ;;  %v1280_v26 = vpop.f32.mrb[19].mxu1  ;;  %v1279_v29 = vadd.f32 %v1278_v53, %v7077_v3  ;;  %v7078_v53 = vld [vmem:[#allocation70_spill] sm:$0xff] }
 0x35c   :  { %v1210_v44 = vadd.f32 %v1209_v52, %v7075_v30  ;;  %v1281_v63 = vadd.f32 %v1280_v26, %v7076_v60 }
 0x35d   :  { %v3418_v13 = vmul.f32 -1.442695, %v1208_v62 }
 0x35e   :  { %v3419_v31 = vmul.f32 -1.442695, %v1210_v44  ;;  %v3420_v27 = vmul.f32 -1.442695, %v1281_v63 }
 0x35f   :  { %5133 = vpow2.f32 %v3418_v13 }
 0x360   :  { %5135 = vpow2.f32 %v3419_v31 }
 0x361   :  { %5137 = vpow2.f32 %v3420_v27 }
 0x362   :  { %5139 = vtanh.f32 %v1279_v29 }
 0x369   :  { %v5134_v4 = vpop.eup %5133 }
 0x36a   :  { %v5136_v35 = vpop.eup %5135  ;;  %v1286_v16 = vadd.f32 1.0, %v5134_v4 }
 0x36b   :  { %v1292_v34 = vadd.f32 1.0, %v5136_v35  ;;  %v5138_v22 = vpop.eup %5137 }
 0x36c   :  { %5141 = vrcp.f32 %v1286_v16  ;;  %v5140_v56 = vpop.eup %5139  ;;  %v1299_v13 = vadd.f32 1.0, %v5138_v22 }
 0x36d   :  { %5143 = vrcp.f32 %v1292_v34 }
 0x36e   :  { %5145 = vrcp.f32 %v1299_v13 }
 0x376   :  { %v5142_v52 = vpop.eup %5141 }
 0x377   :  { %v5144_v62 = vpop.eup %5143  ;;  %v1303_v44 = vmul.f32 %v5142_v52, %v5140_v56  ;;  %v7079_v56 = vld [vmem:[#allocation72_spill] sm:$0xff] }
 0x378   :  { %v1302_v31 = vmul.f32 %v5144_v62, %v6047_v23  ;;  %v5146_v23 = vpop.eup %5145 }
 0x37a   :  { %v1380_v26 = vpop.f32.mrb[4].mxu0  ;;  %v1451_v63 = vpop.f32.mrb[4].mxu1  ;;  %v6161_v60 = vadd.f32 %v1303_v44, %v1302_v31 }
 0x37b   :  { %v5017_v4 = vadd.f32 %v1380_v26, %v7078_v53  ;;  %v1382_v27 = vpop.f32.mrb[5].mxu0  ;;  %v1453_v29 = vpop.f32.mrb[5].mxu1  ;;  %v5033_v44 = vadd.f32 %v1451_v63, %v5920_v42 }
 0x37c   :  { %v5018_v35 = vadd.f32 %v1382_v27, %v7018_v38  ;;  %5147 = vtanh.f32 %v6161_v60  ;;  %v5034_v22 = vadd.f32 %v1453_v29, %v7079_v56 }
 0x37d   :  { %v3421_v34 = vmul.f32 -1.442695, %v5017_v4 }
 0x37e   :  { %v3422_v16 = vmul.f32 -1.442695, %v5018_v35  ;;  %v3423_v62 = vmul.f32 -1.442695, %v5034_v22 }
 0x37f   :  { %5149 = vpow2.f32 %v3421_v34 }
 0x380   :  { %5151 = vpow2.f32 %v3422_v16 }
 0x381   :  { %5153 = vpow2.f32 %v3423_v62 }
 0x382   :  { %5155 = vtanh.f32 %v5033_v44  ;;  %v7083_v44 = vld [vmem:[#allocation18_spill] sm:$0xff] }
 0x386   :  { %v5148_v52 = vpop.eup %5147 }
 0x387   :  { %v1306_v13 = vmul.f32 %v5148_v52, %v5146_v23 }
 0x389   :  { %v5150_v31 = vpop.eup %5149  ;;  %1548 = vmatprep.mubr.f32.mxu0 %v1306_v13  ;;  %1619 = vmatprep.mubr.f32.mxu1 %v1306_v13  ;;  %v7084_v13 = vld [vmem:[#allocation19_spill] sm:$0xff] }
 0x38a   :  { %v5152_v26 = vpop.eup %5151  ;;  %v1463_v53 = vadd.f32 1.0, %v5150_v31  ;;  %v7085_v31 = vld [vmem:[#allocation20_spill] sm:$0xff] }
 0x38b   :  { %v1469_v27 = vadd.f32 1.0, %v5152_v26  ;;  %v5154_v4 = vpop.eup %5153  ;;  %v7086_v26 = vld [vmem:[#allocation21_spill] sm:$0xff] }
 0x38c   :  { %5157 = vrcp.f32 %v1463_v53  ;;  %v5156_v35 = vpop.eup %5155  ;;  %v1476_v56 = vadd.f32 1.0, %v5154_v4  ;;  %v7081_v53 = vld [vmem:[#allocation16_spill] sm:$0xff]  ;;  %v7088_v4 = vld [vmem:[#allocation23_spill] sm:$0xff] }
 0x38d   :  { %5159 = vrcp.f32 %v1469_v27  ;;  %v7087_v27 = vld [vmem:[#allocation22_spill] sm:$0xff] }
 0x38e   :  { %5161 = vrcp.f32 %v1476_v56  ;;  %v7082_v56 = vld [vmem:[#allocation17_spill] sm:$0xff] }
 0x396   :  { %v5158_v34 = vpop.eup %5157 }
 0x397   :  { %v5160_v29 = vpop.eup %5159  ;;  %v1480_v16 = vmul.f32 %v5158_v34, %v5156_v35  ;;  %v7089_v35 = vld [vmem:[#allocation24_spill] sm:$0xff]  ;;  %v7090_v34 = vld [vmem:[#allocation25_spill] sm:$0xff] }
 0x398   :  { %v1479_v22 = vmul.f32 %v5160_v29, %v6055_v0  ;;  %v5162_v23 = vpop.eup %5161  ;;  %v7080_v0 = vld [vmem:[#allocation15_spill] sm:$0xff]  ;;  %v7091_v29 = vld [vmem:[#allocation26_spill] sm:$0xff] }
 0x39a   :  { %v6169_v63 = vadd.f32 %v1480_v16, %v1479_v22  ;;  %v7092_v16 = vld [vmem:[#allocation27_spill] sm:$0xff]  ;;  %v7093_v22 = vld [vmem:[#allocation28_spill] sm:$0xff] }
 0x39c   :  { %5163 = vtanh.f32 %v6169_v63 }
 0x3a6   :  { %v5164_v52 = vpop.eup %5163 }
 0x3a7   :  { %v1483_v62 = vmul.f32 %v5164_v52, %v5162_v23  ;;  %v7094_v23 = vld [vmem:[#allocation29_spill] sm:$0xff]  ;;  %v7095_v52 = vld [vmem:[#allocation30_spill] sm:$0xff] }
 0x3a9   :  { %1549 = vmatmul.mubr.f32.vlgmr.msra.gmra.mrb[20].mxu0 %v1483_v62  ;;  %1620 = vmatmul.mubr.f32.vlgmr.msra.gmra.mrb[20].mxu1 %v1483_v62 }
 0x3aa   :  { %4056 = vmatpush1.bf16.msra.mxu0 %v5549_v36  ;;  %4088 = vmatpush1.bf16.msra.mxu1 %v5554_v39 }
 0x3ab   :  { %4058 = vmatprep.subr.bf16.mxu0 %v5557_v43  ;;  %4090 = vmatprep.subr.bf16.mxu1 %v5563_v48 }
 0x3ac   :  { %1721 = vmatprep.mubr.f32.mxu0 %v6957_v17  ;;  %1792 = vmatprep.mubr.f32.mxu1 %v6957_v17 }
 0x3ae   :  { %4060 = vmatpush1.bf16.msra.mxu0 %v5567_v51  ;;  %4092 = vmatpush1.bf16.msra.mxu1 %v5571_v55 }
 0x3af   :  { %4062 = vmatprep.subr.bf16.mxu0 %v5575_v58  ;;  %4094 = vmatprep.subr.bf16.mxu1 %v5579_v61 }
 0x3b2   :  { %4064 = vmatpush1.bf16.msra.mxu0 %v5586_v2  ;;  %4096 = vmatpush1.bf16.msra.mxu1 %v5590_v5 }
 0x3b3   :  { %4066 = vmatprep.subr.bf16.mxu0 %v5594_v8  ;;  %4098 = vmatprep.subr.bf16.mxu1 %v5598_v11 }
 0x3b6   :  { %4068 = vmatpush1.bf16.msra.mxu0 %v5605_v15  ;;  %4100 = vmatpush1.bf16.msra.mxu1 %v5609_v18 }
 0x3b7   :  { %4070 = vmatprep.subr.bf16.mxu0 %v5613_v21  ;;  %4102 = vmatprep.subr.bf16.mxu1 %v5617_v24 }
 0x3ba   :  { %4072 = vmatpush1.bf16.msra.mxu0 %v5624_v28  ;;  %4104 = vmatpush1.bf16.msra.mxu1 %v5628_v33 }
 0x3bb   :  { %4074 = vmatprep.subr.bf16.mxu0 %v5632_v37  ;;  %4106 = vmatprep.subr.bf16.mxu1 %v5636_v41 }
 0x3be   :  { %4076 = vmatpush1.bf16.msra.mxu0 %v5643_v46  ;;  %4108 = vmatpush1.bf16.msra.mxu1 %v5647_v50 }
 0x3bf   :  { %4078 = vmatprep.subr.bf16.mxu0 %v5651_v54  ;;  %4110 = vmatprep.subr.bf16.mxu1 %v5655_v59 }
 0x3c2   :  { %4080 = vmatpush1.bf16.msra.mxu0 %v5662_v1  ;;  %4112 = vmatpush1.bf16.msra.mxu1 %v5666_v6 }
 0x3c3   :  { %4082 = vmatprep.subr.bf16.mxu0 %v5670_v10  ;;  %4114 = vmatprep.subr.bf16.mxu1 %v5674_v14 }
 0x3c6   :  { %4084 = vmatpush1.bf16.msra.mxu0 %v5681_v20  ;;  %4116 = vmatpush1.bf16.msra.mxu1 %v5685_v25 }
 0x3c7   :  { %4118 = vmatprep.subr.bf16.mxu0 %v5689_v32  ;;  %4182 = vmatprep.subr.bf16.mxu1 %v5693_v40 }
 0x3c9   :  { %1722 = vmatmul.mubr.f32.vlgmr.msra.gmra.mrb[6].mxu0 %v1483_v62  ;;  %1793 = vmatmul.mubr.f32.vlgmr.msra.gmra.mrb[6].mxu1 %v1483_v62  ;;  %v7096_v62 = vld [vmem:[#allocation31_spill] sm:$0xff] }
 0x3ca   :  { %4120 = vmatpush1.bf16.msra.mxu0 %v5697_v45  ;;  %4184 = vmatpush1.bf16.msra.mxu1 %v5701_v47 }
 0x3cb   :  { %4122 = vmatprep.subr.bf16.mxu0 %v5703_v49  ;;  %4186 = vmatprep.subr.bf16.mxu1 %v5707_v57 }
 0x3ce   :  { %4124 = vmatpush1.bf16.msra.mxu0 %v5713_v7  ;;  %4188 = vmatpush1.bf16.msra.mxu1 %v5717_v9 }
 0x3cf   :  { %4126 = vmatprep.subr.bf16.mxu0 %v5719_v12  ;;  %4190 = vmatprep.subr.bf16.mxu1 %v5722_v19 }
 0x3d2   :  { %4128 = vmatpush1.bf16.msra.mxu0 %v7080_v0  ;;  %4192 = vmatpush1.bf16.msra.mxu1 %v7081_v53 }
 0x3d3   :  { %4130 = vmatprep.subr.bf16.mxu0 %v7082_v56  ;;  %4194 = vmatprep.subr.bf16.mxu1 %v7083_v44 }
 0x3d6   :  { %4132 = vmatpush1.bf16.msra.mxu0 %v7084_v13  ;;  %4196 = vmatpush1.bf16.msra.mxu1 %v7085_v31  ;;  %v7136_v31 = vld [vmem:[#allocation69_spill] sm:$0xff] }
 0x3d7   :  { %4134 = vmatprep.subr.bf16.mxu0 %v7086_v26  ;;  %4198 = vmatprep.subr.bf16.mxu1 %v7087_v27  ;;  %v7097_v26 = vld [vmem:[#allocation32_spill] sm:$0xff]  ;;  %v7098_v27 = vld [vmem:[#allocation33_spill] sm:$0xff] }
 0x3da   :  { %4136 = vmatpush1.bf16.msra.mxu0 %v7088_v4  ;;  %4200 = vmatpush1.bf16.msra.mxu1 %v7089_v35  ;;  %v7099_v4 = vld [vmem:[#allocation34_spill] sm:$0xff]  ;;  %v7100_v35 = vld [vmem:[#allocation35_spill] sm:$0xff] }
 0x3db   :  { %4138 = vmatprep.subr.bf16.mxu0 %v7090_v34  ;;  %4202 = vmatprep.subr.bf16.mxu1 %v7091_v29  ;;  %v7101_v34 = vld [vmem:[#allocation36_spill] sm:$0xff]  ;;  %v7102_v29 = vld [vmem:[#allocation37_spill] sm:$0xff] }
 0x3de   :  { %4140 = vmatpush1.bf16.msra.mxu0 %v7092_v16  ;;  %4204 = vmatpush1.bf16.msra.mxu1 %v7093_v22  ;;  %v7103_v16 = vld [vmem:[#allocation38_spill] sm:$0xff]  ;;  %v7104_v22 = vld [vmem:[#allocation39_spill] sm:$0xff] }
 0x3df   :  { %4142 = vmatprep.subr.bf16.mxu0 %v7094_v23  ;;  %4206 = vmatprep.subr.bf16.mxu1 %v7095_v52  ;;  %v7105_v23 = vld [vmem:[#allocation40_spill] sm:$0xff]  ;;  %v7106_v52 = vld [vmem:[#allocation41_spill] sm:$0xff] }
 0x3e2   :  { %4144 = vmatpush1.bf16.msra.mxu0 %v7096_v62  ;;  %4208 = vmatpush1.bf16.msra.mxu1 %v7097_v26  ;;  %v7107_v62 = vld [vmem:[#allocation42_spill] sm:$0xff]  ;;  %v7108_v26 = vld [vmem:[#allocation43_spill] sm:$0xff] }
 0x3e3   :  { %4146 = vmatprep.subr.bf16.mxu0 %v7098_v27  ;;  %4210 = vmatprep.subr.bf16.mxu1 %v7099_v4  ;;  %v7109_v27 = vld [vmem:[#allocation44_spill] sm:$0xff]  ;;  %v7110_v4 = vld [vmem:[#allocation45_spill] sm:$0xff] }
 0x3e6   :  { %4148 = vmatpush1.bf16.msra.mxu0 %v7100_v35  ;;  %4212 = vmatpush1.bf16.msra.mxu1 %v7101_v34  ;;  %v7111_v35 = vld [vmem:[#allocation46_spill] sm:$0xff]  ;;  %v7112_v34 = vld [vmem:[#allocation47_spill] sm:$0xff] }
 0x3e7   :  { %4150 = vmatprep.subr.bf16.mxu0 %v7102_v29  ;;  %4214 = vmatprep.subr.bf16.mxu1 %v7103_v16  ;;  %v7113_v29 = vld [vmem:[#allocation48_spill] sm:$0xff]  ;;  %v7114_v16 = vld [vmem:[#allocation49_spill] sm:$0xff] }
 0x3ea   :  { %4152 = vmatpush1.bf16.msra.mxu0 %v7104_v22  ;;  %4216 = vmatpush1.bf16.msra.mxu1 %v7105_v23  ;;  %v7115_v22 = vld [vmem:[#allocation50_spill] sm:$0xff]  ;;  %v7116_v23 = vld [vmem:[#allocation51_spill] sm:$0xff] }
 0x3eb   :  { %4154 = vmatprep.subr.bf16.mxu0 %v7106_v52  ;;  %4218 = vmatprep.subr.bf16.mxu1 %v7107_v62  ;;  %v7117_v52 = vld [vmem:[#allocation52_spill] sm:$0xff]  ;;  %v7118_v62 = vld [vmem:[#allocation53_spill] sm:$0xff] }
 0x3ee   :  { %4156 = vmatpush1.bf16.msra.mxu0 %v7108_v26  ;;  %4220 = vmatpush1.bf16.msra.mxu1 %v7109_v27  ;;  %v7119_v26 = vld [vmem:[#allocation54_spill] sm:$0xff]  ;;  %v7120_v27 = vld [vmem:[#allocation55_spill] sm:$0xff] }
 0x3ef   :  { %4158 = vmatprep.subr.bf16.mxu0 %v7110_v4  ;;  %4222 = vmatprep.subr.bf16.mxu1 %v7111_v35  ;;  %v7121_v4 = vld [vmem:[#allocation56_spill] sm:$0xff]  ;;  %v7122_v35 = vld [vmem:[#allocation57_spill] sm:$0xff] }
 0x3f2   :  { %4160 = vmatpush1.bf16.msra.mxu0 %v7112_v34  ;;  %4224 = vmatpush1.bf16.msra.mxu1 %v7113_v29  ;;  %v7123_v34 = vld [vmem:[#allocation58_spill] sm:$0xff]  ;;  %v7124_v29 = vld [vmem:[#allocation59_spill] sm:$0xff] }
 0x3f3   :  { %4162 = vmatprep.subr.bf16.mxu0 %v7114_v16  ;;  %4226 = vmatprep.subr.bf16.mxu1 %v7115_v22  ;;  %v7125_v16 = vld [vmem:[#allocation60_spill] sm:$0xff]  ;;  %v7126_v22 = vld [vmem:[#allocation61_spill] sm:$0xff] }
 0x3f6   :  { %4164 = vmatpush1.bf16.msra.mxu0 %v7116_v23  ;;  %4228 = vmatpush1.bf16.msra.mxu1 %v7117_v52  ;;  %v7127_v23 = vld [vmem:[#allocation62_spill] sm:$0xff]  ;;  %v7128_v52 = vld [vmem:[#allocation63_spill] sm:$0xff] }
 0x3f7   :  { %4166 = vmatprep.subr.bf16.mxu0 %v7118_v62  ;;  %4230 = vmatprep.subr.bf16.mxu1 %v7119_v26  ;;  %v7129_v62 = vld [vmem:[#allocation64_spill] sm:$0xff]  ;;  %v7130_v26 = vld [vmem:[#allocation65_spill] sm:$0xff] }
 0x3fa   :  { %4168 = vmatpush1.bf16.msra.mxu0 %v7120_v27  ;;  %4232 = vmatpush1.bf16.msra.mxu1 %v7121_v4  ;;  %v7131_v27 = vld [vmem:[#allocation66_spill] sm:$0xff]  ;;  %v7132_v4 = vld [vmem:[#allocation67_spill] sm:$0xff] }
 0x3fb   :  { %4170 = vmatprep.subr.bf16.mxu0 %v7122_v35  ;;  %4234 = vmatprep.subr.bf16.mxu1 %v7123_v34  ;;  %v7133_v35 = vld [vmem:[#allocation68_spill] sm:$0xff]  ;;  %v7134_v34 = vld [vmem:[#allocation13_spill] sm:$0xff] }
 0x3fe   :  { %4172 = vmatpush1.bf16.msra.mxu0 %v7124_v29  ;;  %4236 = vmatpush1.bf16.msra.mxu1 %v7125_v16  ;;  %v7135_v29 = vld [vmem:[#allocation14_spill] sm:$0xff] }
 0x3ff   :  { %4174 = vmatprep.subr.bf16.mxu0 %v7126_v22  ;;  %4238 = vmatprep.subr.bf16.mxu1 %v7127_v23 }
 0x402   :  { %4176 = vmatpush1.bf16.msra.mxu0 %v7128_v52  ;;  %4240 = vmatpush1.bf16.msra.mxu1 %v7129_v62 }
 0x403   :  { %4178 = vmatprep.subr.bf16.mxu0 %v7130_v26  ;;  %4242 = vmatprep.subr.bf16.mxu1 %v7131_v27  ;;  %v7137_v27 = vld [vmem:[#allocation74_spill] sm:$0xff] }
 0x406   :  { %4180 = vmatpush1.bf16.msra.mxu0 %v7132_v4  ;;  %4244 = vmatpush1.bf16.msra.mxu1 %v7133_v35 }
 0x407   :  { %4246 = vmatprep.subr.bf16.mxu0 %v7134_v34  ;;  %4278 = vmatprep.subr.bf16.mxu1 %v7135_v29 }
 0x47c   :  { %v1550_v16 = vpop.f32.mrb[20].mxu0  ;;  %v1621_v22 = vpop.f32.mrb[20].mxu1 }
 0x47d   :  { %v1551_v23 = vadd.f32 %v1550_v16, %v7136_v31  ;;  %v1552_v13 = vpop.f32.mrb[21].mxu0  ;;  %v1623_v52 = vpop.f32.mrb[21].mxu1  ;;  %v1622_v35 = vadd.f32 %v1621_v22, %v7077_v3  ;;  %v7138_v22 = vld [vmem:[#allocation70_spill] sm:$0xff] }
 0x47e   :  { %v1553_v62 = vadd.f32 %v1552_v13, %v7075_v30  ;;  %v1624_v4 = vadd.f32 %v1623_v52, %v7137_v27 }
 0x47f   :  { %v3424_v44 = vmul.f32 -1.442695, %v1551_v23 }
 0x480   :  { %v3425_v26 = vmul.f32 -1.442695, %v1553_v62  ;;  %v3426_v56 = vmul.f32 -1.442695, %v1624_v4 }
 0x481   :  { %5165 = vpow2.f32 %v3424_v44 }
 0x482   :  { %5167 = vpow2.f32 %v3425_v26 }
 0x483   :  { %5169 = vpow2.f32 %v3426_v56 }
 0x484   :  { %5171 = vtanh.f32 %v1622_v35 }
 0x48b   :  { %v5166_v34 = vpop.eup %5165 }
 0x48c   :  { %v5168_v53 = vpop.eup %5167  ;;  %v1629_v29 = vadd.f32 1.0, %v5166_v34 }
 0x48d   :  { %v1635_v0 = vadd.f32 1.0, %v5168_v53  ;;  %v5170_v16 = vpop.eup %5169 }
 0x48e   :  { %5173 = vrcp.f32 %v1629_v29  ;;  %v5172_v31 = vpop.eup %5171  ;;  %v1642_v44 = vadd.f32 1.0, %v5170_v16 }
 0x48f   :  { %5175 = vrcp.f32 %v1635_v0 }
 0x490   :  { %5177 = vrcp.f32 %v1642_v44 }
 0x498   :  { %v5174_v13 = vpop.eup %5173 }
 0x499   :  { %v5176_v23 = vpop.eup %5175  ;;  %v1646_v62 = vmul.f32 %v5174_v13, %v5172_v31  ;;  %v7139_v31 = vld [vmem:[#allocation72_spill] sm:$0xff] }
 0x49a   :  { %v1645_v26 = vmul.f32 %v5176_v23, %v6161_v60  ;;  %v5178_v60 = vpop.eup %5177 }
 0x49c   :  { %v1723_v52 = vpop.f32.mrb[6].mxu0  ;;  %v1794_v4 = vpop.f32.mrb[6].mxu1  ;;  %v6275_v27 = vadd.f32 %v1646_v62, %v1645_v26 }
 0x49d   :  { %v5019_v34 = vadd.f32 %v1723_v52, %v7138_v22  ;;  %v1725_v56 = vpop.f32.mrb[7].mxu0  ;;  %v1796_v35 = vpop.f32.mrb[7].mxu1  ;;  %v5035_v62 = vadd.f32 %v1794_v4, %v5920_v42 }
 0x49e   :  { %v5020_v53 = vadd.f32 %v1725_v56, %v7018_v38  ;;  %5179 = vtanh.f32 %v6275_v27  ;;  %v5036_v16 = vadd.f32 %v1796_v35, %v7139_v31 }
 0x49f   :  { %v3427_v0 = vmul.f32 -1.442695, %v5019_v34 }
 0x4a0   :  { %v3428_v29 = vmul.f32 -1.442695, %v5020_v53  ;;  %v3429_v23 = vmul.f32 -1.442695, %v5036_v16 }
 0x4a1   :  { %5181 = vpow2.f32 %v3427_v0 }
 0x4a2   :  { %5183 = vpow2.f32 %v3428_v29 }
 0x4a3   :  { %5185 = vpow2.f32 %v3429_v23 }
 0x4a4   :  { %5187 = vtanh.f32 %v5035_v62  ;;  %v7143_v62 = vld [vmem:[#allocation18_spill] sm:$0xff] }
 0x4a8   :  { %v5180_v13 = vpop.eup %5179 }
 0x4a9   :  { %v1649_v44 = vmul.f32 %v5180_v13, %v5178_v60 }
 0x4ab   :  { %v5182_v26 = vpop.eup %5181  ;;  %1891 = vmatprep.mubr.f32.mxu0 %v1649_v44  ;;  %1962 = vmatprep.mubr.f32.mxu1 %v1649_v44  ;;  %v7144_v44 = vld [vmem:[#allocation19_spill] sm:$0xff] }
 0x4ac   :  { %v5184_v52 = vpop.eup %5183  ;;  %v1806_v22 = vadd.f32 1.0, %v5182_v26  ;;  %v7145_v26 = vld [vmem:[#allocation20_spill] sm:$0xff] }
 0x4ad   :  { %v1812_v56 = vadd.f32 1.0, %v5184_v52  ;;  %v5186_v34 = vpop.eup %5185  ;;  %v7146_v52 = vld [vmem:[#allocation21_spill] sm:$0xff] }
 0x4ae   :  { %5189 = vrcp.f32 %v1806_v22  ;;  %v5188_v53 = vpop.eup %5187  ;;  %v1819_v31 = vadd.f32 1.0, %v5186_v34  ;;  %v7141_v22 = vld [vmem:[#allocation16_spill] sm:$0xff]  ;;  %v7148_v34 = vld [vmem:[#allocation23_spill] sm:$0xff] }
 0x4af   :  { %5191 = vrcp.f32 %v1812_v56  ;;  %v7147_v56 = vld [vmem:[#allocation22_spill] sm:$0xff] }
 0x4b0   :  { %5193 = vrcp.f32 %v1819_v31  ;;  %v7142_v31 = vld [vmem:[#allocation17_spill] sm:$0xff] }
 0x4b8   :  { %v5190_v0 = vpop.eup %5189 }
 0x4b9   :  { %v5192_v35 = vpop.eup %5191  ;;  %v1823_v29 = vmul.f32 %v5190_v0, %v5188_v53  ;;  %v7149_v53 = vld [vmem:[#allocation24_spill] sm:$0xff]  ;;  %v7150_v0 = vld [vmem:[#allocation25_spill] sm:$0xff] }
 0x4ba   :  { %v1822_v16 = vmul.f32 %v5192_v35, %v6169_v63  ;;  %v5194_v60 = vpop.eup %5193  ;;  %v7140_v63 = vld [vmem:[#allocation15_spill] sm:$0xff]  ;;  %v7151_v35 = vld [vmem:[#allocation26_spill] sm:$0xff] }
 0x4bc   :  { %v6283_v4 = vadd.f32 %v1823_v29, %v1822_v16  ;;  %v7152_v29 = vld [vmem:[#allocation27_spill] sm:$0xff]  ;;  %v7153_v16 = vld [vmem:[#allocation28_spill] sm:$0xff] }
 0x4be   :  { %5195 = vtanh.f32 %v6283_v4 }
 0x4c8   :  { %v5196_v13 = vpop.eup %5195 }
 0x4c9   :  { %v1826_v23 = vmul.f32 %v5196_v13, %v5194_v60  ;;  %v7154_v60 = vld [vmem:[#allocation29_spill] sm:$0xff]  ;;  %v7155_v13 = vld [vmem:[#allocation30_spill] sm:$0xff] }
 0x4cb   :  { %1892 = vmatmul.mubr.f32.vlgmr.msra.gmra.mrb[22].mxu0 %v1826_v23  ;;  %1963 = vmatmul.mubr.f32.vlgmr.msra.gmra.mrb[22].mxu1 %v1826_v23 }
 0x4cc   :  { %4248 = vmatpush1.bf16.msra.mxu0 %v5549_v36  ;;  %4280 = vmatpush1.bf16.msra.mxu1 %v5554_v39 }
 0x4cd   :  { %4250 = vmatprep.subr.bf16.mxu0 %v5557_v43  ;;  %4282 = vmatprep.subr.bf16.mxu1 %v5563_v48 }
 0x4ce   :  { %2064 = vmatprep.mubr.f32.mxu0 %v6957_v17  ;;  %2135 = vmatprep.mubr.f32.mxu1 %v6957_v17 }
 0x4d0   :  { %4252 = vmatpush1.bf16.msra.mxu0 %v5567_v51  ;;  %4284 = vmatpush1.bf16.msra.mxu1 %v5571_v55 }
 0x4d1   :  { %4254 = vmatprep.subr.bf16.mxu0 %v5575_v58  ;;  %4286 = vmatprep.subr.bf16.mxu1 %v5579_v61 }
 0x4d4   :  { %4256 = vmatpush1.bf16.msra.mxu0 %v5586_v2  ;;  %4288 = vmatpush1.bf16.msra.mxu1 %v5590_v5 }
 0x4d5   :  { %4258 = vmatprep.subr.bf16.mxu0 %v5594_v8  ;;  %4290 = vmatprep.subr.bf16.mxu1 %v5598_v11 }
 0x4d8   :  { %4260 = vmatpush1.bf16.msra.mxu0 %v5605_v15  ;;  %4292 = vmatpush1.bf16.msra.mxu1 %v5609_v18 }
 0x4d9   :  { %4262 = vmatprep.subr.bf16.mxu0 %v5613_v21  ;;  %4294 = vmatprep.subr.bf16.mxu1 %v5617_v24 }
 0x4dc   :  { %4264 = vmatpush1.bf16.msra.mxu0 %v5624_v28  ;;  %4296 = vmatpush1.bf16.msra.mxu1 %v5628_v33 }
 0x4dd   :  { %4266 = vmatprep.subr.bf16.mxu0 %v5632_v37  ;;  %4298 = vmatprep.subr.bf16.mxu1 %v5636_v41 }
 0x4e0   :  { %4268 = vmatpush1.bf16.msra.mxu0 %v5643_v46  ;;  %4300 = vmatpush1.bf16.msra.mxu1 %v5647_v50 }
 0x4e1   :  { %4270 = vmatprep.subr.bf16.mxu0 %v5651_v54  ;;  %4302 = vmatprep.subr.bf16.mxu1 %v5655_v59 }
 0x4e4   :  { %4272 = vmatpush1.bf16.msra.mxu0 %v5662_v1  ;;  %4304 = vmatpush1.bf16.msra.mxu1 %v5666_v6 }
 0x4e5   :  { %4274 = vmatprep.subr.bf16.mxu0 %v5670_v10  ;;  %4306 = vmatprep.subr.bf16.mxu1 %v5674_v14 }
 0x4e8   :  { %4276 = vmatpush1.bf16.msra.mxu0 %v5681_v20  ;;  %4308 = vmatpush1.bf16.msra.mxu1 %v5685_v25 }
 0x4e9   :  { %4310 = vmatprep.subr.bf16.mxu0 %v5689_v32  ;;  %4374 = vmatprep.subr.bf16.mxu1 %v5693_v40 }
 0x4eb   :  { %2065 = vmatmul.mubr.f32.vlgmr.msra.gmra.mrb[8].mxu0 %v1826_v23  ;;  %2136 = vmatmul.mubr.f32.vlgmr.msra.gmra.mrb[8].mxu1 %v1826_v23  ;;  %v7156_v23 = vld [vmem:[#allocation31_spill] sm:$0xff] }
 0x4ec   :  { %4312 = vmatpush1.bf16.msra.mxu0 %v5697_v45  ;;  %4376 = vmatpush1.bf16.msra.mxu1 %v5701_v47 }
 0x4ed   :  { %4314 = vmatprep.subr.bf16.mxu0 %v5703_v49  ;;  %4378 = vmatprep.subr.bf16.mxu1 %v5707_v57 }
 0x4f0   :  { %4316 = vmatpush1.bf16.msra.mxu0 %v5713_v7  ;;  %4380 = vmatpush1.bf16.msra.mxu1 %v5717_v9 }
 0x4f1   :  { %4318 = vmatprep.subr.bf16.mxu0 %v5719_v12  ;;  %4382 = vmatprep.subr.bf16.mxu1 %v5722_v19 }
 0x4f4   :  { %4320 = vmatpush1.bf16.msra.mxu0 %v7140_v63  ;;  %4384 = vmatpush1.bf16.msra.mxu1 %v7141_v22 }
 0x4f5   :  { %4322 = vmatprep.subr.bf16.mxu0 %v7142_v31  ;;  %4386 = vmatprep.subr.bf16.mxu1 %v7143_v62 }
 0x4f8   :  { %4324 = vmatpush1.bf16.msra.mxu0 %v7144_v44  ;;  %4388 = vmatpush1.bf16.msra.mxu1 %v7145_v26  ;;  %v7196_v26 = vld [vmem:[#allocation69_spill] sm:$0xff] }
 0x4f9   :  { %4326 = vmatprep.subr.bf16.mxu0 %v7146_v52  ;;  %4390 = vmatprep.subr.bf16.mxu1 %v7147_v56  ;;  %v7157_v52 = vld [vmem:[#allocation32_spill] sm:$0xff]  ;;  %v7158_v56 = vld [vmem:[#allocation33_spill] sm:$0xff] }
 0x4fc   :  { %4328 = vmatpush1.bf16.msra.mxu0 %v7148_v34  ;;  %4392 = vmatpush1.bf16.msra.mxu1 %v7149_v53  ;;  %v7159_v34 = vld [vmem:[#allocation34_spill] sm:$0xff]  ;;  %v7160_v53 = vld [vmem:[#allocation35_spill] sm:$0xff] }
 0x4fd   :  { %4330 = vmatprep.subr.bf16.mxu0 %v7150_v0  ;;  %4394 = vmatprep.subr.bf16.mxu1 %v7151_v35  ;;  %v7161_v0 = vld [vmem:[#allocation36_spill] sm:$0xff]  ;;  %v7162_v35 = vld [vmem:[#allocation37_spill] sm:$0xff] }
 0x500   :  { %4332 = vmatpush1.bf16.msra.mxu0 %v7152_v29  ;;  %4396 = vmatpush1.bf16.msra.mxu1 %v7153_v16  ;;  %v7163_v29 = vld [vmem:[#allocation38_spill] sm:$0xff]  ;;  %v7164_v16 = vld [vmem:[#allocation39_spill] sm:$0xff] }
 0x501   :  { %4334 = vmatprep.subr.bf16.mxu0 %v7154_v60  ;;  %4398 = vmatprep.subr.bf16.mxu1 %v7155_v13  ;;  %v7165_v60 = vld [vmem:[#allocation40_spill] sm:$0xff]  ;;  %v7166_v13 = vld [vmem:[#allocation41_spill] sm:$0xff] }
 0x504   :  { %4336 = vmatpush1.bf16.msra.mxu0 %v7156_v23  ;;  %4400 = vmatpush1.bf16.msra.mxu1 %v7157_v52  ;;  %v7167_v23 = vld [vmem:[#allocation42_spill] sm:$0xff]  ;;  %v7168_v52 = vld [vmem:[#allocation43_spill] sm:$0xff] }
 0x505   :  { %4338 = vmatprep.subr.bf16.mxu0 %v7158_v56  ;;  %4402 = vmatprep.subr.bf16.mxu1 %v7159_v34  ;;  %v7169_v56 = vld [vmem:[#allocation44_spill] sm:$0xff]  ;;  %v7170_v34 = vld [vmem:[#allocation45_spill] sm:$0xff] }
 0x508   :  { %4340 = vmatpush1.bf16.msra.mxu0 %v7160_v53  ;;  %4404 = vmatpush1.bf16.msra.mxu1 %v7161_v0  ;;  %v7171_v53 = vld [vmem:[#allocation46_spill] sm:$0xff]  ;;  %v7172_v0 = vld [vmem:[#allocation47_spill] sm:$0xff] }
 0x509   :  { %4342 = vmatprep.subr.bf16.mxu0 %v7162_v35  ;;  %4406 = vmatprep.subr.bf16.mxu1 %v7163_v29  ;;  %v7173_v35 = vld [vmem:[#allocation48_spill] sm:$0xff]  ;;  %v7174_v29 = vld [vmem:[#allocation49_spill] sm:$0xff] }
 0x50c   :  { %4344 = vmatpush1.bf16.msra.mxu0 %v7164_v16  ;;  %4408 = vmatpush1.bf16.msra.mxu1 %v7165_v60  ;;  %v7175_v16 = vld [vmem:[#allocation50_spill] sm:$0xff]  ;;  %v7176_v60 = vld [vmem:[#allocation51_spill] sm:$0xff] }
 0x50d   :  { %4346 = vmatprep.subr.bf16.mxu0 %v7166_v13  ;;  %4410 = vmatprep.subr.bf16.mxu1 %v7167_v23  ;;  %v7177_v13 = vld [vmem:[#allocation52_spill] sm:$0xff]  ;;  %v7178_v23 = vld [vmem:[#allocation53_spill] sm:$0xff] }
 0x510   :  { %4348 = vmatpush1.bf16.msra.mxu0 %v7168_v52  ;;  %4412 = vmatpush1.bf16.msra.mxu1 %v7169_v56  ;;  %v7179_v52 = vld [vmem:[#allocation54_spill] sm:$0xff]  ;;  %v7180_v56 = vld [vmem:[#allocation55_spill] sm:$0xff] }
 0x511   :  { %4350 = vmatprep.subr.bf16.mxu0 %v7170_v34  ;;  %4414 = vmatprep.subr.bf16.mxu1 %v7171_v53  ;;  %v7181_v34 = vld [vmem:[#allocation56_spill] sm:$0xff]  ;;  %v7182_v53 = vld [vmem:[#allocation57_spill] sm:$0xff] }
 0x514   :  { %4352 = vmatpush1.bf16.msra.mxu0 %v7172_v0  ;;  %4416 = vmatpush1.bf16.msra.mxu1 %v7173_v35  ;;  %v7183_v0 = vld [vmem:[#allocation58_spill] sm:$0xff]  ;;  %v7184_v35 = vld [vmem:[#allocation59_spill] sm:$0xff] }
 0x515   :  { %4354 = vmatprep.subr.bf16.mxu0 %v7174_v29  ;;  %4418 = vmatprep.subr.bf16.mxu1 %v7175_v16  ;;  %v7185_v29 = vld [vmem:[#allocation60_spill] sm:$0xff]  ;;  %v7186_v16 = vld [vmem:[#allocation61_spill] sm:$0xff] }
 0x518   :  { %4356 = vmatpush1.bf16.msra.mxu0 %v7176_v60  ;;  %4420 = vmatpush1.bf16.msra.mxu1 %v7177_v13  ;;  %v7187_v60 = vld [vmem:[#allocation62_spill] sm:$0xff]  ;;  %v7188_v13 = vld [vmem:[#allocation63_spill] sm:$0xff] }
 0x519   :  { %4358 = vmatprep.subr.bf16.mxu0 %v7178_v23  ;;  %4422 = vmatprep.subr.bf16.mxu1 %v7179_v52  ;;  %v7189_v23 = vld [vmem:[#allocation64_spill] sm:$0xff]  ;;  %v7190_v52 = vld [vmem:[#allocation65_spill] sm:$0xff] }
 0x51c   :  { %4360 = vmatpush1.bf16.msra.mxu0 %v7180_v56  ;;  %4424 = vmatpush1.bf16.msra.mxu1 %v7181_v34  ;;  %v7191_v56 = vld [vmem:[#allocation66_spill] sm:$0xff]  ;;  %v7192_v34 = vld [vmem:[#allocation67_spill] sm:$0xff] }
 0x51d   :  { %4362 = vmatprep.subr.bf16.mxu0 %v7182_v53  ;;  %4426 = vmatprep.subr.bf16.mxu1 %v7183_v0  ;;  %v7193_v53 = vld [vmem:[#allocation68_spill] sm:$0xff]  ;;  %v7194_v0 = vld [vmem:[#allocation13_spill] sm:$0xff] }
 0x520   :  { %4364 = vmatpush1.bf16.msra.mxu0 %v7184_v35  ;;  %4428 = vmatpush1.bf16.msra.mxu1 %v7185_v29  ;;  %v7195_v35 = vld [vmem:[#allocation14_spill] sm:$0xff] }
 0x521   :  { %4366 = vmatprep.subr.bf16.mxu0 %v7186_v16  ;;  %4430 = vmatprep.subr.bf16.mxu1 %v7187_v60 }
 0x524   :  { %4368 = vmatpush1.bf16.msra.mxu0 %v7188_v13  ;;  %4432 = vmatpush1.bf16.msra.mxu1 %v7189_v23 }
 0x525   :  { %4370 = vmatprep.subr.bf16.mxu0 %v7190_v52  ;;  %4434 = vmatprep.subr.bf16.mxu1 %v7191_v56  ;;  %v7197_v56 = vld [vmem:[#allocation74_spill] sm:$0xff] }
 0x528   :  { %4372 = vmatpush1.bf16.msra.mxu0 %v7192_v34  ;;  %4436 = vmatpush1.bf16.msra.mxu1 %v7193_v53 }
 0x529   :  { %4438 = vmatprep.subr.bf16.mxu0 %v7194_v0  ;;  %4470 = vmatprep.subr.bf16.mxu1 %v7195_v35 }
 0x59e   :  { %v1893_v29 = vpop.f32.mrb[22].mxu0  ;;  %v1964_v16 = vpop.f32.mrb[22].mxu1 }
 0x59f   :  { %v1894_v60 = vadd.f32 %v1893_v29, %v7196_v26  ;;  %v1895_v44 = vpop.f32.mrb[23].mxu0  ;;  %v1966_v13 = vpop.f32.mrb[23].mxu1  ;;  %v1965_v53 = vadd.f32 %v1964_v16, %v7077_v3  ;;  %v7198_v16 = vld [vmem:[#allocation70_spill] sm:$0xff] }
 0x5a0   :  { %v1896_v23 = vadd.f32 %v1895_v44, %v7075_v30  ;;  %v1967_v34 = vadd.f32 %v1966_v13, %v7197_v56 }
 0x5a1   :  { %v3430_v62 = vmul.f32 -1.442695, %v1894_v60 }
 0x5a2   :  { %v3431_v52 = vmul.f32 -1.442695, %v1896_v23  ;;  %v3432_v31 = vmul.f32 -1.442695, %v1967_v34 }
 0x5a3   :  { %5197 = vpow2.f32 %v3430_v62 }
 0x5a4   :  { %5199 = vpow2.f32 %v3431_v52 }
 0x5a5   :  { %5201 = vpow2.f32 %v3432_v31 }
 0x5a6   :  { %5203 = vtanh.f32 %v1965_v53 }
 0x5ad   :  { %v5198_v0 = vpop.eup %5197 }
 0x5ae   :  { %v5200_v22 = vpop.eup %5199  ;;  %v1972_v35 = vadd.f32 1.0, %v5198_v0 }
 0x5af   :  { %v1978_v63 = vadd.f32 1.0, %v5200_v22  ;;  %v5202_v29 = vpop.eup %5201 }
 0x5b0   :  { %5205 = vrcp.f32 %v1972_v35  ;;  %v5204_v26 = vpop.eup %5203  ;;  %v1985_v62 = vadd.f32 1.0, %v5202_v29 }
 0x5b1   :  { %5207 = vrcp.f32 %v1978_v63 }
 0x5b2   :  { %5209 = vrcp.f32 %v1985_v62 }
 0x5ba   :  { %v5206_v44 = vpop.eup %5205 }
 0x5bb   :  { %v5208_v60 = vpop.eup %5207  ;;  %v1989_v23 = vmul.f32 %v5206_v44, %v5204_v26  ;;  %v7199_v26 = vld [vmem:[#allocation72_spill] sm:$0xff] }
 0x5bc   :  { %v1988_v52 = vmul.f32 %v5208_v60, %v6275_v27  ;;  %v5210_v27 = vpop.eup %5209 }
 0x5be   :  { %v2066_v13 = vpop.f32.mrb[8].mxu0  ;;  %v2137_v34 = vpop.f32.mrb[8].mxu1  ;;  %v6389_v56 = vadd.f32 %v1989_v23, %v1988_v52 }
 0x5bf   :  { %v5021_v0 = vadd.f32 %v2066_v13, %v7198_v16  ;;  %v2068_v31 = vpop.f32.mrb[9].mxu0  ;;  %v2139_v53 = vpop.f32.mrb[9].mxu1  ;;  %v5037_v23 = vadd.f32 %v2137_v34, %v5920_v42 }
 0x5c0   :  { %v5022_v22 = vadd.f32 %v2068_v31, %v7018_v38  ;;  %5211 = vtanh.f32 %v6389_v56  ;;  %v5038_v29 = vadd.f32 %v2139_v53, %v7199_v26 }
 0x5c1   :  { %v3433_v63 = vmul.f32 -1.442695, %v5021_v0 }
 0x5c2   :  { %v3434_v35 = vmul.f32 -1.442695, %v5022_v22  ;;  %v3435_v60 = vmul.f32 -1.442695, %v5038_v29 }
 0x5c3   :  { %5213 = vpow2.f32 %v3433_v63 }
 0x5c4   :  { %5215 = vpow2.f32 %v3434_v35 }
 0x5c5   :  { %5217 = vpow2.f32 %v3435_v60 }
 0x5c6   :  { %5219 = vtanh.f32 %v5037_v23  ;;  %v7203_v23 = vld [vmem:[#allocation18_spill] sm:$0xff] }
 0x5ca   :  { %v5212_v44 = vpop.eup %5211 }
 0x5cb   :  { %v1992_v62 = vmul.f32 %v5212_v44, %v5210_v27 }
 0x5cd   :  { %v5214_v52 = vpop.eup %5213  ;;  %2234 = vmatprep.mubr.f32.mxu0 %v1992_v62  ;;  %2305 = vmatprep.mubr.f32.mxu1 %v1992_v62  ;;  %v7204_v62 = vld [vmem:[#allocation19_spill] sm:$0xff] }
 0x5ce   :  { %v5216_v13 = vpop.eup %5215  ;;  %v2149_v16 = vadd.f32 1.0, %v5214_v52  ;;  %v7205_v52 = vld [vmem:[#allocation20_spill] sm:$0xff] }
 0x5cf   :  { %v2155_v31 = vadd.f32 1.0, %v5216_v13  ;;  %v5218_v0 = vpop.eup %5217  ;;  %v7206_v13 = vld [vmem:[#allocation21_spill] sm:$0xff] }
 0x5d0   :  { %5221 = vrcp.f32 %v2149_v16  ;;  %v5220_v22 = vpop.eup %5219  ;;  %v2162_v26 = vadd.f32 1.0, %v5218_v0  ;;  %v7201_v16 = vld [vmem:[#allocation16_spill] sm:$0xff]  ;;  %v7208_v0 = vld [vmem:[#allocation23_spill] sm:$0xff] }
 0x5d1   :  { %5223 = vrcp.f32 %v2155_v31  ;;  %v7207_v31 = vld [vmem:[#allocation22_spill] sm:$0xff] }
 0x5d2   :  { %5225 = vrcp.f32 %v2162_v26  ;;  %v7202_v26 = vld [vmem:[#allocation17_spill] sm:$0xff] }
 0x5da   :  { %v5222_v63 = vpop.eup %5221 }
 0x5db   :  { %v5224_v53 = vpop.eup %5223  ;;  %v2166_v35 = vmul.f32 %v5222_v63, %v5220_v22  ;;  %v7209_v22 = vld [vmem:[#allocation24_spill] sm:$0xff]  ;;  %v7210_v63 = vld [vmem:[#allocation25_spill] sm:$0xff] }
 0x5dc   :  { %v2165_v29 = vmul.f32 %v5224_v53, %v6283_v4  ;;  %v5226_v27 = vpop.eup %5225  ;;  %v7200_v4 = vld [vmem:[#allocation15_spill] sm:$0xff]  ;;  %v7211_v53 = vld [vmem:[#allocation26_spill] sm:$0xff] }
 0x5de   :  { %v6397_v34 = vadd.f32 %v2166_v35, %v2165_v29  ;;  %v7212_v35 = vld [vmem:[#allocation27_spill] sm:$0xff]  ;;  %v7213_v29 = vld [vmem:[#allocation28_spill] sm:$0xff] }
 0x5e0   :  { %5227 = vtanh.f32 %v6397_v34 }
 0x5ea   :  { %v5228_v44 = vpop.eup %5227 }
 0x5eb   :  { %v2169_v60 = vmul.f32 %v5228_v44, %v5226_v27  ;;  %v7214_v27 = vld [vmem:[#allocation29_spill] sm:$0xff]  ;;  %v7215_v44 = vld [vmem:[#allocation30_spill] sm:$0xff] }
 0x5ed   :  { %2235 = vmatmul.mubr.f32.vlgmr.msra.gmra.mrb[24].mxu0 %v2169_v60  ;;  %2306 = vmatmul.mubr.f32.vlgmr.msra.gmra.mrb[24].mxu1 %v2169_v60 }
 0x5ee   :  { %4440 = vmatpush1.bf16.msra.mxu0 %v5549_v36  ;;  %4472 = vmatpush1.bf16.msra.mxu1 %v5554_v39 }
 0x5ef   :  { %4442 = vmatprep.subr.bf16.mxu0 %v5557_v43  ;;  %4474 = vmatprep.subr.bf16.mxu1 %v5563_v48 }
 0x5f0   :  { %2407 = vmatprep.mubr.f32.mxu0 %v6957_v17  ;;  %2478 = vmatprep.mubr.f32.mxu1 %v6957_v17 }
 0x5f2   :  { %4444 = vmatpush1.bf16.msra.mxu0 %v5567_v51  ;;  %4476 = vmatpush1.bf16.msra.mxu1 %v5571_v55 }
 0x5f3   :  { %4446 = vmatprep.subr.bf16.mxu0 %v5575_v58  ;;  %4478 = vmatprep.subr.bf16.mxu1 %v5579_v61 }
 0x5f6   :  { %4448 = vmatpush1.bf16.msra.mxu0 %v5586_v2  ;;  %4480 = vmatpush1.bf16.msra.mxu1 %v5590_v5 }
 0x5f7   :  { %4450 = vmatprep.subr.bf16.mxu0 %v5594_v8  ;;  %4482 = vmatprep.subr.bf16.mxu1 %v5598_v11 }
 0x5fa   :  { %4452 = vmatpush1.bf16.msra.mxu0 %v5605_v15  ;;  %4484 = vmatpush1.bf16.msra.mxu1 %v5609_v18 }
 0x5fb   :  { %4454 = vmatprep.subr.bf16.mxu0 %v5613_v21  ;;  %4486 = vmatprep.subr.bf16.mxu1 %v5617_v24 }
 0x5fe   :  { %4456 = vmatpush1.bf16.msra.mxu0 %v5624_v28  ;;  %4488 = vmatpush1.bf16.msra.mxu1 %v5628_v33 }
 0x5ff   :  { %4458 = vmatprep.subr.bf16.mxu0 %v5632_v37  ;;  %4490 = vmatprep.subr.bf16.mxu1 %v5636_v41 }
 0x602   :  { %4460 = vmatpush1.bf16.msra.mxu0 %v5643_v46  ;;  %4492 = vmatpush1.bf16.msra.mxu1 %v5647_v50 }
 0x603   :  { %4462 = vmatprep.subr.bf16.mxu0 %v5651_v54  ;;  %4494 = vmatprep.subr.bf16.mxu1 %v5655_v59 }
 0x606   :  { %4464 = vmatpush1.bf16.msra.mxu0 %v5662_v1  ;;  %4496 = vmatpush1.bf16.msra.mxu1 %v5666_v6 }
 0x607   :  { %4466 = vmatprep.subr.bf16.mxu0 %v5670_v10  ;;  %4498 = vmatprep.subr.bf16.mxu1 %v5674_v14 }
 0x60a   :  { %4468 = vmatpush1.bf16.msra.mxu0 %v5681_v20  ;;  %4500 = vmatpush1.bf16.msra.mxu1 %v5685_v25 }
 0x60b   :  { %4502 = vmatprep.subr.bf16.mxu0 %v5689_v32  ;;  %4566 = vmatprep.subr.bf16.mxu1 %v5693_v40 }
 0x60d   :  { %2408 = vmatmul.mubr.f32.vlgmr.msra.gmra.mrb[10].mxu0 %v2169_v60  ;;  %2479 = vmatmul.mubr.f32.vlgmr.msra.gmra.mrb[10].mxu1 %v2169_v60  ;;  %v7216_v60 = vld [vmem:[#allocation31_spill] sm:$0xff] }
 0x60e   :  { %4504 = vmatpush1.bf16.msra.mxu0 %v5697_v45  ;;  %4568 = vmatpush1.bf16.msra.mxu1 %v5701_v47 }
 0x60f   :  { %4506 = vmatprep.subr.bf16.mxu0 %v5703_v49  ;;  %4570 = vmatprep.subr.bf16.mxu1 %v5707_v57 }
 0x612   :  { %4508 = vmatpush1.bf16.msra.mxu0 %v5713_v7  ;;  %4572 = vmatpush1.bf16.msra.mxu1 %v5717_v9 }
 0x613   :  { %4510 = vmatprep.subr.bf16.mxu0 %v5719_v12  ;;  %4574 = vmatprep.subr.bf16.mxu1 %v5722_v19 }
 0x616   :  { %4512 = vmatpush1.bf16.msra.mxu0 %v7200_v4  ;;  %4576 = vmatpush1.bf16.msra.mxu1 %v7201_v16 }
 0x617   :  { %4514 = vmatprep.subr.bf16.mxu0 %v7202_v26  ;;  %4578 = vmatprep.subr.bf16.mxu1 %v7203_v23 }
 0x61a   :  { %4516 = vmatpush1.bf16.msra.mxu0 %v7204_v62  ;;  %4580 = vmatpush1.bf16.msra.mxu1 %v7205_v52  ;;  %v7256_v52 = vld [vmem:[#allocation69_spill] sm:$0xff] }
 0x61b   :  { %4518 = vmatprep.subr.bf16.mxu0 %v7206_v13  ;;  %4582 = vmatprep.subr.bf16.mxu1 %v7207_v31  ;;  %v7217_v13 = vld [vmem:[#allocation32_spill] sm:$0xff]  ;;  %v7218_v31 = vld [vmem:[#allocation33_spill] sm:$0xff] }
 0x61e   :  { %4520 = vmatpush1.bf16.msra.mxu0 %v7208_v0  ;;  %4584 = vmatpush1.bf16.msra.mxu1 %v7209_v22  ;;  %v7219_v0 = vld [vmem:[#allocation34_spill] sm:$0xff]  ;;  %v7220_v22 = vld [vmem:[#allocation35_spill] sm:$0xff] }
 0x61f   :  { %4522 = vmatprep.subr.bf16.mxu0 %v7210_v63  ;;  %4586 = vmatprep.subr.bf16.mxu1 %v7211_v53  ;;  %v7221_v63 = vld [vmem:[#allocation36_spill] sm:$0xff]  ;;  %v7222_v53 = vld [vmem:[#allocation37_spill] sm:$0xff] }
 0x622   :  { %4524 = vmatpush1.bf16.msra.mxu0 %v7212_v35  ;;  %4588 = vmatpush1.bf16.msra.mxu1 %v7213_v29  ;;  %v7223_v35 = vld [vmem:[#allocation38_spill] sm:$0xff]  ;;  %v7224_v29 = vld [vmem:[#allocation39_spill] sm:$0xff] }
 0x623   :  { %4526 = vmatprep.subr.bf16.mxu0 %v7214_v27  ;;  %4590 = vmatprep.subr.bf16.mxu1 %v7215_v44  ;;  %v7225_v27 = vld [vmem:[#allocation40_spill] sm:$0xff]  ;;  %v7226_v44 = vld [vmem:[#allocation41_spill] sm:$0xff] }
 0x626   :  { %4528 = vmatpush1.bf16.msra.mxu0 %v7216_v60  ;;  %4592 = vmatpush1.bf16.msra.mxu1 %v7217_v13  ;;  %v7227_v60 = vld [vmem:[#allocation42_spill] sm:$0xff]  ;;  %v7228_v13 = vld [vmem:[#allocation43_spill] sm:$0xff] }
 0x627   :  { %4530 = vmatprep.subr.bf16.mxu0 %v7218_v31  ;;  %4594 = vmatprep.subr.bf16.mxu1 %v7219_v0  ;;  %v7229_v31 = vld [vmem:[#allocation44_spill] sm:$0xff]  ;;  %v7230_v0 = vld [vmem:[#allocation45_spill] sm:$0xff] }
 0x62a   :  { %4532 = vmatpush1.bf16.msra.mxu0 %v7220_v22  ;;  %4596 = vmatpush1.bf16.msra.mxu1 %v7221_v63  ;;  %v7231_v22 = vld [vmem:[#allocation46_spill] sm:$0xff]  ;;  %v7232_v63 = vld [vmem:[#allocation47_spill] sm:$0xff] }
 0x62b   :  { %4534 = vmatprep.subr.bf16.mxu0 %v7222_v53  ;;  %4598 = vmatprep.subr.bf16.mxu1 %v7223_v35  ;;  %v7233_v53 = vld [vmem:[#allocation48_spill] sm:$0xff]  ;;  %v7234_v35 = vld [vmem:[#allocation49_spill] sm:$0xff] }
 0x62e   :  { %4536 = vmatpush1.bf16.msra.mxu0 %v7224_v29  ;;  %4600 = vmatpush1.bf16.msra.mxu1 %v7225_v27  ;;  %v7235_v29 = vld [vmem:[#allocation50_spill] sm:$0xff]  ;;  %v7236_v27 = vld [vmem:[#allocation51_spill] sm:$0xff] }
 0x62f   :  { %4538 = vmatprep.subr.bf16.mxu0 %v7226_v44  ;;  %4602 = vmatprep.subr.bf16.mxu1 %v7227_v60  ;;  %v7237_v44 = vld [vmem:[#allocation52_spill] sm:$0xff]  ;;  %v7238_v60 = vld [vmem:[#allocation53_spill] sm:$0xff] }
 0x632   :  { %4540 = vmatpush1.bf16.msra.mxu0 %v7228_v13  ;;  %4604 = vmatpush1.bf16.msra.mxu1 %v7229_v31  ;;  %v7239_v13 = vld [vmem:[#allocation54_spill] sm:$0xff]  ;;  %v7240_v31 = vld [vmem:[#allocation55_spill] sm:$0xff] }
 0x633   :  { %4542 = vmatprep.subr.bf16.mxu0 %v7230_v0  ;;  %4606 = vmatprep.subr.bf16.mxu1 %v7231_v22  ;;  %v7241_v0 = vld [vmem:[#allocation56_spill] sm:$0xff]  ;;  %v7242_v22 = vld [vmem:[#allocation57_spill] sm:$0xff] }
 0x636   :  { %4544 = vmatpush1.bf16.msra.mxu0 %v7232_v63  ;;  %4608 = vmatpush1.bf16.msra.mxu1 %v7233_v53  ;;  %v7243_v63 = vld [vmem:[#allocation58_spill] sm:$0xff]  ;;  %v7244_v53 = vld [vmem:[#allocation59_spill] sm:$0xff] }
 0x637   :  { %4546 = vmatprep.subr.bf16.mxu0 %v7234_v35  ;;  %4610 = vmatprep.subr.bf16.mxu1 %v7235_v29  ;;  %v7245_v35 = vld [vmem:[#allocation60_spill] sm:$0xff]  ;;  %v7246_v29 = vld [vmem:[#allocation61_spill] sm:$0xff] }
 0x63a   :  { %4548 = vmatpush1.bf16.msra.mxu0 %v7236_v27  ;;  %4612 = vmatpush1.bf16.msra.mxu1 %v7237_v44  ;;  %v7247_v27 = vld [vmem:[#allocation62_spill] sm:$0xff]  ;;  %v7248_v44 = vld [vmem:[#allocation63_spill] sm:$0xff] }
 0x63b   :  { %4550 = vmatprep.subr.bf16.mxu0 %v7238_v60  ;;  %4614 = vmatprep.subr.bf16.mxu1 %v7239_v13  ;;  %v7249_v60 = vld [vmem:[#allocation64_spill] sm:$0xff]  ;;  %v7250_v13 = vld [vmem:[#allocation65_spill] sm:$0xff] }
 0x63e   :  { %4552 = vmatpush1.bf16.msra.mxu0 %v7240_v31  ;;  %4616 = vmatpush1.bf16.msra.mxu1 %v7241_v0  ;;  %v7251_v31 = vld [vmem:[#allocation66_spill] sm:$0xff]  ;;  %v7252_v0 = vld [vmem:[#allocation67_spill] sm:$0xff] }
 0x63f   :  { %4554 = vmatprep.subr.bf16.mxu0 %v7242_v22  ;;  %4618 = vmatprep.subr.bf16.mxu1 %v7243_v63  ;;  %v7253_v22 = vld [vmem:[#allocation68_spill] sm:$0xff]  ;;  %v7254_v63 = vld [vmem:[#allocation13_spill] sm:$0xff] }
 0x642   :  { %4556 = vmatpush1.bf16.msra.mxu0 %v7244_v53  ;;  %4620 = vmatpush1.bf16.msra.mxu1 %v7245_v35  ;;  %v7255_v53 = vld [vmem:[#allocation14_spill] sm:$0xff] }
 0x643   :  { %4558 = vmatprep.subr.bf16.mxu0 %v7246_v29  ;;  %4622 = vmatprep.subr.bf16.mxu1 %v7247_v27 }
 0x646   :  { %4560 = vmatpush1.bf16.msra.mxu0 %v7248_v44  ;;  %4624 = vmatpush1.bf16.msra.mxu1 %v7249_v60 }
 0x647   :  { %4562 = vmatprep.subr.bf16.mxu0 %v7250_v13  ;;  %4626 = vmatprep.subr.bf16.mxu1 %v7251_v31  ;;  %v7257_v31 = vld [vmem:[#allocation74_spill] sm:$0xff] }
 0x64a   :  { %4564 = vmatpush1.bf16.msra.mxu0 %v7252_v0  ;;  %4628 = vmatpush1.bf16.msra.mxu1 %v7253_v22 }
 0x64b   :  { %4630 = vmatprep.subr.bf16.mxu0 %v7254_v63  ;;  %4662 = vmatprep.subr.bf16.mxu1 %v7255_v53 }
 0x6c0   :  { %v2236_v35 = vpop.f32.mrb[24].mxu0  ;;  %v2307_v29 = vpop.f32.mrb[24].mxu1 }
 0x6c1   :  { %v2237_v27 = vadd.f32 %v2236_v35, %v7256_v52  ;;  %v2238_v62 = vpop.f32.mrb[25].mxu0  ;;  %v2309_v44 = vpop.f32.mrb[25].mxu1  ;;  %v2308_v22 = vadd.f32 %v2307_v29, %v7077_v3  ;;  %v7258_v29 = vld [vmem:[#allocation70_spill] sm:$0xff] }
 0x6c2   :  { %v2239_v60 = vadd.f32 %v2238_v62, %v7075_v30  ;;  %v2310_v0 = vadd.f32 %v2309_v44, %v7257_v31 }
 0x6c3   :  { %v3436_v23 = vmul.f32 -1.442695, %v2237_v27 }
 0x6c4   :  { %v3437_v13 = vmul.f32 -1.442695, %v2239_v60  ;;  %v3438_v26 = vmul.f32 -1.442695, %v2310_v0 }
 0x6c5   :  { %5229 = vpow2.f32 %v3436_v23 }
 0x6c6   :  { %5231 = vpow2.f32 %v3437_v13 }
 0x6c7   :  { %5233 = vpow2.f32 %v3438_v26 }
 0x6c8   :  { %5235 = vtanh.f32 %v2308_v22 }
 0x6cf   :  { %v5230_v63 = vpop.eup %5229 }
 0x6d0   :  { %v5232_v16 = vpop.eup %5231  ;;  %v2315_v53 = vadd.f32 1.0, %v5230_v63 }
 0x6d1   :  { %v2321_v4 = vadd.f32 1.0, %v5232_v16  ;;  %v5234_v35 = vpop.eup %5233 }
 0x6d2   :  { %5237 = vrcp.f32 %v2315_v53  ;;  %v5236_v52 = vpop.eup %5235  ;;  %v2328_v23 = vadd.f32 1.0, %v5234_v35 }
 0x6d3   :  { %5239 = vrcp.f32 %v2321_v4 }
 0x6d4   :  { %5241 = vrcp.f32 %v2328_v23 }
 0x6dc   :  { %v5238_v62 = vpop.eup %5237 }
 0x6dd   :  { %v5240_v27 = vpop.eup %5239  ;;  %v2332_v60 = vmul.f32 %v5238_v62, %v5236_v52  ;;  %v7259_v52 = vld [vmem:[#allocation72_spill] sm:$0xff] }
 0x6de   :  { %v2331_v13 = vmul.f32 %v5240_v27, %v6389_v56  ;;  %v5242_v56 = vpop.eup %5241 }
 0x6e0   :  { %v2409_v44 = vpop.f32.mrb[10].mxu0  ;;  %v2480_v0 = vpop.f32.mrb[10].mxu1  ;;  %v6503_v31 = vadd.f32 %v2332_v60, %v2331_v13 }
 0x6e1   :  { %v5023_v63 = vadd.f32 %v2409_v44, %v7258_v29  ;;  %v2411_v26 = vpop.f32.mrb[11].mxu0  ;;  %v2482_v22 = vpop.f32.mrb[11].mxu1  ;;  %v5039_v60 = vadd.f32 %v2480_v0, %v5920_v42 }
 0x6e2   :  { %v5024_v16 = vadd.f32 %v2411_v26, %v7018_v38  ;;  %5243 = vtanh.f32 %v6503_v31  ;;  %v5040_v35 = vadd.f32 %v2482_v22, %v7259_v52 }
 0x6e3   :  { %v3439_v4 = vmul.f32 -1.442695, %v5023_v63 }
 0x6e4   :  { %v3440_v53 = vmul.f32 -1.442695, %v5024_v16  ;;  %v3441_v27 = vmul.f32 -1.442695, %v5040_v35 }
 0x6e5   :  { %5245 = vpow2.f32 %v3439_v4 }
 0x6e6   :  { %5247 = vpow2.f32 %v3440_v53 }
 0x6e7   :  { %5249 = vpow2.f32 %v3441_v27 }
 0x6e8   :  { %5251 = vtanh.f32 %v5039_v60  ;;  %v7263_v60 = vld [vmem:[#allocation18_spill] sm:$0xff] }
 0x6ec   :  { %v5244_v62 = vpop.eup %5243 }
 0x6ed   :  { %v2335_v23 = vmul.f32 %v5244_v62, %v5242_v56 }
 0x6ef   :  { %v5246_v13 = vpop.eup %5245  ;;  %2577 = vmatprep.mubr.f32.mxu0 %v2335_v23  ;;  %2648 = vmatprep.mubr.f32.mxu1 %v2335_v23  ;;  %v7264_v23 = vld [vmem:[#allocation19_spill] sm:$0xff] }
 0x6f0   :  { %v5248_v44 = vpop.eup %5247  ;;  %v2492_v29 = vadd.f32 1.0, %v5246_v13  ;;  %v7265_v13 = vld [vmem:[#allocation20_spill] sm:$0xff] }
 0x6f1   :  { %v2498_v26 = vadd.f32 1.0, %v5248_v44  ;;  %v5250_v63 = vpop.eup %5249  ;;  %v7266_v44 = vld [vmem:[#allocation21_spill] sm:$0xff] }
 0x6f2   :  { %5253 = vrcp.f32 %v2492_v29  ;;  %v5252_v16 = vpop.eup %5251  ;;  %v2505_v52 = vadd.f32 1.0, %v5250_v63  ;;  %v7261_v29 = vld [vmem:[#allocation16_spill] sm:$0xff]  ;;  %v7268_v63 = vld [vmem:[#allocation23_spill] sm:$0xff] }
 0x6f3   :  { %5255 = vrcp.f32 %v2498_v26  ;;  %v7267_v26 = vld [vmem:[#allocation22_spill] sm:$0xff] }
 0x6f4   :  { %5257 = vrcp.f32 %v2505_v52  ;;  %v7262_v52 = vld [vmem:[#allocation17_spill] sm:$0xff] }
 0x6fc   :  { %v5254_v4 = vpop.eup %5253 }
 0x6fd   :  { %v5256_v22 = vpop.eup %5255  ;;  %v2509_v53 = vmul.f32 %v5254_v4, %v5252_v16  ;;  %v7269_v16 = vld [vmem:[#allocation24_spill] sm:$0xff]  ;;  %v7270_v4 = vld [vmem:[#allocation25_spill] sm:$0xff] }
 0x6fe   :  { %v2508_v35 = vmul.f32 %v5256_v22, %v6397_v34  ;;  %v5258_v56 = vpop.eup %5257  ;;  %v7260_v34 = vld [vmem:[#allocation15_spill] sm:$0xff]  ;;  %v7271_v22 = vld [vmem:[#allocation26_spill] sm:$0xff] }
 0x700   :  { %v6511_v0 = vadd.f32 %v2509_v53, %v2508_v35  ;;  %v7272_v53 = vld [vmem:[#allocation27_spill] sm:$0xff]  ;;  %v7273_v35 = vld [vmem:[#allocation28_spill] sm:$0xff] }
 0x702   :  { %5259 = vtanh.f32 %v6511_v0 }
 0x70c   :  { %v5260_v62 = vpop.eup %5259 }
 0x70d   :  { %v2512_v27 = vmul.f32 %v5260_v62, %v5258_v56  ;;  %v7274_v56 = vld [vmem:[#allocation29_spill] sm:$0xff]  ;;  %v7275_v62 = vld [vmem:[#allocation30_spill] sm:$0xff] }
 0x70f   :  { %2578 = vmatmul.mubr.f32.vlgmr.msra.gmra.mrb[26].mxu0 %v2512_v27  ;;  %2649 = vmatmul.mubr.f32.vlgmr.msra.gmra.mrb[26].mxu1 %v2512_v27 }
 0x710   :  { %4632 = vmatpush1.bf16.msra.mxu0 %v5549_v36  ;;  %4664 = vmatpush1.bf16.msra.mxu1 %v5554_v39 }
 0x711   :  { %4634 = vmatprep.subr.bf16.mxu0 %v5557_v43  ;;  %4666 = vmatprep.subr.bf16.mxu1 %v5563_v48 }
 0x712   :  { %2750 = vmatprep.mubr.f32.mxu0 %v6957_v17  ;;  %2821 = vmatprep.mubr.f32.mxu1 %v6957_v17 }
 0x714   :  { %4636 = vmatpush1.bf16.msra.mxu0 %v5567_v51  ;;  %4668 = vmatpush1.bf16.msra.mxu1 %v5571_v55 }
 0x715   :  { %4638 = vmatprep.subr.bf16.mxu0 %v5575_v58  ;;  %4670 = vmatprep.subr.bf16.mxu1 %v5579_v61 }
 0x718   :  { %4640 = vmatpush1.bf16.msra.mxu0 %v5586_v2  ;;  %4672 = vmatpush1.bf16.msra.mxu1 %v5590_v5 }
 0x719   :  { %4642 = vmatprep.subr.bf16.mxu0 %v5594_v8  ;;  %4674 = vmatprep.subr.bf16.mxu1 %v5598_v11 }
 0x71c   :  { %4644 = vmatpush1.bf16.msra.mxu0 %v5605_v15  ;;  %4676 = vmatpush1.bf16.msra.mxu1 %v5609_v18 }
 0x71d   :  { %4646 = vmatprep.subr.bf16.mxu0 %v5613_v21  ;;  %4678 = vmatprep.subr.bf16.mxu1 %v5617_v24 }
 0x720   :  { %4648 = vmatpush1.bf16.msra.mxu0 %v5624_v28  ;;  %4680 = vmatpush1.bf16.msra.mxu1 %v5628_v33 }
 0x721   :  { %4650 = vmatprep.subr.bf16.mxu0 %v5632_v37  ;;  %4682 = vmatprep.subr.bf16.mxu1 %v5636_v41 }
 0x724   :  { %4652 = vmatpush1.bf16.msra.mxu0 %v5643_v46  ;;  %4684 = vmatpush1.bf16.msra.mxu1 %v5647_v50 }
 0x725   :  { %4654 = vmatprep.subr.bf16.mxu0 %v5651_v54  ;;  %4686 = vmatprep.subr.bf16.mxu1 %v5655_v59 }
 0x728   :  { %4656 = vmatpush1.bf16.msra.mxu0 %v5662_v1  ;;  %4688 = vmatpush1.bf16.msra.mxu1 %v5666_v6 }
 0x729   :  { %4658 = vmatprep.subr.bf16.mxu0 %v5670_v10  ;;  %4690 = vmatprep.subr.bf16.mxu1 %v5674_v14 }
 0x72c   :  { %4660 = vmatpush1.bf16.msra.mxu0 %v5681_v20  ;;  %4692 = vmatpush1.bf16.msra.mxu1 %v5685_v25 }
 0x72d   :  { %4694 = vmatprep.subr.bf16.mxu0 %v5689_v32  ;;  %4758 = vmatprep.subr.bf16.mxu1 %v5693_v40 }
 0x72f   :  { %2751 = vmatmul.mubr.f32.vlgmr.msra.gmra.mrb[12].mxu0 %v2512_v27  ;;  %2822 = vmatmul.mubr.f32.vlgmr.msra.gmra.mrb[12].mxu1 %v2512_v27  ;;  %v7276_v27 = vld [vmem:[#allocation31_spill] sm:$0xff] }
 0x730   :  { %4696 = vmatpush1.bf16.msra.mxu0 %v5697_v45  ;;  %4760 = vmatpush1.bf16.msra.mxu1 %v5701_v47 }
 0x731   :  { %4698 = vmatprep.subr.bf16.mxu0 %v5703_v49  ;;  %4762 = vmatprep.subr.bf16.mxu1 %v5707_v57 }
 0x734   :  { %4700 = vmatpush1.bf16.msra.mxu0 %v5713_v7  ;;  %4764 = vmatpush1.bf16.msra.mxu1 %v5717_v9 }
 0x735   :  { %4702 = vmatprep.subr.bf16.mxu0 %v5719_v12  ;;  %4766 = vmatprep.subr.bf16.mxu1 %v5722_v19 }
 0x738   :  { %4704 = vmatpush1.bf16.msra.mxu0 %v7260_v34  ;;  %4768 = vmatpush1.bf16.msra.mxu1 %v7261_v29 }
 0x739   :  { %4706 = vmatprep.subr.bf16.mxu0 %v7262_v52  ;;  %4770 = vmatprep.subr.bf16.mxu1 %v7263_v60 }
 0x73c   :  { %4708 = vmatpush1.bf16.msra.mxu0 %v7264_v23  ;;  %4772 = vmatpush1.bf16.msra.mxu1 %v7265_v13  ;;  %v7316_v13 = vld [vmem:[#allocation69_spill] sm:$0xff] }
 0x73d   :  { %4710 = vmatprep.subr.bf16.mxu0 %v7266_v44  ;;  %4774 = vmatprep.subr.bf16.mxu1 %v7267_v26  ;;  %v7277_v44 = vld [vmem:[#allocation32_spill] sm:$0xff]  ;;  %v7278_v26 = vld [vmem:[#allocation33_spill] sm:$0xff] }
 0x740   :  { %4712 = vmatpush1.bf16.msra.mxu0 %v7268_v63  ;;  %4776 = vmatpush1.bf16.msra.mxu1 %v7269_v16  ;;  %v7279_v63 = vld [vmem:[#allocation34_spill] sm:$0xff]  ;;  %v7280_v16 = vld [vmem:[#allocation35_spill] sm:$0xff] }
 0x741   :  { %4714 = vmatprep.subr.bf16.mxu0 %v7270_v4  ;;  %4778 = vmatprep.subr.bf16.mxu1 %v7271_v22  ;;  %v7281_v4 = vld [vmem:[#allocation36_spill] sm:$0xff]  ;;  %v7282_v22 = vld [vmem:[#allocation37_spill] sm:$0xff] }
 0x744   :  { %4716 = vmatpush1.bf16.msra.mxu0 %v7272_v53  ;;  %4780 = vmatpush1.bf16.msra.mxu1 %v7273_v35  ;;  %v7283_v53 = vld [vmem:[#allocation38_spill] sm:$0xff]  ;;  %v7284_v35 = vld [vmem:[#allocation39_spill] sm:$0xff] }
 0x745   :  { %4718 = vmatprep.subr.bf16.mxu0 %v7274_v56  ;;  %4782 = vmatprep.subr.bf16.mxu1 %v7275_v62  ;;  %v7285_v56 = vld [vmem:[#allocation40_spill] sm:$0xff]  ;;  %v7286_v62 = vld [vmem:[#allocation41_spill] sm:$0xff] }
 0x748   :  { %4720 = vmatpush1.bf16.msra.mxu0 %v7276_v27  ;;  %4784 = vmatpush1.bf16.msra.mxu1 %v7277_v44  ;;  %v7287_v27 = vld [vmem:[#allocation42_spill] sm:$0xff]  ;;  %v7288_v44 = vld [vmem:[#allocation43_spill] sm:$0xff] }
 0x749   :  { %4722 = vmatprep.subr.bf16.mxu0 %v7278_v26  ;;  %4786 = vmatprep.subr.bf16.mxu1 %v7279_v63  ;;  %v7289_v26 = vld [vmem:[#allocation44_spill] sm:$0xff]  ;;  %v7290_v63 = vld [vmem:[#allocation45_spill] sm:$0xff] }
 0x74c   :  { %4724 = vmatpush1.bf16.msra.mxu0 %v7280_v16  ;;  %4788 = vmatpush1.bf16.msra.mxu1 %v7281_v4  ;;  %v7291_v16 = vld [vmem:[#allocation46_spill] sm:$0xff]  ;;  %v7292_v4 = vld [vmem:[#allocation47_spill] sm:$0xff] }
 0x74d   :  { %4726 = vmatprep.subr.bf16.mxu0 %v7282_v22  ;;  %4790 = vmatprep.subr.bf16.mxu1 %v7283_v53  ;;  %v7293_v22 = vld [vmem:[#allocation48_spill] sm:$0xff]  ;;  %v7294_v53 = vld [vmem:[#allocation49_spill] sm:$0xff] }
 0x750   :  { %4728 = vmatpush1.bf16.msra.mxu0 %v7284_v35  ;;  %4792 = vmatpush1.bf16.msra.mxu1 %v7285_v56  ;;  %v7295_v35 = vld [vmem:[#allocation50_spill] sm:$0xff]  ;;  %v7296_v56 = vld [vmem:[#allocation51_spill] sm:$0xff] }
 0x751   :  { %4730 = vmatprep.subr.bf16.mxu0 %v7286_v62  ;;  %4794 = vmatprep.subr.bf16.mxu1 %v7287_v27  ;;  %v7297_v62 = vld [vmem:[#allocation52_spill] sm:$0xff]  ;;  %v7298_v27 = vld [vmem:[#allocation53_spill] sm:$0xff] }
 0x754   :  { %4732 = vmatpush1.bf16.msra.mxu0 %v7288_v44  ;;  %4796 = vmatpush1.bf16.msra.mxu1 %v7289_v26  ;;  %v7299_v44 = vld [vmem:[#allocation54_spill] sm:$0xff]  ;;  %v7300_v26 = vld [vmem:[#allocation55_spill] sm:$0xff] }
 0x755   :  { %4734 = vmatprep.subr.bf16.mxu0 %v7290_v63  ;;  %4798 = vmatprep.subr.bf16.mxu1 %v7291_v16  ;;  %v7301_v63 = vld [vmem:[#allocation56_spill] sm:$0xff]  ;;  %v7302_v16 = vld [vmem:[#allocation57_spill] sm:$0xff] }
 0x758   :  { %4736 = vmatpush1.bf16.msra.mxu0 %v7292_v4  ;;  %4800 = vmatpush1.bf16.msra.mxu1 %v7293_v22  ;;  %v7303_v4 = vld [vmem:[#allocation58_spill] sm:$0xff]  ;;  %v7304_v22 = vld [vmem:[#allocation59_spill] sm:$0xff] }
 0x759   :  { %4738 = vmatprep.subr.bf16.mxu0 %v7294_v53  ;;  %4802 = vmatprep.subr.bf16.mxu1 %v7295_v35  ;;  %v7305_v53 = vld [vmem:[#allocation60_spill] sm:$0xff]  ;;  %v7306_v35 = vld [vmem:[#allocation61_spill] sm:$0xff] }
 0x75c   :  { %4740 = vmatpush1.bf16.msra.mxu0 %v7296_v56  ;;  %4804 = vmatpush1.bf16.msra.mxu1 %v7297_v62  ;;  %v7307_v56 = vld [vmem:[#allocation62_spill] sm:$0xff]  ;;  %v7308_v62 = vld [vmem:[#allocation63_spill] sm:$0xff] }
 0x75d   :  { %4742 = vmatprep.subr.bf16.mxu0 %v7298_v27  ;;  %4806 = vmatprep.subr.bf16.mxu1 %v7299_v44  ;;  %v7309_v27 = vld [vmem:[#allocation64_spill] sm:$0xff]  ;;  %v7310_v44 = vld [vmem:[#allocation65_spill] sm:$0xff] }
 0x760   :  { %4744 = vmatpush1.bf16.msra.mxu0 %v7300_v26  ;;  %4808 = vmatpush1.bf16.msra.mxu1 %v7301_v63  ;;  %v7311_v26 = vld [vmem:[#allocation66_spill] sm:$0xff]  ;;  %v7312_v63 = vld [vmem:[#allocation67_spill] sm:$0xff] }
 0x761   :  { %4746 = vmatprep.subr.bf16.mxu0 %v7302_v16  ;;  %4810 = vmatprep.subr.bf16.mxu1 %v7303_v4  ;;  %v7313_v16 = vld [vmem:[#allocation68_spill] sm:$0xff]  ;;  %v7314_v4 = vld [vmem:[#allocation13_spill] sm:$0xff] }
 0x764   :  { %4748 = vmatpush1.bf16.msra.mxu0 %v7304_v22  ;;  %4812 = vmatpush1.bf16.msra.mxu1 %v7305_v53  ;;  %v7315_v22 = vld [vmem:[#allocation14_spill] sm:$0xff] }
 0x765   :  { %4750 = vmatprep.subr.bf16.mxu0 %v7306_v35  ;;  %4814 = vmatprep.subr.bf16.mxu1 %v7307_v56 }
 0x768   :  { %4752 = vmatpush1.bf16.msra.mxu0 %v7308_v62  ;;  %4816 = vmatpush1.bf16.msra.mxu1 %v7309_v27 }
 0x769   :  { %4754 = vmatprep.subr.bf16.mxu0 %v7310_v44  ;;  %4818 = vmatprep.subr.bf16.mxu1 %v7311_v26  ;;  %v7317_v26 = vld [vmem:[#allocation74_spill] sm:$0xff] }
 0x76c   :  { %4756 = vmatpush1.bf16.msra.mxu0 %v7312_v63  ;;  %4820 = vmatpush1.bf16.msra.mxu1 %v7313_v16 }
 0x76d   :  { %4822 = vmatprep.subr.bf16.mxu0 %v7314_v4  ;;  %4854 = vmatprep.subr.bf16.mxu1 %v7315_v22 }
 0x7e2   :  { %v2579_v53 = vpop.f32.mrb[26].mxu0  ;;  %v2650_v35 = vpop.f32.mrb[26].mxu1 }
 0x7e3   :  { %v2580_v56 = vadd.f32 %v2579_v53, %v7316_v13  ;;  %v2581_v23 = vpop.f32.mrb[27].mxu0  ;;  %v2652_v62 = vpop.f32.mrb[27].mxu1  ;;  %v2651_v16 = vadd.f32 %v2650_v35, %v7077_v3  ;;  %v7318_v35 = vld [vmem:[#allocation70_spill] sm:$0xff] }
 0x7e4   :  { %v2582_v27 = vadd.f32 %v2581_v23, %v7075_v30  ;;  %v2653_v63 = vadd.f32 %v2652_v62, %v7317_v26 }
 0x7e5   :  { %v3442_v60 = vmul.f32 -1.442695, %v2580_v56 }
 0x7e6   :  { %v3443_v44 = vmul.f32 -1.442695, %v2582_v27  ;;  %v3444_v52 = vmul.f32 -1.442695, %v2653_v63 }
 0x7e7   :  { %5261 = vpow2.f32 %v3442_v60 }
 0x7e8   :  { %5263 = vpow2.f32 %v3443_v44 }
 0x7e9   :  { %5265 = vpow2.f32 %v3444_v52 }
 0x7ea   :  { %5267 = vtanh.f32 %v2651_v16 }
 0x7f1   :  { %v5262_v4 = vpop.eup %5261 }
 0x7f2   :  { %v5264_v29 = vpop.eup %5263  ;;  %v2658_v22 = vadd.f32 1.0, %v5262_v4 }
 0x7f3   :  { %v2664_v34 = vadd.f32 1.0, %v5264_v29  ;;  %v5266_v53 = vpop.eup %5265 }
 0x7f4   :  { %5269 = vrcp.f32 %v2658_v22  ;;  %v5268_v13 = vpop.eup %5267  ;;  %v2671_v60 = vadd.f32 1.0, %v5266_v53 }
 0x7f5   :  { %5271 = vrcp.f32 %v2664_v34 }
 0x7f6   :  { %5273 = vrcp.f32 %v2671_v60 }
 0x7fe   :  { %v5270_v23 = vpop.eup %5269 }
 0x7ff   :  { %v5272_v56 = vpop.eup %5271  ;;  %v2675_v27 = vmul.f32 %v5270_v23, %v5268_v13  ;;  %v7319_v13 = vld [vmem:[#allocation72_spill] sm:$0xff] }
 0x800   :  { %v2674_v44 = vmul.f32 %v5272_v56, %v6503_v31  ;;  %v5274_v31 = vpop.eup %5273 }
 0x802   :  { %v2752_v62 = vpop.f32.mrb[12].mxu0  ;;  %v2823_v63 = vpop.f32.mrb[12].mxu1  ;;  %v6617_v26 = vadd.f32 %v2675_v27, %v2674_v44 }
 0x803   :  { %v5025_v4 = vadd.f32 %v2752_v62, %v7318_v35  ;;  %v2754_v52 = vpop.f32.mrb[13].mxu0  ;;  %v2825_v16 = vpop.f32.mrb[13].mxu1  ;;  %v5041_v27 = vadd.f32 %v2823_v63, %v5920_v42 }
 0x804   :  { %v5026_v29 = vadd.f32 %v2754_v52, %v7018_v38  ;;  %5275 = vtanh.f32 %v6617_v26  ;;  %v5042_v53 = vadd.f32 %v2825_v16, %v7319_v13 }
 0x805   :  { %v3445_v34 = vmul.f32 -1.442695, %v5025_v4 }
 0x806   :  { %v3446_v22 = vmul.f32 -1.442695, %v5026_v29  ;;  %v3447_v56 = vmul.f32 -1.442695, %v5042_v53 }
 0x807   :  { %5277 = vpow2.f32 %v3445_v34 }
 0x808   :  { %5279 = vpow2.f32 %v3446_v22 }
 0x809   :  { %5281 = vpow2.f32 %v3447_v56 }
 0x80a   :  { %5283 = vtanh.f32 %v5041_v27  ;;  %v7364_v27 = vld [vmem:[#allocation59_spill] sm:$0xff] }
 0x80e   :  { %v5276_v23 = vpop.eup %5275 }
 0x80f   :  { %v2678_v60 = vmul.f32 %v5276_v23, %v5274_v31 }
 0x811   :  { %v5278_v44 = vpop.eup %5277  ;;  %2920 = vmatprep.mubr.f32.mxu0 %v2678_v60  ;;  %2991 = vmatprep.mubr.f32.mxu1 %v2678_v60  ;;  %v7365_v60 = vld [vmem:[#allocation60_spill] sm:$0xff] }
 0x812   :  { %v5280_v62 = vpop.eup %5279  ;;  %v2835_v35 = vadd.f32 1.0, %v5278_v44  ;;  %v7366_v44 = vld [vmem:[#allocation61_spill] sm:$0xff] }
 0x813   :  { %v2841_v52 = vadd.f32 1.0, %v5280_v62  ;;  %v5282_v4 = vpop.eup %5281  ;;  %v7367_v62 = vld [vmem:[#allocation62_spill] sm:$0xff] }
 0x814   :  { %5285 = vrcp.f32 %v2835_v35  ;;  %v5284_v29 = vpop.eup %5283  ;;  %v2848_v13 = vadd.f32 1.0, %v5282_v4  ;;  %v7362_v35 = vld [vmem:[#allocation57_spill] sm:$0xff]  ;;  %v7369_v4 = vld [vmem:[#allocation64_spill] sm:$0xff] }
 0x815   :  { %5287 = vrcp.f32 %v2841_v52  ;;  %v7368_v52 = vld [vmem:[#allocation63_spill] sm:$0xff] }
 0x816   :  { %5289 = vrcp.f32 %v2848_v13  ;;  %v7363_v13 = vld [vmem:[#allocation58_spill] sm:$0xff] }
 0x81e   :  { %v5286_v34 = vpop.eup %5285 }
 0x81f   :  { %v5288_v16 = vpop.eup %5287  ;;  %v2852_v22 = vmul.f32 %v5286_v34, %v5284_v29  ;;  %v7370_v29 = vld [vmem:[#allocation65_spill] sm:$0xff]  ;;  %v7371_v34 = vld [vmem:[#allocation66_spill] sm:$0xff] }
 0x820   :  { %v2851_v53 = vmul.f32 %v5288_v16, %v6511_v0  ;;  %v5290_v31 = vpop.eup %5289  ;;  %v7361_v0 = vld [vmem:[#allocation56_spill] sm:$0xff]  ;;  %v7372_v16 = vld [vmem:[#allocation67_spill] sm:$0xff] }
 0x822   :  { %v6625_v63 = vadd.f32 %v2852_v22, %v2851_v53  ;;  %v7373_v22 = vld [vmem:[#allocation68_spill] sm:$0xff] }
 0x824   :  { %5291 = vtanh.f32 %v6625_v63 }
 0x82e   :  { %v5292_v23 = vpop.eup %5291 }
 0x82f   :  { %v2855_v56 = vmul.f32 %v5292_v23, %v5290_v31  ;;  %v7374_v23 = vld [vmem:[#allocation69_spill] sm:$0xff] }
 0x831   :  { %2921 = vmatmul.mubr.f32.vlgmr.msra.gmra.mrb[28].mxu0 %v2855_v56  ;;  %2992 = vmatmul.mubr.f32.vlgmr.msra.gmra.mrb[28].mxu1 %v2855_v56 }
 0x832   :  { %4824 = vmatpush1.bf16.msra.mxu0 %v5549_v36  ;;  %4856 = vmatpush1.bf16.msra.mxu1 %v5554_v39  ;;  %v7320_v36 = vld [vmem:[#allocation15_spill] sm:$0xff]  ;;  %v7321_v39 = vld [vmem:[#allocation16_spill] sm:$0xff] }
 0x833   :  { %4826 = vmatprep.subr.bf16.mxu0 %v5557_v43  ;;  %4858 = vmatprep.subr.bf16.mxu1 %v5563_v48  ;;  %v7322_v43 = vld [vmem:[#allocation17_spill] sm:$0xff]  ;;  %v7323_v48 = vld [vmem:[#allocation18_spill] sm:$0xff] }
 0x834   :  { %3093 = vmatprep.mubr.f32.mxu0 %v6957_v17  ;;  %3164 = vmatprep.mubr.f32.mxu1 %v6957_v17  ;;  %v7360_v17 = vld [vmem:[#allocation55_spill] sm:$0xff] }
 0x836   :  { %4828 = vmatpush1.bf16.msra.mxu0 %v5567_v51  ;;  %4860 = vmatpush1.bf16.msra.mxu1 %v5571_v55  ;;  %v7324_v51 = vld [vmem:[#allocation19_spill] sm:$0xff]  ;;  %v7325_v55 = vld [vmem:[#allocation20_spill] sm:$0xff] }
 0x837   :  { %4830 = vmatprep.subr.bf16.mxu0 %v5575_v58  ;;  %4862 = vmatprep.subr.bf16.mxu1 %v5579_v61  ;;  %v7326_v58 = vld [vmem:[#allocation21_spill] sm:$0xff]  ;;  %v7327_v61 = vld [vmem:[#allocation22_spill] sm:$0xff] }
 0x83a   :  { %4832 = vmatpush1.bf16.msra.mxu0 %v5586_v2  ;;  %4864 = vmatpush1.bf16.msra.mxu1 %v5590_v5  ;;  %v7328_v2 = vld [vmem:[#allocation23_spill] sm:$0xff]  ;;  %v7329_v5 = vld [vmem:[#allocation24_spill] sm:$0xff] }
 0x83b   :  { %4834 = vmatprep.subr.bf16.mxu0 %v5594_v8  ;;  %4866 = vmatprep.subr.bf16.mxu1 %v5598_v11  ;;  %v7330_v8 = vld [vmem:[#allocation25_spill] sm:$0xff]  ;;  %v7331_v11 = vld [vmem:[#allocation26_spill] sm:$0xff] }
 0x83e   :  { %4836 = vmatpush1.bf16.msra.mxu0 %v5605_v15  ;;  %4868 = vmatpush1.bf16.msra.mxu1 %v5609_v18  ;;  %v7332_v15 = vld [vmem:[#allocation27_spill] sm:$0xff]  ;;  %v7333_v18 = vld [vmem:[#allocation28_spill] sm:$0xff] }
 0x83f   :  { %4838 = vmatprep.subr.bf16.mxu0 %v5613_v21  ;;  %4870 = vmatprep.subr.bf16.mxu1 %v5617_v24  ;;  %v7334_v21 = vld [vmem:[#allocation29_spill] sm:$0xff]  ;;  %v7335_v24 = vld [vmem:[#allocation30_spill] sm:$0xff] }
 0x842   :  { %4840 = vmatpush1.bf16.msra.mxu0 %v5624_v28  ;;  %4872 = vmatpush1.bf16.msra.mxu1 %v5628_v33  ;;  %v7336_v28 = vld [vmem:[#allocation31_spill] sm:$0xff]  ;;  %v7337_v33 = vld [vmem:[#allocation32_spill] sm:$0xff] }
 0x843   :  { %4842 = vmatprep.subr.bf16.mxu0 %v5632_v37  ;;  %4874 = vmatprep.subr.bf16.mxu1 %v5636_v41  ;;  %v7338_v37 = vld [vmem:[#allocation33_spill] sm:$0xff]  ;;  %v7339_v41 = vld [vmem:[#allocation34_spill] sm:$0xff] }
 0x846   :  { %4844 = vmatpush1.bf16.msra.mxu0 %v5643_v46  ;;  %4876 = vmatpush1.bf16.msra.mxu1 %v5647_v50  ;;  %v7340_v46 = vld [vmem:[#allocation35_spill] sm:$0xff]  ;;  %v7341_v50 = vld [vmem:[#allocation36_spill] sm:$0xff] }
 0x847   :  { %4846 = vmatprep.subr.bf16.mxu0 %v5651_v54  ;;  %4878 = vmatprep.subr.bf16.mxu1 %v5655_v59  ;;  %v7342_v54 = vld [vmem:[#allocation37_spill] sm:$0xff]  ;;  %v7343_v59 = vld [vmem:[#allocation38_spill] sm:$0xff] }
 0x84a   :  { %4848 = vmatpush1.bf16.msra.mxu0 %v5662_v1  ;;  %4880 = vmatpush1.bf16.msra.mxu1 %v5666_v6  ;;  %v7344_v1 = vld [vmem:[#allocation39_spill] sm:$0xff]  ;;  %v7345_v6 = vld [vmem:[#allocation40_spill] sm:$0xff] }
 0x84b   :  { %4850 = vmatprep.subr.bf16.mxu0 %v5670_v10  ;;  %4882 = vmatprep.subr.bf16.mxu1 %v5674_v14  ;;  %v7346_v10 = vld [vmem:[#allocation41_spill] sm:$0xff]  ;;  %v7347_v14 = vld [vmem:[#allocation42_spill] sm:$0xff] }
 0x84e   :  { %4852 = vmatpush1.bf16.msra.mxu0 %v5681_v20  ;;  %4884 = vmatpush1.bf16.msra.mxu1 %v5685_v25  ;;  %v7348_v20 = vld [vmem:[#allocation43_spill] sm:$0xff]  ;;  %v7349_v25 = vld [vmem:[#allocation44_spill] sm:$0xff] }
 0x84f   :  { %4886 = vmatprep.subr.bf16.mxu0 %v5689_v32  ;;  %4950 = vmatprep.subr.bf16.mxu1 %v5693_v40  ;;  %v7350_v32 = vld [vmem:[#allocation45_spill] sm:$0xff]  ;;  %v7351_v40 = vld [vmem:[#allocation46_spill] sm:$0xff] }
 0x851   :  { %3094 = vmatmul.mubr.f32.vlgmr.msra.gmra.mrb[14].mxu0 %v2855_v56  ;;  %3165 = vmatmul.mubr.f32.vlgmr.msra.gmra.mrb[14].mxu1 %v2855_v56 }
 0x852   :  { %4888 = vmatpush1.bf16.msra.mxu0 %v5697_v45  ;;  %4952 = vmatpush1.bf16.msra.mxu1 %v5701_v47  ;;  %v7352_v45 = vld [vmem:[#allocation47_spill] sm:$0xff]  ;;  %v7353_v47 = vld [vmem:[#allocation48_spill] sm:$0xff] }
 0x853   :  { %4890 = vmatprep.subr.bf16.mxu0 %v5703_v49  ;;  %4954 = vmatprep.subr.bf16.mxu1 %v5707_v57  ;;  %v7354_v49 = vld [vmem:[#allocation49_spill] sm:$0xff]  ;;  %v7355_v57 = vld [vmem:[#allocation50_spill] sm:$0xff] }
 0x856   :  { %4892 = vmatpush1.bf16.msra.mxu0 %v5713_v7  ;;  %4956 = vmatpush1.bf16.msra.mxu1 %v5717_v9  ;;  %v7356_v7 = vld [vmem:[#allocation51_spill] sm:$0xff]  ;;  %v7357_v9 = vld [vmem:[#allocation52_spill] sm:$0xff] }
 0x857   :  { %4894 = vmatprep.subr.bf16.mxu0 %v5719_v12  ;;  %4958 = vmatprep.subr.bf16.mxu1 %v5722_v19  ;;  %v7358_v12 = vld [vmem:[#allocation53_spill] sm:$0xff]  ;;  %v7359_v19 = vld [vmem:[#allocation54_spill] sm:$0xff] }
 0x85a   :  { %4896 = vmatpush1.bf16.msra.mxu0 %v7320_v36  ;;  %4960 = vmatpush1.bf16.msra.mxu1 %v7321_v39 }
 0x85b   :  { %4898 = vmatprep.subr.bf16.mxu0 %v7322_v43  ;;  %4962 = vmatprep.subr.bf16.mxu1 %v7323_v48 }
 0x85e   :  { %4900 = vmatpush1.bf16.msra.mxu0 %v7324_v51  ;;  %4964 = vmatpush1.bf16.msra.mxu1 %v7325_v55  ;;  %v7375_v55 = vld [vmem:[#allocation74_spill] sm:$0xff] }
 0x85f   :  { %4902 = vmatprep.subr.bf16.mxu0 %v7326_v58  ;;  %4966 = vmatprep.subr.bf16.mxu1 %v7327_v61 }
 0x862   :  { %4904 = vmatpush1.bf16.msra.mxu0 %v7328_v2  ;;  %4968 = vmatpush1.bf16.msra.mxu1 %v7329_v5 }
 0x863   :  { %4906 = vmatprep.subr.bf16.mxu0 %v7330_v8  ;;  %4970 = vmatprep.subr.bf16.mxu1 %v7331_v11 }
 0x866   :  { %4908 = vmatpush1.bf16.msra.mxu0 %v7332_v15  ;;  %4972 = vmatpush1.bf16.msra.mxu1 %v7333_v18 }
 0x867   :  { %4910 = vmatprep.subr.bf16.mxu0 %v7334_v21  ;;  %4974 = vmatprep.subr.bf16.mxu1 %v7335_v24 }
 0x86a   :  { %4912 = vmatpush1.bf16.msra.mxu0 %v7336_v28  ;;  %4976 = vmatpush1.bf16.msra.mxu1 %v7337_v33 }
 0x86b   :  { %4914 = vmatprep.subr.bf16.mxu0 %v7338_v37  ;;  %4978 = vmatprep.subr.bf16.mxu1 %v7339_v41 }
 0x86e   :  { %4916 = vmatpush1.bf16.msra.mxu0 %v7340_v46  ;;  %4980 = vmatpush1.bf16.msra.mxu1 %v7341_v50 }
 0x86f   :  { %4918 = vmatprep.subr.bf16.mxu0 %v7342_v54  ;;  %4982 = vmatprep.subr.bf16.mxu1 %v7343_v59  ;;  %v7376_v59 = vld [vmem:[#allocation70_spill] sm:$0xff] }
 0x872   :  { %4920 = vmatpush1.bf16.msra.mxu0 %v7344_v1  ;;  %4984 = vmatpush1.bf16.msra.mxu1 %v7345_v6 }
 0x873   :  { %4922 = vmatprep.subr.bf16.mxu0 %v7346_v10  ;;  %4986 = vmatprep.subr.bf16.mxu1 %v7347_v14 }
 0x876   :  { %4924 = vmatpush1.bf16.msra.mxu0 %v7348_v20  ;;  %4988 = vmatpush1.bf16.msra.mxu1 %v7349_v25 }
 0x877   :  { %4926 = vmatprep.subr.bf16.mxu0 %v7350_v32  ;;  %4990 = vmatprep.subr.bf16.mxu1 %v7351_v40  ;;  %v7377_v32 = vld [vmem:[#allocation72_spill] sm:$0xff] }
 0x87a   :  { %4928 = vmatpush1.bf16.msra.mxu0 %v7352_v45  ;;  %4992 = vmatpush1.bf16.msra.mxu1 %v7353_v47 }
 0x87b   :  { %4930 = vmatprep.subr.bf16.mxu0 %v7354_v49  ;;  %4994 = vmatprep.subr.bf16.mxu1 %v7355_v57 }
 0x87e   :  { %4932 = vmatpush1.bf16.msra.mxu0 %v7356_v7  ;;  %4996 = vmatpush1.bf16.msra.mxu1 %v7357_v9 }
 0x87f   :  { %4934 = vmatprep.subr.bf16.mxu0 %v7358_v12  ;;  %4998 = vmatprep.subr.bf16.mxu1 %v7359_v19 }
 0x882   :  { %4936 = vmatpush1.bf16.msra.mxu0 %v7360_v17  ;;  %5000 = vmatpush1.bf16.msra.mxu1 %v7361_v0 }
 0x883   :  { %4938 = vmatprep.subr.bf16.mxu0 %v7362_v35  ;;  %5002 = vmatprep.subr.bf16.mxu1 %v7363_v13 }
 0x886   :  { %4940 = vmatpush1.bf16.msra.mxu0 %v7364_v27  ;;  %5004 = vmatpush1.bf16.msra.mxu1 %v7365_v60 }
 0x887   :  { %4942 = vmatprep.subr.bf16.mxu0 %v7366_v44  ;;  %5006 = vmatprep.subr.bf16.mxu1 %v7367_v62 }
 0x88a   :  { %4944 = vmatpush1.bf16.msra.mxu0 %v7368_v52  ;;  %5008 = vmatpush1.bf16.msra.mxu1 %v7369_v4 }
 0x88b   :  { %4946 = vmatprep.subr.bf16.mxu0 %v7370_v29  ;;  %5010 = vmatprep.subr.bf16.mxu1 %v7371_v34 }
 0x88e   :  { %4948 = vmatpush1.bf16.msra.mxu0 %v7372_v16  ;;  %5012 = vmatpush1.bf16.msra.mxu1 %v7373_v22 }
 0x904   :  { %v2922_v53 = vpop.f32.mrb[28].mxu0  ;;  %v2993_v31 = vpop.f32.mrb[28].mxu1 }
 0x905   :  { %v2923_v56 = vadd.f32 %v2922_v53, %v7374_v23  ;;  %v2924_v36 = vpop.f32.mrb[29].mxu0  ;;  %v2995_v39 = vpop.f32.mrb[29].mxu1  ;;  %v2994_v2 = vadd.f32 %v2993_v31, %v7077_v3 }
 0x906   :  { %v2925_v43 = vadd.f32 %v2924_v36, %v7075_v30  ;;  %v2996_v58 = vadd.f32 %v2995_v39, %v7375_v55 }
 0x907   :  { %v3448_v48 = vmul.f32 -1.442695, %v2923_v56 }
 0x908   :  { %v3449_v51 = vmul.f32 -1.442695, %v2925_v43  ;;  %v3450_v61 = vmul.f32 -1.442695, %v2996_v58 }
 0x909   :  { %5293 = vpow2.f32 %v3448_v48 }
 0x90a   :  { %5295 = vpow2.f32 %v3449_v51 }
 0x90b   :  { %5297 = vpow2.f32 %v3450_v61 }
 0x90c   :  { %5299 = vtanh.f32 %v2994_v2 }
 0x913   :  { %v5294_v5 = vpop.eup %5293 }
 0x914   :  { %v5296_v8 = vpop.eup %5295  ;;  %v3001_v11 = vadd.f32 1.0, %v5294_v5 }
 0x915   :  { %v3007_v15 = vadd.f32 1.0, %v5296_v8  ;;  %v5298_v18 = vpop.eup %5297 }
 0x916   :  { %5301 = vrcp.f32 %v3001_v11  ;;  %v5300_v21 = vpop.eup %5299  ;;  %v3014_v37 = vadd.f32 1.0, %v5298_v18 }
 0x917   :  { %5303 = vrcp.f32 %v3007_v15 }
 0x918   :  { %5305 = vrcp.f32 %v3014_v37 }
 0x920   :  { %v5302_v24 = vpop.eup %5301 }
 0x921   :  { %v5304_v28 = vpop.eup %5303  ;;  %v3018_v33 = vmul.f32 %v5302_v24, %v5300_v21 }
 0x922   :  { %v3017_v41 = vmul.f32 %v5304_v28, %v6617_v26  ;;  %v5306_v26 = vpop.eup %5305 }
 0x924   :  { %v3095_v46 = vpop.f32.mrb[14].mxu0  ;;  %v3166_v50 = vpop.f32.mrb[14].mxu1  ;;  %v6729_v54 = vadd.f32 %v3018_v33, %v3017_v41 }
 0x925   :  { %v5027_v1 = vadd.f32 %v3095_v46, %v7376_v59  ;;  %v3097_v6 = vpop.f32.mrb[15].mxu0  ;;  %v3168_v10 = vpop.f32.mrb[15].mxu1  ;;  %v5043_v49 = vadd.f32 %v3166_v50, %v5920_v42 }
 0x926   :  { %v5028_v14 = vadd.f32 %v3097_v6, %v7018_v38  ;;  %5307 = vtanh.f32 %v6729_v54  ;;  %v5044_v40 = vadd.f32 %v3168_v10, %v7377_v32 }
 0x927   :  { %v3451_v20 = vmul.f32 -1.442695, %v5027_v1 }
 0x928   :  { %v3452_v25 = vmul.f32 -1.442695, %v5028_v14  ;;  %v3453_v47 = vmul.f32 -1.442695, %v5044_v40 }
 0x929   :  { %5309 = vpow2.f32 %v3451_v20 }
 0x92a   :  { %5311 = vpow2.f32 %v3452_v25 }
 0x92b   :  { %5313 = vpow2.f32 %v3453_v47 }
 0x92c   :  { %5315 = vtanh.f32 %v5043_v49 }
 0x930   :  { %v5308_v45 = vpop.eup %5307 }
 0x931   :  { %v3021_v57 = vmul.f32 %v5308_v45, %v5306_v26 }
 0x933   :  { %v5310_v7 = vpop.eup %5309  ;;  %3263 = vmatprep.mubr.f32.mxu0 %v3021_v57  ;;  %3334 = vmatprep.mubr.f32.mxu1 %v3021_v57 }
 0x934   :  { %v5312_v9 = vpop.eup %5311  ;;  %v3178_v12 = vadd.f32 1.0, %v5310_v7 }
 0x935   :  { %v3184_v38 = vadd.f32 1.0, %v5312_v9  ;;  %v5314_v19 = vpop.eup %5313 }
 0x936   :  { %5317 = vrcp.f32 %v3178_v12  ;;  %v5316_v17 = vpop.eup %5315  ;;  %v3191_v27 = vadd.f32 1.0, %v5314_v19 }
 0x937   :  { %5319 = vrcp.f32 %v3184_v38 }
 0x938   :  { %5321 = vrcp.f32 %v3191_v27 }
 0x940   :  { %v5318_v0 = vpop.eup %5317 }
 0x941   :  { %v5320_v35 = vpop.eup %5319  ;;  %v3195_v13 = vmul.f32 %v5318_v0, %v5316_v17 }
 0x942   :  { %v3194_v60 = vmul.f32 %v5320_v35, %v6625_v63  ;;  %v5322_v44 = vpop.eup %5321 }
 0x944   :  { %v3196_v42 = vadd.f32 %v3195_v13, %v3194_v60 }
 0x946   :  { %5323 = vtanh.f32 %v3196_v42 }
 0x950   :  { %v5324_v62 = vpop.eup %5323 }
 0x951   :  { %v3198_v52 = vmul.f32 %v5324_v62, %v5322_v44 }
 0x953   :  { %3264 = vmatmul.mubr.f32.vlgmr.msra.gmra.mrb[30].mxu0 %v3198_v52  ;;  %3335 = vmatmul.mubr.f32.vlgmr.msra.gmra.mrb[30].mxu1 %v3198_v52 }
 0xa26   :  { %v3265_v4 = vpop.f32.mrb[30].mxu0  ;;  %v3336_v29 = vpop.f32.mrb[30].mxu1 }
 0xa27   :  { %v3266_v34 = vadd.f32 %v3265_v4, %v7374_v23  ;;  %v3267_v16 = vpop.f32.mrb[31].mxu0  ;;  %v3338_v22 = vpop.f32.mrb[31].mxu1  ;;  %v3337_v39 = vadd.f32 %v3336_v29, %v7077_v3 }
 0xa28   :  { %v3268_v53 = vadd.f32 %v3267_v16, %v7075_v30  ;;  %v3339_v63 = vadd.f32 %v3338_v22, %v7375_v55 }
 0xa29   :  { %v3454_v31 = vmul.f32 -1.442695, %v3266_v34 }
 0xa2a   :  { %v3455_v56 = vmul.f32 -1.442695, %v3268_v53  ;;  %v3456_v36 = vmul.f32 -1.442695, %v3339_v63 }
 0xa2b   :  { %5325 = vpow2.f32 %v3454_v31 }
 0xa2c   :  { %5327 = vpow2.f32 %v3455_v56 }
 0xa2d   :  { %5329 = vpow2.f32 %v3456_v36 }
 0xa2e   :  { %5331 = vtanh.f32 %v3337_v39 }
 0xa35   :  { %v5326_v43 = vpop.eup %5325 }
 0xa36   :  { %v5328_v48 = vpop.eup %5327  ;;  %v3344_v51 = vadd.f32 1.0, %v5326_v43 }
 0xa37   :  { %v3350_v58 = vadd.f32 1.0, %v5328_v48  ;;  %v5330_v23 = vpop.eup %5329 }
 0xa38   :  { %5333 = vrcp.f32 %v3344_v51  ;;  %v5332_v61 = vpop.eup %5331  ;;  %v3357_v8 = vadd.f32 1.0, %v5330_v23 }
 0xa39   :  { %5335 = vrcp.f32 %v3350_v58 }
 0xa3a   :  { %5337 = vrcp.f32 %v3357_v8 }
 0xa42   :  { %v5334_v30 = vpop.eup %5333 }
 0xa43   :  { %v5336_v2 = vpop.eup %5335  ;;  %v3361_v5 = vmul.f32 %v5334_v30, %v5332_v61 }
 0xa44   :  { %v3360_v11 = vmul.f32 %v5336_v2, %v6729_v54  ;;  %v5338_v3 = vpop.eup %5337 }
 0xa46   :  { %v3362_v55 = vadd.f32 %v3361_v5, %v3360_v11 }
 0xa48   :  { %5339 = vtanh.f32 %v3362_v55 }
 0xa52   :  { %v5340_v15 = vpop.eup %5339 }
 0xa53   :  { %v3364_v18 = vmul.f32 %v5340_v15, %v5338_v3 }
 0xa55   :  { %3365 = vst [vmem:[#allocation9] sm:$0xff] %v3364_v18 }
 0xa56   :  { %5418 = shalt.err (!%p5415_p0)
}
 0xa57   :  { %s5419_s30 = scalar_lea.hbm %s6760_s6, 128 }
 0xa58   :  { %p5420_p1 = scmp.ne.s32.totalorder %s6760_s6, %s5419_s30  ;;  %p5423_p2 = scmp.lt.u32.totalorder %s5419_s30, %s6760_s6 }
 0xa5a   :  { %p5425_p3 = pnand %p5423_p2, %p5420_p1 }
 0xa5c   :  { %5428 = shalt.err (!%p5425_p3)
}
 0xa5d   :  { %3375 = dma.vmem_to_hbm [thread:$0]  %s3373_s26, 128, %s6760_s6, [#allocation5]  }
 0xa5e   :  { %5433 = dma.done.wait [#allocation5], 128  }
 0xa5f   :  { %5434 = vsyncadd [#allocation5], 4294967168 }
 0xa60   :  { %3379 = vsyncpa [#allocation4], 1 }
 0xa61   :  { %3380 = vsyncpa [#allocation7], 1 }
 0xa62   :  { %3381 = vsyncpa [#allocation5], 1 }

</bundles_post_ra>
